<compile_context>
chip_gen: v6e
topology: v6e:2x2x1
jax: 0.10.0
libtpu: 0.0.40
codegen_flags: <defaults>
</compile_context>

<pallas_src>
import jax
import jax.numpy as jnp
from jax.experimental import pallas as pl
from jax.experimental.pallas import tpu as pltpu  # noqa: F401  (TPU backend assumed)

jax.config.update("jax_default_matmul_precision", "highest")

NEG_SLOPE = 0.3
BN_EPS = 1e-5
MAX_PAD = 4          # largest kernel is 1x9 -> "same" pad of 4 along W


def _lrelu(x):
    return jnp.where(x >= 0, x, NEG_SLOPE * x)


# --------------------------------- kernel ------------------------------------
def _fblock_kernel(x_ref, masks_ref,
                   w13_ref, b13_ref,      # path1.conv1x3_bn : 2  -> 7
                   w19_ref, b19_ref,      # path1.conv1x9_bn : 7  -> 7
                   w15_ref, b15_ref,      # path2.conv1x5_bn : 2  -> 7
                   w11_ref, b11_ref,      # conv1x1          : 14 -> 2
                   o_ref):
    x = x_ref[...]                        # (2, R) f32, R = N*H*W (lane-dense)
    masks = masks_ref[...]                # (2*MAX_PAD+1, R) 0/1 f32

    def shift_w(a, d):
        # out[:, r] = a[:, r + d]; wrapped positions are zeroed by the mask.
        if d == 0:
            return a
        return jnp.concatenate([a[:, d:], a[:, :d]], axis=1)

    def conv1xk(a, w, b):
        # a: (c_in, R), w: (K, c_out, c_in), b: (c_out, 1) -> (c_out, R)
        k = w.shape[0]
        p = (k - 1) // 2
        acc = jnp.zeros((w.shape[1], a.shape[1]), jnp.float32)
        for t in range(k):                                    # static unroll, K <= 9
            d = t - p
            xs = shift_w(a, d)
            if d != 0:
                xs = xs * masks[d + MAX_PAD:d + MAX_PAD + 1]  # zero "same" padding
            acc = acc + jnp.dot(w[t], xs, preferred_element_type=jnp.float32)
        return acc + b                                        # folded BN bias

    out1 = _lrelu(conv1xk(x, w13_ref[...], b13_ref[...]))
    out1 = conv1xk(out1, w19_ref[...], b19_ref[...])
    out2 = conv1xk(x, w15_ref[...], b15_ref[...])
    cat = _lrelu(jnp.concatenate([out1, out2], axis=0))       # (14, R)
    y = conv1xk(cat, w11_ref[...], b11_ref[...])              # (2, R)
    o_ref[...] = _lrelu(y + x)                                # residual + LeakyReLU


# ------------------------------ pallas_call glue ------------------------------
def _full_spec(shape):
    nd = len(shape)
    return pl.BlockSpec(shape, lambda *_: (0,) * nd)


def fblock_forward(x, kparams):
    """x: (N, 2, H, W) float32. kparams: folded conv/BN params (see fold_for_kernel)."""
    n, c, h, w = x.shape
    assert c == 2, "FBlock expects 2 input channels"
    r = n * h * w

    # lane-dense layout: (C, N*H*W), batch/height folded into the lane axis
    x_flat = jnp.transpose(x, (1, 0, 2, 3)).reshape(c, r).astype(jnp.float32)

    # 0/1 masks that reproduce zero "same" padding of the 1xK convs at W-row
    # boundaries of the flattened axis (tap offsets d = -MAX_PAD..MAX_PAD).
    wpos = jnp.arange(r, dtype=jnp.int32) % w
    masks = jnp.stack(
        [((wpos + d >= 0) & (wpos + d < w)).astype(jnp.float32)
         for d in range(-MAX_PAD, MAX_PAD + 1)], axis=0)      # (9, R)

    (w13, b13), (w19, b19), (w15, b15), (w11, b11) = kparams
    ins = [x_flat, masks, w13, b13, w19, b19, w15, b15, w11, b11]

    out_flat = pl.pallas_call(
        _fblock_kernel,
        out_shape=jax.ShapeDtypeStruct((c, r), jnp.float32),
        grid=(1,),
        in_specs=[_full_spec(a.shape) for a in ins],
        out_specs=_full_spec((c, r)),
    )(*ins)

    return jnp.transpose(out_flat.reshape(c, n, h, w), (1, 0, 2, 3))


# --------------------------- parameters & BN folding --------------------------
def init_params(key):
    """Raw (PyTorch-layout) ConvBN params with default-initialized BatchNorm."""
    def conv_bn(k, c_out, c_in, kw):
        bound = (c_in * kw) ** -0.5
        w = jax.random.uniform(k, (c_out, c_in, 1, kw), jnp.float32, -bound, bound)
        return dict(w=w,
                    gamma=jnp.ones((c_out,), jnp.float32),
                    beta=jnp.zeros((c_out,), jnp.float32),
                    mean=jnp.zeros((c_out,), jnp.float32),
                    var=jnp.ones((c_out,), jnp.float32))

    k1, k2, k3, k4 = jax.random.split(key, 4)
    return [conv_bn(k1, 7, 2, 3),     # path1.conv1x3_bn
            conv_bn(k2, 7, 7, 9),     # path1.conv1x9_bn
            conv_bn(k3, 7, 2, 5),     # path2.conv1x5_bn
            conv_bn(k4, 2, 14, 1)]    # conv1x1


def fold_for_kernel(raw_params):
    """Fold eval-mode BN into conv weights; reshape to (K, c_out, c_in) + (c_out,1)."""
    folded = []
    for p in raw_params:
        scale = p["gamma"] / jnp.sqrt(p["var"] + BN_EPS)            # (c_out,)
        bias = p["beta"] - p["mean"] * scale                        # (c_out,)
        w = p["w"] * scale[:, None, None, None]                     # (c_out,c_in,1,K)
        w_k = jnp.transpose(w[:, :, 0, :], (2, 0, 1))               # (K,c_out,c_in)
        folded.append((w_k, bias[:, None]))
    return folded


# --------------------------- pure-JAX reference check -------------------------
def _conv_bn_ref(x, p):
    kw = p["w"].shape[-1]
    pad = (kw - 1) // 2
    y = jax.lax.conv_general_dilated(
        x, p["w"], window_strides=(1, 1), padding=[(0, 0), (pad, pad)],
        dimension_numbers=("NCHW", "OIHW", "NCHW"))
    scale = p["gamma"] / jnp.sqrt(p["var"] + BN_EPS)
    bias = p["beta"] - p["mean"] * scale
    return y * scale[None, :, None, None] + bias[None, :, None, None]


def fblock_reference(x, raw_params):
    p13, p19, p15, p11 = raw_params
    out1 = _conv_bn_ref(_lrelu(_conv_bn_ref(x, p13)), p19)
    out2 = _conv_bn_ref(x, p15)
    out = _lrelu(jnp.concatenate([out1, out2], axis=1))
    out = _conv_bn_ref(out, p11)
    return _lrelu(out + x)


# ------------------------------------ main ------------------------------------
if __name__ == "__main__":
    key = jax.random.PRNGKey(0)
    pkey, xkey = jax.random.split(key)

    raw_params = init_params(pkey)
    kparams = fold_for_kernel(raw_params)

    # FBlock input: NCHW with 2 channels; N*H*W chosen as a multiple of 128.
    N, C, H, W = 2, 2, 8, 32
    x = jax.random.normal(xkey, (N, C, H, W), jnp.float32)

    out = jax.block_until_ready(fblock_forward(x, kparams))
    assert out.shape == x.shape
    assert bool(jnp.all(jnp.isfinite(out)))

    ref = fblock_reference(x, raw_params)
    max_err = float(jnp.max(jnp.abs(out - ref)))
    assert max_err < 2e-2, f"mismatch vs reference: max abs err = {max_err}"

    print("KERNEL_OK")
</pallas_src>

<mosaic_0001>
module attributes {stable_mosaic.version = 11 : i64} {
  func.func @_fblock_kernel(%arg0: i32, %arg1: memref<2x512xf32, #tpu.memory_space<vmem>>, %arg2: memref<9x512xf32, #tpu.memory_space<vmem>>, %arg3: memref<3x7x2xf32, #tpu.memory_space<vmem>>, %arg4: memref<7x1xf32, #tpu.memory_space<vmem>>, %arg5: memref<9x7x7xf32, #tpu.memory_space<vmem>>, %arg6: memref<7x1xf32, #tpu.memory_space<vmem>>, %arg7: memref<5x7x2xf32, #tpu.memory_space<vmem>>, %arg8: memref<7x1xf32, #tpu.memory_space<vmem>>, %arg9: memref<1x2x14xf32, #tpu.memory_space<vmem>>, %arg10: memref<2x1xf32, #tpu.memory_space<vmem>>, %arg11: memref<2x512xf32, #tpu.memory_space<vmem>>) attributes {dimension_semantics = [#tpu.dimension_semantics<arbitrary>], iteration_bounds = array<i64: 1>, scalar_prefetch = 0 : i64, scratch_operands = 0 : i64, tpu.core_type = #tpu.core_type<tc>, window_params = [{pipeline_mode = #tpu.pipeline_mode<synchronous>, transform_indices = @transform_0, window_bounds = array<i64: 2, 512>}, {pipeline_mode = #tpu.pipeline_mode<synchronous>, transform_indices = @transform_1, window_bounds = array<i64: 9, 512>}, {pipeline_mode = #tpu.pipeline_mode<synchronous>, transform_indices = @transform_2, window_bounds = array<i64: 3, 7, 2>}, {pipeline_mode = #tpu.pipeline_mode<synchronous>, transform_indices = @transform_3, window_bounds = array<i64: 7, 1>}, {pipeline_mode = #tpu.pipeline_mode<synchronous>, transform_indices = @transform_4, window_bounds = array<i64: 9, 7, 7>}, {pipeline_mode = #tpu.pipeline_mode<synchronous>, transform_indices = @transform_5, window_bounds = array<i64: 7, 1>}, {pipeline_mode = #tpu.pipeline_mode<synchronous>, transform_indices = @transform_6, window_bounds = array<i64: 5, 7, 2>}, {pipeline_mode = #tpu.pipeline_mode<synchronous>, transform_indices = @transform_7, window_bounds = array<i64: 7, 1>}, {pipeline_mode = #tpu.pipeline_mode<synchronous>, transform_indices = @transform_8, window_bounds = array<i64: 1, 2, 14>}, {pipeline_mode = #tpu.pipeline_mode<synchronous>, transform_indices = @transform_9, window_bounds = array<i64: 2, 1>}, {pipeline_mode = #tpu.pipeline_mode<synchronous>, transform_indices = @transform_10, window_bounds = array<i64: 2, 512>}]} {
    %c0 = arith.constant 0 : index
    %c0_0 = arith.constant 0 : index
    %0 = vector.load %arg1[%c0, %c0_0] : memref<2x512xf32, #tpu.memory_space<vmem>>, vector<2x512xf32>
    %c0_1 = arith.constant 0 : index
    %c0_2 = arith.constant 0 : index
    %1 = vector.load %arg2[%c0_1, %c0_2] : memref<9x512xf32, #tpu.memory_space<vmem>>, vector<9x512xf32>
    %c0_3 = arith.constant 0 : index
    %c0_4 = arith.constant 0 : index
    %c0_5 = arith.constant 0 : index
    %2 = vector.load %arg3[%c0_3, %c0_4, %c0_5] : memref<3x7x2xf32, #tpu.memory_space<vmem>>, vector<3x7x2xf32>
    %c0_6 = arith.constant 0 : index
    %c0_7 = arith.constant 0 : index
    %3 = vector.load %arg4[%c0_6, %c0_7] : memref<7x1xf32, #tpu.memory_space<vmem>>, vector<7x1xf32>
    %cst = arith.constant 0.000000e+00 : f32
    %4 = vector.broadcast %cst : f32 to vector<7x512xf32>
    %5 = vector.extract_strided_slice %0 {offsets = [0, 511], sizes = [2, 1], strides = [1, 1]} : vector<2x512xf32> to vector<2x1xf32>
    %6 = vector.extract_strided_slice %0 {offsets = [0, 0], sizes = [2, 511], strides = [1, 1]} : vector<2x512xf32> to vector<2x511xf32>
    %7 = tpu.concatenate %5, %6 in 1 : vector<2x1xf32>, vector<2x511xf32> -> vector<2x512xf32>
    %8 = vector.extract_strided_slice %1 {offsets = [3, 0], sizes = [1, 512], strides = [1, 1]} : vector<9x512xf32> to vector<1x512xf32>
    %9 = vector.broadcast %8 : vector<1x512xf32> to vector<2x512xf32>
    %10 = arith.mulf %7, %9 : vector<2x512xf32>
    %11 = vector.extract_strided_slice %2 {offsets = [0, 0, 0], sizes = [1, 7, 2], strides = [1, 1, 1]} : vector<3x7x2xf32> to vector<1x7x2xf32>
    %12 = vector.shape_cast %11 : vector<1x7x2xf32> to vector<7x2xf32>
    %cst_8 = arith.constant dense<0.000000e+00> : vector<7x512xf32>
    %13 = tpu.matmul %12, %10, %cst_8 {dimension_numbers = #tpu.dot_dimension_numbers<[1], [0], [0], [1], [0, 0, 1, 1], [], []>, precision = #tpu.contract_precision<fp32>} : vector<7x2xf32>, vector<2x512xf32>, vector<7x512xf32> -> vector<7x512xf32>
    %14 = arith.addf %4, %13 : vector<7x512xf32>
    %15 = vector.extract_strided_slice %2 {offsets = [1, 0, 0], sizes = [1, 7, 2], strides = [1, 1, 1]} : vector<3x7x2xf32> to vector<1x7x2xf32>
    %16 = vector.shape_cast %15 : vector<1x7x2xf32> to vector<7x2xf32>
    %cst_9 = arith.constant dense<0.000000e+00> : vector<7x512xf32>
    %17 = tpu.matmul %16, %0, %cst_9 {dimension_numbers = #tpu.dot_dimension_numbers<[1], [0], [0], [1], [0, 0, 1, 1], [], []>, precision = #tpu.contract_precision<fp32>} : vector<7x2xf32>, vector<2x512xf32>, vector<7x512xf32> -> vector<7x512xf32>
    %18 = arith.addf %14, %17 : vector<7x512xf32>
    %19 = vector.extract_strided_slice %0 {offsets = [0, 1], sizes = [2, 511], strides = [1, 1]} : vector<2x512xf32> to vector<2x511xf32>
    %20 = vector.extract_strided_slice %0 {offsets = [0, 0], sizes = [2, 1], strides = [1, 1]} : vector<2x512xf32> to vector<2x1xf32>
    %21 = tpu.concatenate %19, %20 in 1 : vector<2x511xf32>, vector<2x1xf32> -> vector<2x512xf32>
    %22 = vector.extract_strided_slice %1 {offsets = [5, 0], sizes = [1, 512], strides = [1, 1]} : vector<9x512xf32> to vector<1x512xf32>
    %23 = vector.broadcast %22 : vector<1x512xf32> to vector<2x512xf32>
    %24 = arith.mulf %21, %23 : vector<2x512xf32>
    %25 = vector.extract_strided_slice %2 {offsets = [2, 0, 0], sizes = [1, 7, 2], strides = [1, 1, 1]} : vector<3x7x2xf32> to vector<1x7x2xf32>
    %26 = vector.shape_cast %25 : vector<1x7x2xf32> to vector<7x2xf32>
    %cst_10 = arith.constant dense<0.000000e+00> : vector<7x512xf32>
    %27 = tpu.matmul %26, %24, %cst_10 {dimension_numbers = #tpu.dot_dimension_numbers<[1], [0], [0], [1], [0, 0, 1, 1], [], []>, precision = #tpu.contract_precision<fp32>} : vector<7x2xf32>, vector<2x512xf32>, vector<7x512xf32> -> vector<7x512xf32>
    %28 = arith.addf %18, %27 : vector<7x512xf32>
    %29 = vector.broadcast %3 : vector<7x1xf32> to vector<7x512xf32>
    %30 = arith.addf %28, %29 : vector<7x512xf32>
    %cst_11 = arith.constant 0.000000e+00 : f32
    %31 = vector.broadcast %cst_11 : f32 to vector<7x512xf32>
    %32 = arith.cmpf oge, %30, %31 : vector<7x512xf32>
    %cst_12 = arith.constant 3.000000e-01 : f32
    %33 = vector.broadcast %cst_12 : f32 to vector<7x512xf32>
    %34 = arith.mulf %33, %30 : vector<7x512xf32>
    %35 = arith.select %32, %30, %34 : vector<7x512xi1>, vector<7x512xf32>
    %c0_13 = arith.constant 0 : index
    %c0_14 = arith.constant 0 : index
    %c0_15 = arith.constant 0 : index
    %36 = vector.load %arg5[%c0_13, %c0_14, %c0_15] : memref<9x7x7xf32, #tpu.memory_space<vmem>>, vector<9x7x7xf32>
    %c0_16 = arith.constant 0 : index
    %c0_17 = arith.constant 0 : index
    %37 = vector.load %arg6[%c0_16, %c0_17] : memref<7x1xf32, #tpu.memory_space<vmem>>, vector<7x1xf32>
    %cst_18 = arith.constant 0.000000e+00 : f32
    %38 = vector.broadcast %cst_18 : f32 to vector<7x512xf32>
    %39 = vector.extract_strided_slice %35 {offsets = [0, 508], sizes = [7, 4], strides = [1, 1]} : vector<7x512xf32> to vector<7x4xf32>
    %40 = vector.extract_strided_slice %35 {offsets = [0, 0], sizes = [7, 508], strides = [1, 1]} : vector<7x512xf32> to vector<7x508xf32>
    %41 = tpu.concatenate %39, %40 in 1 : vector<7x4xf32>, vector<7x508xf32> -> vector<7x512xf32>
    %42 = vector.extract_strided_slice %1 {offsets = [0, 0], sizes = [1, 512], strides = [1, 1]} : vector<9x512xf32> to vector<1x512xf32>
    %43 = vector.broadcast %42 : vector<1x512xf32> to vector<7x512xf32>
    %44 = arith.mulf %41, %43 : vector<7x512xf32>
    %45 = vector.extract_strided_slice %36 {offsets = [0, 0, 0], sizes = [1, 7, 7], strides = [1, 1, 1]} : vector<9x7x7xf32> to vector<1x7x7xf32>
    %46 = vector.shape_cast %45 : vector<1x7x7xf32> to vector<7x7xf32>
    %cst_19 = arith.constant dense<0.000000e+00> : vector<7x512xf32>
    %47 = tpu.matmul %46, %44, %cst_19 {dimension_numbers = #tpu.dot_dimension_numbers<[1], [0], [0], [1], [0, 0, 1, 1], [], []>, precision = #tpu.contract_precision<fp32>} : vector<7x7xf32>, vector<7x512xf32>, vector<7x512xf32> -> vector<7x512xf32>
    %48 = arith.addf %38, %47 : vector<7x512xf32>
    %49 = vector.extract_strided_slice %35 {offsets = [0, 509], sizes = [7, 3], strides = [1, 1]} : vector<7x512xf32> to vector<7x3xf32>
    %50 = vector.extract_strided_slice %35 {offsets = [0, 0], sizes = [7, 509], strides = [1, 1]} : vector<7x512xf32> to vector<7x509xf32>
    %51 = tpu.concatenate %49, %50 in 1 : vector<7x3xf32>, vector<7x509xf32> -> vector<7x512xf32>
    %52 = vector.extract_strided_slice %1 {offsets = [1, 0], sizes = [1, 512], strides = [1, 1]} : vector<9x512xf32> to vector<1x512xf32>
    %53 = vector.broadcast %52 : vector<1x512xf32> to vector<7x512xf32>
    %54 = arith.mulf %51, %53 : vector<7x512xf32>
    %55 = vector.extract_strided_slice %36 {offsets = [1, 0, 0], sizes = [1, 7, 7], strides = [1, 1, 1]} : vector<9x7x7xf32> to vector<1x7x7xf32>
    %56 = vector.shape_cast %55 : vector<1x7x7xf32> to vector<7x7xf32>
    %cst_20 = arith.constant dense<0.000000e+00> : vector<7x512xf32>
    %57 = tpu.matmul %56, %54, %cst_20 {dimension_numbers = #tpu.dot_dimension_numbers<[1], [0], [0], [1], [0, 0, 1, 1], [], []>, precision = #tpu.contract_precision<fp32>} : vector<7x7xf32>, vector<7x512xf32>, vector<7x512xf32> -> vector<7x512xf32>
    %58 = arith.addf %48, %57 : vector<7x512xf32>
    %59 = vector.extract_strided_slice %35 {offsets = [0, 510], sizes = [7, 2], strides = [1, 1]} : vector<7x512xf32> to vector<7x2xf32>
    %60 = vector.extract_strided_slice %35 {offsets = [0, 0], sizes = [7, 510], strides = [1, 1]} : vector<7x512xf32> to vector<7x510xf32>
    %61 = tpu.concatenate %59, %60 in 1 : vector<7x2xf32>, vector<7x510xf32> -> vector<7x512xf32>
    %62 = vector.extract_strided_slice %1 {offsets = [2, 0], sizes = [1, 512], strides = [1, 1]} : vector<9x512xf32> to vector<1x512xf32>
    %63 = vector.broadcast %62 : vector<1x512xf32> to vector<7x512xf32>
    %64 = arith.mulf %61, %63 : vector<7x512xf32>
    %65 = vector.extract_strided_slice %36 {offsets = [2, 0, 0], sizes = [1, 7, 7], strides = [1, 1, 1]} : vector<9x7x7xf32> to vector<1x7x7xf32>
    %66 = vector.shape_cast %65 : vector<1x7x7xf32> to vector<7x7xf32>
    %cst_21 = arith.constant dense<0.000000e+00> : vector<7x512xf32>
    %67 = tpu.matmul %66, %64, %cst_21 {dimension_numbers = #tpu.dot_dimension_numbers<[1], [0], [0], [1], [0, 0, 1, 1], [], []>, precision = #tpu.contract_precision<fp32>} : vector<7x7xf32>, vector<7x512xf32>, vector<7x512xf32> -> vector<7x512xf32>
    %68 = arith.addf %58, %67 : vector<7x512xf32>
    %69 = vector.extract_strided_slice %35 {offsets = [0, 511], sizes = [7, 1], strides = [1, 1]} : vector<7x512xf32> to vector<7x1xf32>
    %70 = vector.extract_strided_slice %35 {offsets = [0, 0], sizes = [7, 511], strides = [1, 1]} : vector<7x512xf32> to vector<7x511xf32>
    %71 = tpu.concatenate %69, %70 in 1 : vector<7x1xf32>, vector<7x511xf32> -> vector<7x512xf32>
    %72 = vector.extract_strided_slice %1 {offsets = [3, 0], sizes = [1, 512], strides = [1, 1]} : vector<9x512xf32> to vector<1x512xf32>
    %73 = vector.broadcast %72 : vector<1x512xf32> to vector<7x512xf32>
    %74 = arith.mulf %71, %73 : vector<7x512xf32>
    %75 = vector.extract_strided_slice %36 {offsets = [3, 0, 0], sizes = [1, 7, 7], strides = [1, 1, 1]} : vector<9x7x7xf32> to vector<1x7x7xf32>
    %76 = vector.shape_cast %75 : vector<1x7x7xf32> to vector<7x7xf32>
    %cst_22 = arith.constant dense<0.000000e+00> : vector<7x512xf32>
    %77 = tpu.matmul %76, %74, %cst_22 {dimension_numbers = #tpu.dot_dimension_numbers<[1], [0], [0], [1], [0, 0, 1, 1], [], []>, precision = #tpu.contract_precision<fp32>} : vector<7x7xf32>, vector<7x512xf32>, vector<7x512xf32> -> vector<7x512xf32>
    %78 = arith.addf %68, %77 : vector<7x512xf32>
    %79 = vector.extract_strided_slice %36 {offsets = [4, 0, 0], sizes = [1, 7, 7], strides = [1, 1, 1]} : vector<9x7x7xf32> to vector<1x7x7xf32>
    %80 = vector.shape_cast %79 : vector<1x7x7xf32> to vector<7x7xf32>
    %cst_23 = arith.constant dense<0.000000e+00> : vector<7x512xf32>
    %81 = tpu.matmul %80, %35, %cst_23 {dimension_numbers = #tpu.dot_dimension_numbers<[1], [0], [0], [1], [0, 0, 1, 1], [], []>, precision = #tpu.contract_precision<fp32>} : vector<7x7xf32>, vector<7x512xf32>, vector<7x512xf32> -> vector<7x512xf32>
    %82 = arith.addf %78, %81 : vector<7x512xf32>
    %83 = vector.extract_strided_slice %35 {offsets = [0, 1], sizes = [7, 511], strides = [1, 1]} : vector<7x512xf32> to vector<7x511xf32>
    %84 = vector.extract_strided_slice %35 {offsets = [0, 0], sizes = [7, 1], strides = [1, 1]} : vector<7x512xf32> to vector<7x1xf32>
    %85 = tpu.concatenate %83, %84 in 1 : vector<7x511xf32>, vector<7x1xf32> -> vector<7x512xf32>
    %86 = vector.extract_strided_slice %1 {offsets = [5, 0], sizes = [1, 512], strides = [1, 1]} : vector<9x512xf32> to vector<1x512xf32>
    %87 = vector.broadcast %86 : vector<1x512xf32> to vector<7x512xf32>
    %88 = arith.mulf %85, %87 : vector<7x512xf32>
    %89 = vector.extract_strided_slice %36 {offsets = [5, 0, 0], sizes = [1, 7, 7], strides = [1, 1, 1]} : vector<9x7x7xf32> to vector<1x7x7xf32>
    %90 = vector.shape_cast %89 : vector<1x7x7xf32> to vector<7x7xf32>
    %cst_24 = arith.constant dense<0.000000e+00> : vector<7x512xf32>
    %91 = tpu.matmul %90, %88, %cst_24 {dimension_numbers = #tpu.dot_dimension_numbers<[1], [0], [0], [1], [0, 0, 1, 1], [], []>, precision = #tpu.contract_precision<fp32>} : vector<7x7xf32>, vector<7x512xf32>, vector<7x512xf32> -> vector<7x512xf32>
    %92 = arith.addf %82, %91 : vector<7x512xf32>
    %93 = vector.extract_strided_slice %35 {offsets = [0, 2], sizes = [7, 510], strides = [1, 1]} : vector<7x512xf32> to vector<7x510xf32>
    %94 = vector.extract_strided_slice %35 {offsets = [0, 0], sizes = [7, 2], strides = [1, 1]} : vector<7x512xf32> to vector<7x2xf32>
    %95 = tpu.concatenate %93, %94 in 1 : vector<7x510xf32>, vector<7x2xf32> -> vector<7x512xf32>
    %96 = vector.extract_strided_slice %1 {offsets = [6, 0], sizes = [1, 512], strides = [1, 1]} : vector<9x512xf32> to vector<1x512xf32>
    %97 = vector.broadcast %96 : vector<1x512xf32> to vector<7x512xf32>
    %98 = arith.mulf %95, %97 : vector<7x512xf32>
    %99 = vector.extract_strided_slice %36 {offsets = [6, 0, 0], sizes = [1, 7, 7], strides = [1, 1, 1]} : vector<9x7x7xf32> to vector<1x7x7xf32>
    %100 = vector.shape_cast %99 : vector<1x7x7xf32> to vector<7x7xf32>
    %cst_25 = arith.constant dense<0.000000e+00> : vector<7x512xf32>
    %101 = tpu.matmul %100, %98, %cst_25 {dimension_numbers = #tpu.dot_dimension_numbers<[1], [0], [0], [1], [0, 0, 1, 1], [], []>, precision = #tpu.contract_precision<fp32>} : vector<7x7xf32>, vector<7x512xf32>, vector<7x512xf32> -> vector<7x512xf32>
    %102 = arith.addf %92, %101 : vector<7x512xf32>
    %103 = vector.extract_strided_slice %35 {offsets = [0, 3], sizes = [7, 509], strides = [1, 1]} : vector<7x512xf32> to vector<7x509xf32>
    %104 = vector.extract_strided_slice %35 {offsets = [0, 0], sizes = [7, 3], strides = [1, 1]} : vector<7x512xf32> to vector<7x3xf32>
    %105 = tpu.concatenate %103, %104 in 1 : vector<7x509xf32>, vector<7x3xf32> -> vector<7x512xf32>
    %106 = vector.extract_strided_slice %1 {offsets = [7, 0], sizes = [1, 512], strides = [1, 1]} : vector<9x512xf32> to vector<1x512xf32>
    %107 = vector.broadcast %106 : vector<1x512xf32> to vector<7x512xf32>
    %108 = arith.mulf %105, %107 : vector<7x512xf32>
    %109 = vector.extract_strided_slice %36 {offsets = [7, 0, 0], sizes = [1, 7, 7], strides = [1, 1, 1]} : vector<9x7x7xf32> to vector<1x7x7xf32>
    %110 = vector.shape_cast %109 : vector<1x7x7xf32> to vector<7x7xf32>
    %cst_26 = arith.constant dense<0.000000e+00> : vector<7x512xf32>
    %111 = tpu.matmul %110, %108, %cst_26 {dimension_numbers = #tpu.dot_dimension_numbers<[1], [0], [0], [1], [0, 0, 1, 1], [], []>, precision = #tpu.contract_precision<fp32>} : vector<7x7xf32>, vector<7x512xf32>, vector<7x512xf32> -> vector<7x512xf32>
    %112 = arith.addf %102, %111 : vector<7x512xf32>
    %113 = vector.extract_strided_slice %35 {offsets = [0, 4], sizes = [7, 508], strides = [1, 1]} : vector<7x512xf32> to vector<7x508xf32>
    %114 = vector.extract_strided_slice %35 {offsets = [0, 0], sizes = [7, 4], strides = [1, 1]} : vector<7x512xf32> to vector<7x4xf32>
    %115 = tpu.concatenate %113, %114 in 1 : vector<7x508xf32>, vector<7x4xf32> -> vector<7x512xf32>
    %116 = vector.extract_strided_slice %1 {offsets = [8, 0], sizes = [1, 512], strides = [1, 1]} : vector<9x512xf32> to vector<1x512xf32>
    %117 = vector.broadcast %116 : vector<1x512xf32> to vector<7x512xf32>
    %118 = arith.mulf %115, %117 : vector<7x512xf32>
    %119 = vector.extract_strided_slice %36 {offsets = [8, 0, 0], sizes = [1, 7, 7], strides = [1, 1, 1]} : vector<9x7x7xf32> to vector<1x7x7xf32>
    %120 = vector.shape_cast %119 : vector<1x7x7xf32> to vector<7x7xf32>
    %cst_27 = arith.constant dense<0.000000e+00> : vector<7x512xf32>
    %121 = tpu.matmul %120, %118, %cst_27 {dimension_numbers = #tpu.dot_dimension_numbers<[1], [0], [0], [1], [0, 0, 1, 1], [], []>, precision = #tpu.contract_precision<fp32>} : vector<7x7xf32>, vector<7x512xf32>, vector<7x512xf32> -> vector<7x512xf32>
    %122 = arith.addf %112, %121 : vector<7x512xf32>
    %123 = vector.broadcast %37 : vector<7x1xf32> to vector<7x512xf32>
    %124 = arith.addf %122, %123 : vector<7x512xf32>
    %c0_28 = arith.constant 0 : index
    %c0_29 = arith.constant 0 : index
    %c0_30 = arith.constant 0 : index
    %125 = vector.load %arg7[%c0_28, %c0_29, %c0_30] : memref<5x7x2xf32, #tpu.memory_space<vmem>>, vector<5x7x2xf32>
    %c0_31 = arith.constant 0 : index
    %c0_32 = arith.constant 0 : index
    %126 = vector.load %arg8[%c0_31, %c0_32] : memref<7x1xf32, #tpu.memory_space<vmem>>, vector<7x1xf32>
    %cst_33 = arith.constant 0.000000e+00 : f32
    %127 = vector.broadcast %cst_33 : f32 to vector<7x512xf32>
    %128 = vector.extract_strided_slice %0 {offsets = [0, 510], sizes = [2, 2], strides = [1, 1]} : vector<2x512xf32> to vector<2x2xf32>
    %129 = vector.extract_strided_slice %0 {offsets = [0, 0], sizes = [2, 510], strides = [1, 1]} : vector<2x512xf32> to vector<2x510xf32>
    %130 = tpu.concatenate %128, %129 in 1 : vector<2x2xf32>, vector<2x510xf32> -> vector<2x512xf32>
    %131 = vector.extract_strided_slice %1 {offsets = [2, 0], sizes = [1, 512], strides = [1, 1]} : vector<9x512xf32> to vector<1x512xf32>
    %132 = vector.broadcast %131 : vector<1x512xf32> to vector<2x512xf32>
    %133 = arith.mulf %130, %132 : vector<2x512xf32>
    %134 = vector.extract_strided_slice %125 {offsets = [0, 0, 0], sizes = [1, 7, 2], strides = [1, 1, 1]} : vector<5x7x2xf32> to vector<1x7x2xf32>
    %135 = vector.shape_cast %134 : vector<1x7x2xf32> to vector<7x2xf32>
    %cst_34 = arith.constant dense<0.000000e+00> : vector<7x512xf32>
    %136 = tpu.matmul %135, %133, %cst_34 {dimension_numbers = #tpu.dot_dimension_numbers<[1], [0], [0], [1], [0, 0, 1, 1], [], []>, precision = #tpu.contract_precision<fp32>} : vector<7x2xf32>, vector<2x512xf32>, vector<7x512xf32> -> vector<7x512xf32>
    %137 = arith.addf %127, %136 : vector<7x512xf32>
    %138 = vector.extract_strided_slice %0 {offsets = [0, 511], sizes = [2, 1], strides = [1, 1]} : vector<2x512xf32> to vector<2x1xf32>
    %139 = vector.extract_strided_slice %0 {offsets = [0, 0], sizes = [2, 511], strides = [1, 1]} : vector<2x512xf32> to vector<2x511xf32>
    %140 = tpu.concatenate %138, %139 in 1 : vector<2x1xf32>, vector<2x511xf32> -> vector<2x512xf32>
    %141 = vector.extract_strided_slice %1 {offsets = [3, 0], sizes = [1, 512], strides = [1, 1]} : vector<9x512xf32> to vector<1x512xf32>
    %142 = vector.broadcast %141 : vector<1x512xf32> to vector<2x512xf32>
    %143 = arith.mulf %140, %142 : vector<2x512xf32>
    %144 = vector.extract_strided_slice %125 {offsets = [1, 0, 0], sizes = [1, 7, 2], strides = [1, 1, 1]} : vector<5x7x2xf32> to vector<1x7x2xf32>
    %145 = vector.shape_cast %144 : vector<1x7x2xf32> to vector<7x2xf32>
    %cst_35 = arith.constant dense<0.000000e+00> : vector<7x512xf32>
    %146 = tpu.matmul %145, %143, %cst_35 {dimension_numbers = #tpu.dot_dimension_numbers<[1], [0], [0], [1], [0, 0, 1, 1], [], []>, precision = #tpu.contract_precision<fp32>} : vector<7x2xf32>, vector<2x512xf32>, vector<7x512xf32> -> vector<7x512xf32>
    %147 = arith.addf %137, %146 : vector<7x512xf32>
    %148 = vector.extract_strided_slice %125 {offsets = [2, 0, 0], sizes = [1, 7, 2], strides = [1, 1, 1]} : vector<5x7x2xf32> to vector<1x7x2xf32>
    %149 = vector.shape_cast %148 : vector<1x7x2xf32> to vector<7x2xf32>
    %cst_36 = arith.constant dense<0.000000e+00> : vector<7x512xf32>
    %150 = tpu.matmul %149, %0, %cst_36 {dimension_numbers = #tpu.dot_dimension_numbers<[1], [0], [0], [1], [0, 0, 1, 1], [], []>, precision = #tpu.contract_precision<fp32>} : vector<7x2xf32>, vector<2x512xf32>, vector<7x512xf32> -> vector<7x512xf32>
    %151 = arith.addf %147, %150 : vector<7x512xf32>
    %152 = vector.extract_strided_slice %0 {offsets = [0, 1], sizes = [2, 511], strides = [1, 1]} : vector<2x512xf32> to vector<2x511xf32>
    %153 = vector.extract_strided_slice %0 {offsets = [0, 0], sizes = [2, 1], strides = [1, 1]} : vector<2x512xf32> to vector<2x1xf32>
    %154 = tpu.concatenate %152, %153 in 1 : vector<2x511xf32>, vector<2x1xf32> -> vector<2x512xf32>
    %155 = vector.extract_strided_slice %1 {offsets = [5, 0], sizes = [1, 512], strides = [1, 1]} : vector<9x512xf32> to vector<1x512xf32>
    %156 = vector.broadcast %155 : vector<1x512xf32> to vector<2x512xf32>
    %157 = arith.mulf %154, %156 : vector<2x512xf32>
    %158 = vector.extract_strided_slice %125 {offsets = [3, 0, 0], sizes = [1, 7, 2], strides = [1, 1, 1]} : vector<5x7x2xf32> to vector<1x7x2xf32>
    %159 = vector.shape_cast %158 : vector<1x7x2xf32> to vector<7x2xf32>
    %cst_37 = arith.constant dense<0.000000e+00> : vector<7x512xf32>
    %160 = tpu.matmul %159, %157, %cst_37 {dimension_numbers = #tpu.dot_dimension_numbers<[1], [0], [0], [1], [0, 0, 1, 1], [], []>, precision = #tpu.contract_precision<fp32>} : vector<7x2xf32>, vector<2x512xf32>, vector<7x512xf32> -> vector<7x512xf32>
    %161 = arith.addf %151, %160 : vector<7x512xf32>
    %162 = vector.extract_strided_slice %0 {offsets = [0, 2], sizes = [2, 510], strides = [1, 1]} : vector<2x512xf32> to vector<2x510xf32>
    %163 = vector.extract_strided_slice %0 {offsets = [0, 0], sizes = [2, 2], strides = [1, 1]} : vector<2x512xf32> to vector<2x2xf32>
    %164 = tpu.concatenate %162, %163 in 1 : vector<2x510xf32>, vector<2x2xf32> -> vector<2x512xf32>
    %165 = vector.extract_strided_slice %1 {offsets = [6, 0], sizes = [1, 512], strides = [1, 1]} : vector<9x512xf32> to vector<1x512xf32>
    %166 = vector.broadcast %165 : vector<1x512xf32> to vector<2x512xf32>
    %167 = arith.mulf %164, %166 : vector<2x512xf32>
    %168 = vector.extract_strided_slice %125 {offsets = [4, 0, 0], sizes = [1, 7, 2], strides = [1, 1, 1]} : vector<5x7x2xf32> to vector<1x7x2xf32>
    %169 = vector.shape_cast %168 : vector<1x7x2xf32> to vector<7x2xf32>
    %cst_38 = arith.constant dense<0.000000e+00> : vector<7x512xf32>
    %170 = tpu.matmul %169, %167, %cst_38 {dimension_numbers = #tpu.dot_dimension_numbers<[1], [0], [0], [1], [0, 0, 1, 1], [], []>, precision = #tpu.contract_precision<fp32>} : vector<7x2xf32>, vector<2x512xf32>, vector<7x512xf32> -> vector<7x512xf32>
    %171 = arith.addf %161, %170 : vector<7x512xf32>
    %172 = vector.broadcast %126 : vector<7x1xf32> to vector<7x512xf32>
    %173 = arith.addf %171, %172 : vector<7x512xf32>
    %174 = tpu.concatenate %124, %173 in 0 : vector<7x512xf32>, vector<7x512xf32> -> vector<14x512xf32>
    %cst_39 = arith.constant 0.000000e+00 : f32
    %175 = vector.broadcast %cst_39 : f32 to vector<14x512xf32>
    %176 = arith.cmpf oge, %174, %175 : vector<14x512xf32>
    %cst_40 = arith.constant 3.000000e-01 : f32
    %177 = vector.broadcast %cst_40 : f32 to vector<14x512xf32>
    %178 = arith.mulf %177, %174 : vector<14x512xf32>
    %179 = arith.select %176, %174, %178 : vector<14x512xi1>, vector<14x512xf32>
    %c0_41 = arith.constant 0 : index
    %c0_42 = arith.constant 0 : index
    %c0_43 = arith.constant 0 : index
    %180 = vector.load %arg9[%c0_41, %c0_42, %c0_43] : memref<1x2x14xf32, #tpu.memory_space<vmem>>, vector<1x2x14xf32>
    %c0_44 = arith.constant 0 : index
    %c0_45 = arith.constant 0 : index
    %181 = vector.load %arg10[%c0_44, %c0_45] : memref<2x1xf32, #tpu.memory_space<vmem>>, vector<2x1xf32>
    %cst_46 = arith.constant 0.000000e+00 : f32
    %182 = vector.broadcast %cst_46 : f32 to vector<2x512xf32>
    %183 = vector.shape_cast %180 : vector<1x2x14xf32> to vector<2x14xf32>
    %cst_47 = arith.constant dense<0.000000e+00> : vector<2x512xf32>
    %184 = tpu.matmul %183, %179, %cst_47 {dimension_numbers = #tpu.dot_dimension_numbers<[1], [0], [0], [1], [0, 0, 1, 1], [], []>, precision = #tpu.contract_precision<fp32>} : vector<2x14xf32>, vector<14x512xf32>, vector<2x512xf32> -> vector<2x512xf32>
    %185 = arith.addf %182, %184 : vector<2x512xf32>
    %186 = vector.broadcast %181 : vector<2x1xf32> to vector<2x512xf32>
    %187 = arith.addf %185, %186 : vector<2x512xf32>
    %188 = arith.addf %187, %0 : vector<2x512xf32>
    %cst_48 = arith.constant 0.000000e+00 : f32
    %189 = vector.broadcast %cst_48 : f32 to vector<2x512xf32>
    %190 = arith.cmpf oge, %188, %189 : vector<2x512xf32>
    %cst_49 = arith.constant 3.000000e-01 : f32
    %191 = vector.broadcast %cst_49 : f32 to vector<2x512xf32>
    %192 = arith.mulf %191, %188 : vector<2x512xf32>
    %193 = arith.select %190, %188, %192 : vector<2x512xi1>, vector<2x512xf32>
    %c0_50 = arith.constant 0 : index
    %c0_51 = arith.constant 0 : index
    %194 = vector.load %arg11[%c0_50, %c0_51] : memref<2x512xf32, #tpu.memory_space<vmem>>, vector<2x512xf32>
    tpu.vector_store %arg11[%c0_50, %c0_51], %193 {strides = array<i32>} : memref<2x512xf32, #tpu.memory_space<vmem>>, vector<2x512xf32>,
    return
  }
  func.func @transform_0(%arg0: i32) -> (i32, i32) {
    %c0_i32 = arith.constant 0 : i32
    %c0_i32_0 = arith.constant 0 : i32
    %c0_i32_1 = arith.constant 0 : i32
    return %c0_i32, %c0_i32_0 : i32, i32
  }
  func.func @transform_1(%arg0: i32) -> (i32, i32) {
    %c0_i32 = arith.constant 0 : i32
    %c0_i32_0 = arith.constant 0 : i32
    %c0_i32_1 = arith.constant 0 : i32
    return %c0_i32, %c0_i32_0 : i32, i32
  }
  func.func @transform_2(%arg0: i32) -> (i32, i32, i32) {
    %c0_i32 = arith.constant 0 : i32
    %c0_i32_0 = arith.constant 0 : i32
    %c0_i32_1 = arith.constant 0 : i32
    %c0_i32_2 = arith.constant 0 : i32
    return %c0_i32, %c0_i32_0, %c0_i32_1 : i32, i32, i32
  }
  func.func @transform_3(%arg0: i32) -> (i32, i32) {
    %c0_i32 = arith.constant 0 : i32
    %c0_i32_0 = arith.constant 0 : i32
    %c0_i32_1 = arith.constant 0 : i32
    return %c0_i32, %c0_i32_0 : i32, i32
  }
  func.func @transform_4(%arg0: i32) -> (i32, i32, i32) {
    %c0_i32 = arith.constant 0 : i32
    %c0_i32_0 = arith.constant 0 : i32
    %c0_i32_1 = arith.constant 0 : i32
    %c0_i32_2 = arith.constant 0 : i32
    return %c0_i32, %c0_i32_0, %c0_i32_1 : i32, i32, i32
  }
  func.func @transform_5(%arg0: i32) -> (i32, i32) {
    %c0_i32 = arith.constant 0 : i32
    %c0_i32_0 = arith.constant 0 : i32
    %c0_i32_1 = arith.constant 0 : i32
    return %c0_i32, %c0_i32_0 : i32, i32
  }
  func.func @transform_6(%arg0: i32) -> (i32, i32, i32) {
    %c0_i32 = arith.constant 0 : i32
    %c0_i32_0 = arith.constant 0 : i32
    %c0_i32_1 = arith.constant 0 : i32
    %c0_i32_2 = arith.constant 0 : i32
    return %c0_i32, %c0_i32_0, %c0_i32_1 : i32, i32, i32
  }
  func.func @transform_7(%arg0: i32) -> (i32, i32) {
    %c0_i32 = arith.constant 0 : i32
    %c0_i32_0 = arith.constant 0 : i32
    %c0_i32_1 = arith.constant 0 : i32
    return %c0_i32, %c0_i32_0 : i32, i32
  }
  func.func @transform_8(%arg0: i32) -> (i32, i32, i32) {
    %c0_i32 = arith.constant 0 : i32
    %c0_i32_0 = arith.constant 0 : i32
    %c0_i32_1 = arith.constant 0 : i32
    %c0_i32_2 = arith.constant 0 : i32
    return %c0_i32, %c0_i32_0, %c0_i32_1 : i32, i32, i32
  }
  func.func @transform_9(%arg0: i32) -> (i32, i32) {
    %c0_i32 = arith.constant 0 : i32
    %c0_i32_0 = arith.constant 0 : i32
    %c0_i32_1 = arith.constant 0 : i32
    return %c0_i32, %c0_i32_0 : i32, i32
  }
  func.func @transform_10(%arg0: i32) -> (i32, i32) {
    %c0_i32 = arith.constant 0 : i32
    %c0_i32_0 = arith.constant 0 : i32
    %c0_i32_1 = arith.constant 0 : i32
    return %c0_i32, %c0_i32_0 : i32, i32
  }
}

</mosaic_0001>

<bundles_post_ra>
// kernel: tpu_custom_call.1
= control target key start
LH: loop header
LB: loop body
LE: loop exit
PB: predicated region body
PF: predicated region fallthrough
CT: control target
= control target key end

     0   :  { %v54_v1 = vlaneseq  ;;  %v17730_v2 = vmov 1983009808   ;;  %vm105_vm0 = vcmask 15360   ;;  %v19730_v6 = vmov 0.0   ;;  %s19719_s0 = inlined_call_operand.vmem [shape: f32[2,512], index: 0, kind: input, shape index: {}]   ;;  %s19720_s1 = inlined_call_operand.vmem [shape: f32[9,512], index: 1, kind: input, shape index: {}]   ;;  %s19721_s2 = inlined_call_operand.vmem [shape: f32[3,7,2], index: 2, kind: input, shape index: {}]   ;;  %s19722_s3 = inlined_call_operand.vmem [shape: f32[7,1], index: 3, kind: input, shape index: {}]   ;;  %s19723_s4 = inlined_call_operand.vmem [shape: f32[9,7,7], index: 4, kind: input, shape index: {}]   ;;  %s19724_s5 = inlined_call_operand.vmem [shape: f32[7,1], index: 5, kind: input, shape index: {}]   ;;  %s19725_s6 = inlined_call_operand.vmem [shape: f32[5,7,2], index: 6, kind: input, shape index: {}]   ;;  %s19726_s7 = inlined_call_operand.vmem [shape: f32[7,1], index: 7, kind: input, shape index: {}]   ;;  %s19727_s8 = inlined_call_operand.vmem [shape: f32[1,2,14], index: 8, kind: input, shape index: {}]   ;;  %s19728_s9 = inlined_call_operand.vmem [shape: f32[2,1], index: 9, kind: input, shape index: {}]   ;;  %s19729_s10 = inlined_call_operand.hbm [shape: f32[2,512], index: 10, kind: output, shape index: {}]  }
   0x1   :  { %v36_v0 = vld [vmem:[%s19719_s0] sm:$0xff]  ;;  %v52_v3 = vunpack.c.l.s4 %v17730_v2  ;;  %v46_v4 = vld [vmem:[%s19721_s2 + $0x8] sm:$0x7f]  ;;  %184 = vmatprep.mubr.f32.mxu0 %v19730_v6  ;;  %270 = vmatprep.mubr.f32.mxu1 %v19730_v6 }
   0x2   :  { %v17803_v5 = vshrl.u32 %v54_v1, 7  ;;  %v107_v7 = vsel %vm105_vm0, %v46_v4, 0  ;;  %v50_v9 = vcombine.high %v36_v0, %v36_v0 }
   0x3   :  { %v53_v8 = vunpack.c.0.s8 %v52_v3  ;;  %v17808_v10 = vand.u32 4294901760, %v107_v7 }
   0x4   :  { %15 = vsyncpa [#allocation3], 0  ;;  %vm109_vm1 = vcmask 1041408   ;;  %s17732_s0 = smov 1   ;;  %s17733_s17 = smov 127   ;;  %v17734_v45 = vmov 0  }
   0x5   :  { %v17811_v11 = vsub.s32 %v53_v8, %v17803_v5  ;;  %v17814_v12 = vsub.f32 %v107_v7, %v17808_v10  ;;  %v48_v44 = vld [vmem:[%s19722_s3] sm:$0x7f]  ;;  %17701 = vset.pattern.permute.xlu0 %v17734_v45  ;;  %17702 = vset.pattern.permute.xlu1 %v17734_v45  ;;  %v87_v49 = vsub.s32 3, %v17803_v5  ;;  %v17974_v52 = vld [vmem:[%s19720_s1 + $0x8] sm:$0xff]  ;;  %vm76_vm2 = vcmask 7168   ;;  %v17982_v55 = vld [vmem:[%s19720_s1 + $0x10] sm:$0xff] }
   0x6   :  { %v45_v46 = vld [vmem:[%s19721_s2] sm:$0x7f]  ;;  %v17987_v56 = vld [vmem:[%s19720_s1 + $0x18] sm:$0xff]  ;;  %v18009_v8 = vsub.s32 5, %v17803_v5  ;;  %vm2001_vm3 = vcmask 1039360   ;;  %s17736_s11 = smov 4  }
   0x7   :  { %19802 = vst [vmem:[#allocation5_spill] sm:$0xff] %v17811_v11  ;;  %v17817_v13 = vrot.slane %v36_v0, %v17811_v11  ;;  %v17820_v14 = vrot.slane %v50_v9, %v17811_v11  ;;  %v17823_v15 = vand.u32 4294901760, %v17814_v12  ;;  %v1049_v47 = vsel %vm105_vm0, %v45_v46, 0  ;;  %v17966_v50 = vld [vmem:[%s19720_s1] sm:$0xff]  ;;  %s17737_s12 = smov 2   ;;  %s17738_s13 = smov 126  }
   0x8   :  { %v17960_v48 = vand.u32 4294901760, %v1049_v47  ;;  %v17977_v54 = vrot.slane %v17966_v50, %v87_v49  ;;  %v17993_v59 = vrot.slane %v17974_v52, %v87_v49  ;;  %v17998_v63 = vrot.slane %v17982_v55, %v87_v49  ;;  %s17739_s14 = smov 125   ;;  %s17740_s15 = smov 124  }
   0x9   :  { %19803 = vst [vmem:[#allocation6_spill] sm:$0xff] %v17817_v13  ;;  %19804 = vst [vmem:[#allocation7_spill] sm:$0xff] %v17820_v14  ;;  %70 = vrot.lane.b32.xlu0 %v17817_v13, %s17732_s0  ;;  %v17829_v16 = vcombine.high %v17820_v14, %v17820_v14  ;;  %v17833_v17 = vcombine.high %v17817_v13, %v17817_v13  ;;  %v110_v18 = vsel %vm109_vm1, %v17817_v13, 0  ;;  %v114_v21 = vsel %vm109_vm1, %v17820_v14, 0 }
   0xa   :  { %v188_v19 = vsub.f32 %v17814_v12, %v17823_v15  ;;  %v17839_v20 = vand.u32 4294901760, %v110_v18  ;;  %v17858_v28 = vand.u32 4294901760, %v114_v21  ;;  %v17969_v51 = vsub.f32 %v1049_v47, %v17960_v48 }
   0xb   :  { %19805 = vst [vmem:[#allocation8_spill] sm:$0xff] %v17829_v16  ;;  %19806 = vst [vmem:[#allocation9_spill] sm:$0xff] %v17833_v17  ;;  %66 = vrot.lane.b32.xlu1 %v17829_v16, %s17732_s0  ;;  %v112_v22 = vsel %vm109_vm1, %v17833_v17, 0  ;;  %v116_v23 = vsel %vm109_vm1, %v17829_v16, 0  ;;  %v18001_v0 = vrot.slane %v17987_v56, %v87_v49  ;;  %v19841_v11 = vmov 0.0  }
   0xc   :  { %19807 = vst [vmem:[#allocation10_spill] sm:$0xff] %v17839_v20  ;;  %v17849_v24 = vand.u32 4294901760, %v112_v22  ;;  %v189_v25 = vand.u32 4294901760, %v188_v19  ;;  %v17852_v26 = vsub.f32 %v110_v18, %v17839_v20  ;;  %v17854_v27 = vand.u32 4294901760, %v116_v23  ;;  %19811 = vst [vmem:[#allocation14_spill] sm:$0xff] %v17858_v28 }
   0xd   :  { %72 = vrot.lane.b32.xlu0 %v17833_v17, %s17732_s0  ;;  %v17883_v34 = vsub.f32 %v114_v21, %v17858_v28  ;;  %v17990_v57 = vand.u32 4294901760, %v17969_v51  ;;  %vm3091_vm8 = vcmask 56320   ;;  %vm3062_vm9 = vcmask 23552  }
   0xe   :  { %19808 = vst [vmem:[#allocation11_spill] sm:$0xff] %v17849_v24  ;;  %19809 = vst [vmem:[#allocation12_spill] sm:$0xff] %v17852_v26  ;;  %149 = vmatprep.subr.mxu0 %v17849_v24  ;;  %v17862_v29 = vsub.f32 %v112_v22, %v17849_v24  ;;  %v17865_v30 = vand.u32 4294901760, %v17852_v26  ;;  %v17868_v31 = vsub.f32 %v116_v23, %v17854_v27  ;;  %vm3095_vm10 = vcmask 1046528  }
   0xf   :  { %19810 = vst [vmem:[#allocation13_spill] sm:$0xff] %v17854_v27  ;;  %74 = vrot.lane.b32.xlu1 %v17820_v14, %s17732_s0  ;;  %151 = vmatpush1.msra.mxu0 %v17839_v20  ;;  %19816 = vst [vmem:[#allocation19_spill] sm:$0xff] %v17883_v34  ;;  %v17903_v39 = vand.u32 4294901760, %v17883_v34  ;;  %v1133_v2 = vsub.f32 %v17969_v51, %v17990_v57  ;;  %vm3024_vm11 = vcmask 31744   ;;  %vm8862_vm12 = vcmask 1031168  }
  0x10   :  { %19812 = vst [vmem:[#allocation15_spill] sm:$0xff] %v17862_v29  ;;  %19813 = vst [vmem:[#allocation16_spill] sm:$0xff] %v17865_v30  ;;  %190 = vmatmul.mubr.f32.vlgmr.msra.gmra.mxu0 %v189_v25  ;;  %v17874_v32 = vand.u32 4294901760, %v17862_v29  ;;  %310 = vmatprep.subr.mxu0 %v17862_v29  ;;  %v235_v33 = vsub.f32 %v17852_v26, %v17865_v30  ;;  %v17890_v36 = vand.u32 4294901760, %v17868_v31  ;;  %vm9849_vm13 = vcmask 1022976  }
  0x11   :  { %19814 = vst [vmem:[#allocation17_spill] sm:$0xff] %v17868_v31  ;;  %1995 = vrot.lane.b32.xlu0 %v17833_v17, %s17733_s17  ;;  %313 = vmatpush1.msra.mxu0 %v17852_v26  ;;  %19820 = vst [vmem:[#allocation23_spill] sm:$0xff] %v17903_v39  ;;  %v700_v41 = vsub.f32 %v17883_v34, %v17903_v39  ;;  %vm10836_vm14 = vcmask 1014784   ;;  %vm16629_vm15 = vcmask 113664  }
  0x12   :  { %19815 = vst [vmem:[#allocation18_spill] sm:$0xff] %v17874_v32  ;;  %v229_v35 = vsub.f32 %v17862_v29, %v17874_v32  ;;  %346 = vmatprep.mubr.f32.mxu0 %v19730_v6  ;;  %464 = vmatprep.subr.mxu0 %v17874_v32  ;;  %19817 = vst [vmem:[#allocation20_spill] sm:$0xff] %v17890_v36  ;;  %v17894_v37 = vand.u32 4294901760, %v235_v33  ;;  %v694_v40 = vsub.f32 %v17868_v31, %v17890_v36 }
  0x13   :  { %1997 = vrot.lane.b32.xlu1 %v17820_v14, %s17733_s17  ;;  %v17928_v43 = vand.u32 4294901760, %v700_v41 }
  0x14   :  { %19818 = vst [vmem:[#allocation21_spill] sm:$0xff] %v17894_v37  ;;  %v17896_v38 = vand.u32 4294901760, %v229_v35  ;;  %349 = vmatmul.mubr.f32.vlgmr.msra.gmra.mxu0 %v17814_v12  ;;  %v17920_v42 = vand.u32 4294901760, %v694_v40  ;;  %v18029_v40 = vrot.slane %v17974_v52, %v18009_v8 }
  0x15   :  { %1993 = vrot.lane.b32.xlu0 %v17817_v13, %s17733_s17  ;;  %468 = vmatpush1.msra.mxu0 %v17865_v30  ;;  %19822 = vst [vmem:[#allocation25_spill] sm:$0xff] %v17928_v43 }
  0x16   :  { %19819 = vst [vmem:[#allocation22_spill] sm:$0xff] %v17896_v38  ;;  %231 = vmatprep.subr.mxu1 %v17896_v38  ;;  %501 = vmatprep.mubr.f32.mxu0 %v19730_v6  ;;  %19821 = vst [vmem:[#allocation24_spill] sm:$0xff] %v17920_v42 }
  0x17   :  { %1999 = vrot.lane.b32.xlu1 %v17829_v16, %s17733_s17  ;;  %237 = vmatpush1.msra.mxu1 %v17894_v37 }
  0x18   :  { %272 = vmatmul.mubr.f32.vlgmr.msra.gmra.mxu1 %v17808_v10  ;;  %386 = vmatprep.subr.mxu1 %v17849_v24 }
  0x19   :  { %388 = vmatpush1.msra.mxu1 %v17839_v20  ;;  %421 = vmatprep.mubr.f32.mxu1 %v19730_v6 }
  0x1a   :  { %503 = vmatmul.mubr.f32.vlgmr.msra.gmra.mxu0 %v17808_v10  ;;  %540 = vmatprep.subr.mxu1 %v17849_v24 }
  0x1b   :  { %614 = vmatprep.subr.mxu0 %v17854_v27  ;;  %649 = vmatprep.mubr.f32.mxu0 %v19730_v6 }
  0x1c   :  { %425 = vmatmul.mubr.f32.vlgmr.msra.gmra.mxu1 %v17823_v15  ;;  %616 = vmatpush1.msra.mxu0 %v17858_v28 }
  0x1d   :  { %542 = vmatpush1.msra.mxu1 %v17839_v20  ;;  %575 = vmatprep.mubr.f32.mxu1 %v19730_v6 }
  0x1e   :  { %655 = vmatmul.mubr.f32.vlgmr.msra.gmra.mxu0 %v189_v25  ;;  %696 = vmatprep.subr.mxu1 %v17920_v42  ;;  %v18023_v25 = vand.u32 4294901760, %v1133_v2 }
  0x1f   :  { %775 = vmatprep.subr.mxu0 %v17868_v31  ;;  %811 = vmatprep.mubr.f32.mxu0 %v19730_v6 }
  0x20   :  { %577 = vmatmul.mubr.f32.vlgmr.msra.gmra.mxu1 %v17808_v10  ;;  %778 = vmatpush1.msra.mxu0 %v17883_v34 }
  0x21   :  { %702 = vmatpush1.msra.mxu1 %v17928_v43  ;;  %735 = vmatprep.mubr.f32.mxu1 %v19730_v6 }
  0x22   :  { %814 = vmatmul.mubr.f32.vlgmr.msra.gmra.mxu0 %v17814_v12  ;;  %851 = vmatprep.subr.mxu1 %v17854_v27 }
  0x23   :  { %929 = vmatprep.subr.mxu0 %v17890_v36  ;;  %966 = vmatprep.mubr.f32.mxu0 %v19730_v6 }
  0x24   :  { %737 = vmatmul.mubr.f32.vlgmr.msra.gmra.mxu1 %v17808_v10  ;;  %933 = vmatpush1.msra.mxu0 %v17903_v39 }
  0x25   :  { %853 = vmatpush1.msra.mxu1 %v17858_v28  ;;  %886 = vmatprep.mubr.f32.mxu1 %v19730_v6 }
  0x26   :  { %968 = vmatmul.mubr.f32.vlgmr.msra.gmra.mxu0 %v17808_v10  ;;  %1005 = vmatprep.subr.mxu1 %v17854_v27 }
  0x27   :  { %1129 = vmatprep.mubr.f32.mxu0 %v19730_v6  ;;  %2982 = vperm.xlu0 %17701, %v48_v44  }
  0x28   :  { %890 = vmatmul.mubr.f32.vlgmr.msra.gmra.mxu1 %v17823_v15 }
  0x29   :  { %1007 = vmatpush1.msra.mxu1 %v17858_v28  ;;  %1040 = vmatprep.mubr.f32.mxu1 %v19730_v6 }
  0x2c   :  { %1042 = vmatmul.mubr.f32.vlgmr.msra.gmra.mxu1 %v17808_v10 }
  0x2d   :  { %1215 = vmatprep.mubr.f32.mxu1 %v19730_v6 }
  0x7b   :  { %v71_v53 = vpop.permute.xlu0 %70 }
  0x7d   :  { %v67_v58 = vpop.permute.xlu1 %66 }
  0x7e   :  { %v84_v60 = vsel %vm76_vm2, %v67_v58, %v71_v53 }
  0x7f   :  { %v101_v61 = vmul.f32 %v17977_v54, %v84_v60  ;;  %v73_v62 = vpop.permute.xlu0 %72 }
  0x80   :  { %v77_v1 = vsel %vm76_vm2, %v71_v53, %v73_v62 }
  0x81   :  { %v1052_v3 = vsel %vm109_vm1, %v101_v61, 0  ;;  %v102_v4 = vmul.f32 %v17993_v59, %v77_v1  ;;  %v75_v7 = vpop.permute.xlu1 %74 }
  0x82   :  { %v18011_v9 = vand.u32 4294901760, %v1052_v3  ;;  %v78_v10 = vsel %vm76_vm2, %v73_v62, %v75_v7  ;;  %v79_v12 = vsel %vm76_vm2, %v75_v7, %v67_v58  ;;  %v47_v58 = vld [vmem:[%s19721_s2 + $0x10] sm:$0x7f]  ;;  %v18057_v62 = vrot.slane %v17966_v50, %v18009_v8  ;;  %s17735_s2 = smov 3  }
  0x83   :  { %v1055_v15 = vsel %vm109_vm1, %v102_v4, 0  ;;  %v103_v18 = vmul.f32 %v17998_v63, %v78_v10  ;;  %v104_v19 = vmul.f32 %v18001_v0, %v79_v12  ;;  %v1996_v21 = vpop.permute.xlu0 %1995  ;;  %v2032_v7 = vsel %vm105_vm0, %v47_v58, 0 }
  0x84   :  { %19823 = vst [vmem:[#allocation26_spill] sm:$0xff] %v18011_v9  ;;  %v18019_v22 = vsub.f32 %v1052_v3, %v18011_v9  ;;  %v18021_v23 = vand.u32 4294901760, %v1055_v15  ;;  %19832 = vst [vmem:[#allocation35_spill] sm:$0xff] %v18057_v62 }
  0x85   :  { %v1058_v33 = vsel %vm109_vm1, %v103_v18, 0  ;;  %v1061_v35 = vsel %vm109_vm1, %v104_v19, 0  ;;  %v1998_v41 = vpop.permute.xlu1 %1997 }
  0x86   :  { %19824 = vst [vmem:[#allocation27_spill] sm:$0xff] %v18019_v22  ;;  %19825 = vst [vmem:[#allocation28_spill] sm:$0xff] %v18021_v23  ;;  %v18032_v44 = vsub.f32 %v1055_v15, %v18021_v23  ;;  %v18034_v45 = vand.u32 4294901760, %v1061_v35  ;;  %1094 = vmatprep.subr.mxu0 %v18021_v23  ;;  %v18038_v46 = vand.u32 4294901760, %v18019_v22  ;;  %v18040_v47 = vand.u32 4294901760, %v1058_v33 }
  0x87   :  { %1096 = vmatpush1.msra.mxu0 %v18011_v9  ;;  %v2003_v49 = vsel %vm2001_vm3, %v1996_v21, %v1998_v41  ;;  %v1994_v53 = vpop.permute.xlu0 %1993 }
  0x88   :  { %19826 = vst [vmem:[#allocation29_spill] sm:$0xff] %v18032_v44  ;;  %19827 = vst [vmem:[#allocation30_spill] sm:$0xff] %v18034_v45  ;;  %v18048_v60 = vsub.f32 %v1061_v35, %v18034_v45  ;;  %1135 = vmatmul.mubr.f32.vlgmr.msra.gmra.mxu0 %v18023_v25  ;;  %1255 = vmatprep.subr.mxu0 %v18032_v44  ;;  %v18053_v61 = vand.u32 4294901760, %v18032_v44  ;;  %v2028_v1 = vmul.f32 %v18029_v40, %v2003_v49 }
  0x89   :  { %19828 = vst [vmem:[#allocation31_spill] sm:$0xff] %v18038_v46  ;;  %19829 = vst [vmem:[#allocation32_spill] sm:$0xff] %v18040_v47  ;;  %1258 = vmatpush1.msra.mxu0 %v18019_v22  ;;  %1291 = vmatprep.mubr.f32.mxu0 %v19730_v6  ;;  %v1180_v2 = vsub.f32 %v18019_v22, %v18038_v46  ;;  %v2002_v3 = vsel %vm2001_vm3, %v1994_v53, %v1996_v21  ;;  %v18084_v35 = vand.u32 4294901760, %v2032_v7 }
  0x8a   :  { %19830 = vst [vmem:[#allocation33_spill] sm:$0xff] %v18048_v60  ;;  %19831 = vst [vmem:[#allocation34_spill] sm:$0xff] %v18053_v61  ;;  %1409 = vmatprep.subr.mxu0 %v18053_v61  ;;  %v1174_v4 = vsub.f32 %v18032_v44, %v18053_v61  ;;  %v18070_v10 = vsub.f32 %v1058_v33, %v18040_v47  ;;  %v2027_v15 = vmul.f32 %v18057_v62, %v2002_v3  ;;  %v2000_v33 = vpop.permute.xlu1 %1999 }
  0x8b   :  { %v18077_v18 = vand.u32 4294901760, %v18048_v60  ;;  %v2038_v19 = vsel %vm109_vm1, %v2028_v1, 0  ;;  %v18081_v21 = vand.u32 4294901760, %v1180_v2  ;;  %v18103_v3 = vrot.slane %v17987_v56, %v18009_v8 }
  0x8c   :  { %19833 = vst [vmem:[#allocation36_spill] sm:$0xff] %v18070_v10  ;;  %1294 = vmatmul.mubr.f32.vlgmr.msra.gmra.mxu0 %v17969_v51  ;;  %v18073_v12 = vand.u32 4294901760, %v1174_v4  ;;  %v18090_v49 = vand.u32 4294901760, %v18070_v10  ;;  %v18092_v58 = vand.u32 4294901760, %v2038_v19  ;;  %v2035_v1 = vsel %vm109_vm1, %v2027_v15, 0 }
  0x8d   :  { %19835 = vst [vmem:[#allocation38_spill] sm:$0xff] %v18077_v18  ;;  %1413 = vmatpush1.msra.mxu0 %v18038_v46  ;;  %19836 = vst [vmem:[#allocation39_spill] sm:$0xff] %v18081_v21  ;;  %1446 = vmatprep.mubr.f32.mxu0 %v19730_v6  ;;  %v1639_v2 = vsub.f32 %v18048_v60, %v18077_v18  ;;  %v18106_v4 = vsub.f32 %v2032_v7, %v18084_v35  ;;  %v18111_v6 = vand.u32 4294901760, %v2035_v1 }
  0x8e   :  { %19834 = vst [vmem:[#allocation37_spill] sm:$0xff] %v18073_v12  ;;  %1559 = vmatprep.subr.mxu0 %v18034_v45  ;;  %1176 = vmatprep.subr.mxu1 %v18073_v12  ;;  %19837 = vst [vmem:[#allocation40_spill] sm:$0xff] %v18090_v49  ;;  %v2010_v15 = vsel %vm2001_vm3, %v2000_v33, %v1994_v53  ;;  %v1645_v43 = vsub.f32 %v18070_v10, %v18090_v49 }
  0x8f   :  { %1182 = vmatpush1.msra.mxu1 %v18081_v21  ;;  %19838 = vst [vmem:[#allocation41_spill] sm:$0xff] %v18092_v58  ;;  %19839 = vst [vmem:[#allocation42_spill] sm:$0xff] %v18103_v3  ;;  %v18118_v42 = vsub.f32 %v2038_v19, %v18092_v58  ;;  %v18122_v7 = vrot.slane %v17982_v55, %v18009_v8  ;;  %v18126_v53 = vand.u32 4294901760, %v1639_v2  ;;  %v18133_v19 = vand.u32 4294901760, %v18106_v4 }
  0x90   :  { %1217 = vmatmul.mubr.f32.vlgmr.msra.gmra.mxu1 %v17960_v48  ;;  %1331 = vmatprep.subr.mxu1 %v18021_v23  ;;  %19840 = vst [vmem:[#allocation43_spill] sm:$0xff] %v18111_v6  ;;  %v2004_v39 = vsel %vm2001_vm3, %v1998_v41, %v2000_v33  ;;  %v2030_v36 = vmul.f32 %v18103_v3, %v2010_v15  ;;  %v18142_v41 = vand.u32 4294901760, %v1645_v43 }
  0x91   :  { %1448 = vmatmul.mubr.f32.vlgmr.msra.gmra.mxu0 %v17960_v48  ;;  %1333 = vmatpush1.msra.mxu1 %v18011_v9  ;;  %19842 = vst [vmem:[#allocation44_spill] sm:$0xff] %v18118_v42  ;;  %19843 = vst [vmem:[#allocation45_spill] sm:$0xff] %v18122_v7  ;;  %v18138_v8 = vsub.f32 %v2035_v1, %v18111_v6  ;;  %v2029_v33 = vmul.f32 %v18122_v7, %v2004_v39 }
  0x92   :  { %1561 = vmatpush1.msra.mxu0 %v18040_v47  ;;  %1485 = vmatprep.subr.mxu1 %v18021_v23  ;;  %19844 = vst [vmem:[#allocation46_spill] sm:$0xff] %v18126_v53  ;;  %19846 = vst [vmem:[#allocation48_spill] sm:$0xff] %v18142_v41  ;;  %v2044_v2 = vsel %vm109_vm1, %v2030_v36, 0  ;;  %v2116_v1 = vsub.f32 %v18106_v4, %v18133_v19 }
  0x93   :  { %1720 = vmatprep.subr.mxu0 %v18048_v60  ;;  %1366 = vmatprep.mubr.f32.mxu1 %v19841_v11  ;;  %19845 = vst [vmem:[#allocation47_spill] sm:$0xff] %v18138_v8  ;;  %v18160_v39 = vand.u32 4294901760, %v18138_v8  ;;  %v2041_v36 = vsel %vm109_vm1, %v2029_v33, 0  ;;  %v18163_v43 = vand.u32 4294901760, %v2044_v2 }
  0x94   :  { %1594 = vmatprep.mubr.f32.mxu0 %v19841_v11  ;;  %1370 = vmatmul.mubr.f32.vlgmr.msra.gmra.mxu1 %v17990_v57  ;;  %v2117_v15 = vand.u32 4294901760, %v2116_v1  ;;  %v18173_v34 = vand.u32 4294901760, %v2041_v36 }
  0x95   :  { %1487 = vmatpush1.msra.mxu1 %v18011_v9  ;;  %1600 = vmatmul.mubr.f32.vlgmr.msra.gmra.mxu0 %v18023_v25  ;;  %v18148_v25 = vand.u32 4294901760, %v18118_v42  ;;  %19848 = vst [vmem:[#allocation50_spill] sm:$0xff] %v18160_v39  ;;  %19849 = vst [vmem:[#allocation51_spill] sm:$0xff] %v18163_v43  ;;  %v2163_v33 = vsub.f32 %v18138_v8, %v18160_v39  ;;  %v18180_v31 = vsub.f32 %v2044_v2, %v18163_v43 }
  0x96   :  { %1723 = vmatpush1.msra.mxu0 %v18070_v10  ;;  %1641 = vmatprep.subr.mxu1 %v18126_v53  ;;  %19850 = vst [vmem:[#allocation52_spill] sm:$0xff] %v18173_v34 }
  0x97   :  { %1874 = vmatprep.subr.mxu0 %v18077_v18  ;;  %1520 = vmatprep.mubr.f32.mxu1 %v19841_v11  ;;  %19847 = vst [vmem:[#allocation49_spill] sm:$0xff] %v18148_v25  ;;  %19851 = vst [vmem:[#allocation53_spill] sm:$0xff] %v18180_v31  ;;  %v18194_v2 = vand.u32 4294901760, %v2163_v33 }
  0x98   :  { %1756 = vmatprep.mubr.f32.mxu0 %v19841_v11  ;;  %1522 = vmatmul.mubr.f32.vlgmr.msra.gmra.mxu1 %v17960_v48 }
  0x99   :  { %1647 = vmatpush1.msra.mxu1 %v18142_v41  ;;  %1759 = vmatmul.mubr.f32.vlgmr.msra.gmra.mxu0 %v17969_v51  ;;  %v2157_v51 = vsub.f32 %v18118_v42, %v18148_v25  ;;  %19854 = vst [vmem:[#allocation56_spill] sm:$0xff] %v18194_v2 }
  0x9a   :  { %1878 = vmatpush1.msra.mxu0 %v18090_v49  ;;  %1796 = vmatprep.subr.mxu1 %v18034_v45 }
  0x9b   :  { %1680 = vmatprep.mubr.f32.mxu1 %v19841_v11  ;;  %1911 = vmatprep.mubr.f32.mxu0 %v19841_v11  ;;  %v18184_v1 = vand.u32 4294901760, %v2157_v51 }
  0x9c   :  { %2077 = vmatprep.subr.mxu0 %v18092_v58  ;;  %1682 = vmatmul.mubr.f32.vlgmr.msra.gmra.mxu1 %v17960_v48 }
  0x9d   :  { %1798 = vmatpush1.msra.mxu1 %v18040_v47  ;;  %1913 = vmatmul.mubr.f32.vlgmr.msra.gmra.mxu0 %v17960_v48  ;;  %19852 = vst [vmem:[#allocation54_spill] sm:$0xff] %v18184_v1 }
  0x9e   :  { %2079 = vmatpush1.msra.mxu0 %v18111_v6  ;;  %1950 = vmatprep.subr.mxu1 %v18034_v45 }
  0x9f   :  { %2238 = vmatprep.subr.mxu0 %v18118_v42  ;;  %1831 = vmatprep.mubr.f32.mxu1 %v19841_v11  ;;  %v18190_v42 = vsub.f32 %v2041_v36, %v18173_v34 }
  0xa0   :  { %2112 = vmatprep.mubr.f32.mxu0 %v19841_v11  ;;  %1835 = vmatmul.mubr.f32.vlgmr.msra.gmra.mxu1 %v17990_v57  ;;  %v18199_v57 = vand.u32 4294901760, %v18180_v31 }
  0xa1   :  { %1952 = vmatpush1.msra.mxu1 %v18040_v47  ;;  %2118 = vmatmul.mubr.f32.vlgmr.msra.gmra.mxu0 %v2117_v15  ;;  %19853 = vst [vmem:[#allocation55_spill] sm:$0xff] %v18190_v42  ;;  %v18208_v36 = vand.u32 4294901760, %v18190_v42 }
  0xa2   :  { %2241 = vmatpush1.msra.mxu0 %v18138_v8  ;;  %2159 = vmatprep.subr.mxu1 %v18184_v1  ;;  %19855 = vst [vmem:[#allocation57_spill] sm:$0xff] %v18199_v57 }
  0xa3   :  { %2392 = vmatprep.subr.mxu0 %v18148_v25  ;;  %1985 = vmatprep.mubr.f32.mxu1 %v19841_v11  ;;  %19856 = vst [vmem:[#allocation58_spill] sm:$0xff] %v18208_v36  ;;  %v2628_v51 = vsub.f32 %v18190_v42, %v18208_v36 }
  0xa4   :  { %2274 = vmatprep.mubr.f32.mxu0 %v19841_v11  ;;  %1987 = vmatmul.mubr.f32.vlgmr.msra.gmra.mxu1 %v17960_v48  ;;  %v2622_v48 = vsub.f32 %v18180_v31, %v18199_v57 }
  0xa5   :  { %2165 = vmatpush1.msra.mxu1 %v18194_v2  ;;  %2277 = vmatmul.mubr.f32.vlgmr.msra.gmra.mxu0 %v18106_v4 }
  0xa6   :  { %2396 = vmatpush1.msra.mxu0 %v18160_v39  ;;  %2314 = vmatprep.subr.mxu1 %v18092_v58  ;;  %v18224_v33 = vand.u32 4294901760, %v2622_v48 }
  0xa7   :  { %2542 = vmatprep.subr.mxu0 %v18163_v43  ;;  %2198 = vmatprep.mubr.f32.mxu1 %v19841_v11 }
  0xa8   :  { %2429 = vmatprep.mubr.f32.mxu0 %v19841_v11  ;;  %2200 = vmatmul.mubr.f32.vlgmr.msra.gmra.mxu1 %v18084_v35  ;;  %19857 = vst [vmem:[#allocation59_spill] sm:$0xff] %v18224_v33 }
  0xa9   :  { %2316 = vmatpush1.msra.mxu1 %v18111_v6  ;;  %2431 = vmatmul.mubr.f32.vlgmr.msra.gmra.mxu0 %v18084_v35 }
  0xaa   :  { %2544 = vmatpush1.msra.mxu0 %v18173_v34  ;;  %2468 = vmatprep.subr.mxu1 %v18092_v58 }
  0xab   :  { %2703 = vmatprep.subr.mxu0 %v18180_v31  ;;  %2349 = vmatprep.mubr.f32.mxu1 %v19841_v11  ;;  %v18231_v31 = vand.u32 4294901760, %v2628_v51 }
  0xac   :  { %2577 = vmatprep.mubr.f32.mxu0 %v19841_v11  ;;  %2353 = vmatmul.mubr.f32.vlgmr.msra.gmra.mxu1 %v18133_v19 }
  0xad   :  { %2470 = vmatpush1.msra.mxu1 %v18111_v6  ;;  %2583 = vmatmul.mubr.f32.vlgmr.msra.gmra.mxu0 %v2117_v15  ;;  %19858 = vst [vmem:[#allocation60_spill] sm:$0xff] %v18231_v31 }
  0xae   :  { %2706 = vmatpush1.msra.mxu0 %v18190_v42  ;;  %2624 = vmatprep.subr.mxu1 %v18224_v33 }
  0xaf   :  { %2857 = vmatprep.subr.mxu0 %v18199_v57  ;;  %2503 = vmatprep.mubr.f32.mxu1 %v19841_v11 }
  0xb0   :  { %2739 = vmatprep.mubr.f32.mxu0 %v19841_v11  ;;  %2505 = vmatmul.mubr.f32.vlgmr.msra.gmra.mxu1 %v18084_v35 }
  0xb1   :  { %2630 = vmatpush1.msra.mxu1 %v18231_v31  ;;  %2742 = vmatmul.mubr.f32.vlgmr.msra.gmra.mxu0 %v18106_v4 }
  0xb2   :  { %2861 = vmatpush1.msra.mxu0 %v18208_v36  ;;  %2779 = vmatprep.subr.mxu1 %v18163_v43 }
  0xb3   :  { %2663 = vmatprep.mubr.f32.mxu1 %v19841_v11  ;;  %2894 = vmatprep.mubr.f32.mxu0 %v19841_v11 }
  0xb4   :  { %2665 = vmatmul.mubr.f32.vlgmr.msra.gmra.mxu1 %v18084_v35 }
  0xb5   :  { %2781 = vmatpush1.msra.mxu1 %v18173_v34  ;;  %2814 = vmatprep.mubr.f32.mxu1 %v19841_v11 }
  0xb6   :  { %2933 = vmatprep.subr.mxu1 %v18163_v43  ;;  %2896 = vmatmul.mubr.f32.vlgmr.msra.gmra.mxu0 %v18084_v35 }
  0xb7   :  { %3174 = vmatprep.mubr.f32.mxu0 %v19841_v11 }
  0xb8   :  { %2818 = vmatmul.mubr.f32.vlgmr.msra.gmra.mxu1 %v18133_v19 }
  0xb9   :  { %2935 = vmatpush1.msra.mxu1 %v18173_v34  ;;  %2968 = vmatprep.mubr.f32.mxu1 %v19841_v11 }
  0xbc   :  { %2970 = vmatmul.mubr.f32.vlgmr.msra.gmra.mxu1 %v18084_v35 }
  0xbd   :  { %3260 = vmatprep.mubr.f32.mxu1 %v19841_v11 }
  0xd0   :  { %v191_v4 = vpop.f32.mrf.mxu0 }
  0xd2   :  { %v193_v15 = vpop.f32.mrf.mxu0 }
  0xd4   :  { %v350_v48 = vpop.f32.mrf.mxu0 }
  0xd6   :  { %v352_v36 = vpop.f32.mrf.mxu0 }
  0xd8   :  { %v273_v51 = vpop.f32.mrf.mxu1 }
  0xd9   :  { %v274_v26 = vadd.f32 %v273_v51, %v191_v4 }
  0xda   :  { %v275_v31 = vpop.f32.mrf.mxu1  ;;  %v504_v57 = vpop.f32.mrf.mxu0 }
  0xdb   :  { %v276_v24 = vadd.f32 %v275_v31, %v193_v15  ;;  %v351_v41 = vadd.f32 %v350_v48, %v274_v26 }
  0xdc   :  { %v426_v33 = vpop.f32.mrf.mxu1  ;;  %v506_v42 = vpop.f32.mrf.mxu0 }
  0xdd   :  { %v353_v10 = vadd.f32 %v352_v36, %v276_v24  ;;  %v427_v45 = vadd.f32 %v426_v33, %v351_v41 }
  0xde   :  { %v428_v43 = vpop.f32.mrf.mxu1  ;;  %v656_v39 = vpop.f32.mrf.mxu0 }
  0xdf   :  { %v429_v61 = vadd.f32 %v428_v43, %v353_v10  ;;  %v505_v44 = vadd.f32 %v504_v57, %v427_v45 }
  0xe0   :  { %v578_v19 = vpop.f32.mrf.mxu1  ;;  %v658_v2 = vpop.f32.mrf.mxu0 }
  0xe1   :  { %v507_v51 = vadd.f32 %v506_v42, %v429_v61  ;;  %v579_v48 = vadd.f32 %v578_v19, %v505_v44 }
  0xe2   :  { %v580_v34 = vpop.f32.mrf.mxu1  ;;  %v815_v25 = vpop.f32.mrf.mxu0 }
  0xe3   :  { %v581_v33 = vadd.f32 %v580_v34, %v507_v51 }
  0xe4   :  { %v738_v1 = vpop.f32.mrf.mxu1  ;;  %v817_v8 = vpop.f32.mrf.mxu0 }
  0xe5   :  { %v739_v9 = vadd.f32 %v738_v1, %v656_v39 }
  0xe6   :  { %v740_v35 = vpop.f32.mrf.mxu1  ;;  %v969_v6 = vpop.f32.mrf.mxu0 }
  0xe7   :  { %v741_v26 = vadd.f32 %v740_v35, %v658_v2  ;;  %v816_v24 = vadd.f32 %v815_v25, %v739_v9 }
  0xe8   :  { %v891_v58 = vpop.f32.mrf.mxu1  ;;  %v971_v28 = vpop.f32.mrf.mxu0 }
  0xe9   :  { %v818_v43 = vadd.f32 %v817_v8, %v741_v26  ;;  %v892_v39 = vadd.f32 %v891_v58, %v816_v24 }
  0xea   :  { %v893_v27 = vpop.f32.mrf.mxu1 }
  0xeb   :  { %v894_v2 = vadd.f32 %v893_v27, %v818_v43  ;;  %v970_v9 = vadd.f32 %v969_v6, %v892_v39 }
  0xec   :  { %v1043_v37 = vpop.f32.mrf.mxu1 }
  0xed   :  { %v972_v51 = vadd.f32 %v971_v28, %v894_v2  ;;  %v1044_v26 = vadd.f32 %v1043_v37, %v970_v9 }
  0xee   :  { %v1045_v29 = vpop.f32.mrf.mxu1 }
  0xef   :  { %v1046_v43 = vadd.f32 %v1045_v29, %v972_v51  ;;  %v2983_v51 = vpop.permute.xlu0 %2982 }
 0x148   :  { %v1136_v30 = vpop.f32.mrf.mxu0 }
 0x149   :  { %v1137_v7 = vadd.f32 %v1136_v30, %v579_v48 }
 0x14a   :  { %v1138_v32 = vpop.f32.mrf.mxu0 }
 0x14b   :  { %v1139_v1 = vadd.f32 %v1138_v32, %v581_v33 }
 0x14c   :  { %v1295_v38 = vpop.f32.mrf.mxu0 }
 0x14e   :  { %v1297_v20 = vpop.f32.mrf.mxu0 }
 0x150   :  { %v1218_v49 = vpop.f32.mrf.mxu1 }
 0x151   :  { %v1449_v18 = vpop.f32.mrf.mxu0  ;;  %v1219_v57 = vadd.f32 %v1218_v49, %v1137_v7 }
 0x152   :  { %v1220_v53 = vpop.f32.mrf.mxu1 }
 0x153   :  { %v1451_v60 = vpop.f32.mrf.mxu0  ;;  %v1221_v61 = vadd.f32 %v1220_v53, %v1139_v1  ;;  %v1296_v44 = vadd.f32 %v1295_v38, %v1219_v57 }
 0x154   :  { %v1371_v47 = vpop.f32.mrf.mxu1 }
 0x155   :  { %v1601_v46 = vpop.f32.mrf.mxu0  ;;  %v1298_v30 = vadd.f32 %v1297_v20, %v1221_v61  ;;  %v1372_v58 = vadd.f32 %v1371_v47, %v1296_v44 }
 0x156   :  { %v1373_v21 = vpop.f32.mrf.mxu1  ;;  %v1602_v48 = vadd.f32 %v1601_v46, %v1044_v26 }
 0x157   :  { %v1603_v12 = vpop.f32.mrf.mxu0  ;;  %v1374_v53 = vadd.f32 %v1373_v21, %v1298_v30  ;;  %v1450_v38 = vadd.f32 %v1449_v18, %v1372_v58 }
 0x158   :  { %v1523_v22 = vpop.f32.mrf.mxu1  ;;  %v1604_v61 = vadd.f32 %v1603_v12, %v1046_v43 }
 0x159   :  { %v1760_v23 = vpop.f32.mrf.mxu0  ;;  %v1452_v2 = vadd.f32 %v1451_v60, %v1374_v53  ;;  %v1524_v46 = vadd.f32 %v1523_v22, %v1450_v38 }
 0x15a   :  { %v18252_v4 = vpop.f32.mrf.mxu1 }
 0x15b   :  { %v18254_v31 = vpop.f32.mrf.mxu0  ;;  %v1526_v18 = vadd.f32 %v18252_v4, %v1452_v2 }
 0x15c   :  { %v1683_v15 = vpop.f32.mrf.mxu1 }
 0x15d   :  { %v18256_v36 = vpop.f32.mrf.mxu0  ;;  %v1684_v39 = vadd.f32 %v1683_v15, %v1602_v48 }
 0x15e   :  { %v1685_v41 = vpop.f32.mrf.mxu1 }
 0x15f   :  { %v18258_v10 = vpop.f32.mrf.mxu0  ;;  %v1686_v9 = vadd.f32 %v1685_v41, %v1604_v61  ;;  %v1761_v21 = vadd.f32 %v1760_v23, %v1684_v39 }
 0x160   :  { %v1836_v45 = vpop.f32.mrf.mxu1 }
 0x161   :  { %v2119_v3 = vpop.f32.mrf.mxu0  ;;  %v1763_v12 = vadd.f32 %v18254_v31, %v1686_v9  ;;  %v1837_v60 = vadd.f32 %v1836_v45, %v1761_v21 }
 0x162   :  { %v1838_v42 = vpop.f32.mrf.mxu1 }
 0x163   :  { %v2121_v62 = vpop.f32.mrf.mxu0  ;;  %v1839_v48 = vadd.f32 %v1838_v42, %v1763_v12  ;;  %v1915_v4 = vadd.f32 %v18256_v36, %v1837_v60 }
 0x164   :  { %v18260_v35 = vpop.f32.mrf.mxu1 }
 0x165   :  { %v2278_v25 = vpop.f32.mrf.mxu0  ;;  %v1917_v39 = vadd.f32 %v18258_v10, %v1839_v48 }
 0x166   :  { %v18262_v19 = vpop.f32.mrf.mxu1 }
 0x167   :  { %v2280_v34 = vpop.f32.mrf.mxu0 }
 0x168   :  { %v2201_v8 = vpop.f32.mrf.mxu1 }
 0x169   :  { %v2202_v32 = vadd.f32 %v2201_v8, %v2119_v3  ;;  %v2432_v49 = vpop.f32.mrf.mxu0 }
 0x16a   :  { %v2203_v7 = vpop.f32.mrf.mxu1 }
 0x16b   :  { %v2279_v24 = vadd.f32 %v2278_v25, %v2202_v32  ;;  %v2204_v27 = vadd.f32 %v2203_v7, %v2121_v62  ;;  %v2434_v33 = vpop.f32.mrf.mxu0 }
 0x16c   :  { %v2354_v6 = vpop.f32.mrf.mxu1 }
 0x16d   :  { %v2281_v1 = vadd.f32 %v2280_v34, %v2204_v27  ;;  %v2355_v57 = vadd.f32 %v2354_v6, %v2279_v24  ;;  %v2584_v20 = vpop.f32.mrf.mxu0 }
 0x16e   :  { %v2356_v28 = vpop.f32.mrf.mxu1 }
 0x16f   :  { %v2433_v37 = vadd.f32 %v2432_v49, %v2355_v57  ;;  %v2357_v47 = vadd.f32 %v2356_v28, %v2281_v1  ;;  %v2586_v3 = vpop.f32.mrf.mxu0  ;;  %v1989_v57 = vadd.f32 %v18260_v35, %v1915_v4 }
 0x170   :  { %v2506_v44 = vpop.f32.mrf.mxu1 }
 0x171   :  { %v2435_v25 = vadd.f32 %v2434_v33, %v2357_v47  ;;  %v2507_v62 = vadd.f32 %v2506_v44, %v2433_v37  ;;  %v2743_v30 = vpop.f32.mrf.mxu0  ;;  %v1991_v47 = vadd.f32 %v18262_v19, %v1917_v39  ;;  %v11829_v19 = vld [vmem:[%s19726_s7] sm:$0x7f] }
 0x172   :  { %v2508_v29 = vpop.f32.mrf.mxu1 }
 0x173   :  { %v2976_v15 = vadd.f32 %v2507_v62, %v1524_v46  ;;  %v2509_v34 = vadd.f32 %v2508_v29, %v2435_v25  ;;  %v2745_v41 = vpop.f32.mrf.mxu0  ;;  %v16623_v62 = vld [vmem:[%s19728_s9] sm:$0x3]  ;;  %v3073_v29 = vsub.s32 1, %v17803_v5 }
 0x174   :  { %v2666_v8 = vpop.f32.mrf.mxu1 }
 0x175   :  { %v2977_v26 = vadd.f32 %v2509_v34, %v1526_v18  ;;  %v2985_v58 = vadd.f32 %v2983_v51, %v2976_v15  ;;  %v2667_v32 = vadd.f32 %v2666_v8, %v2584_v20  ;;  %v3078_v15 = vrot.slane %v17974_v52, %v3073_v29 }
 0x176   :  { %v2668_v49 = vpop.f32.mrf.mxu1  ;;  %v2897_v43 = vpop.f32.mrf.mxu0  ;;  %v3074_v48 = vrot.slane %v17966_v50, %v3073_v29 }
 0x177   :  { %v2986_v22 = vadd.f32 %v2983_v51, %v2977_v26  ;;  %vm2989_vm4 = vcmp.ge.f32.partialorder %v2985_v58, 0.0  ;;  %v2993_v23 = vmul.f32 0.3, %v2985_v58  ;;  %v2744_v7 = vadd.f32 %v2743_v30, %v2667_v32  ;;  %v3002_v30 = vld [vmem:[%s19723_s4 + $0x8] sm:$0x7f] }
 0x178   :  { %v2669_v53 = vadd.f32 %v2668_v49, %v2586_v3  ;;  %v2819_v24 = vpop.f32.mrf.mxu1  ;;  %v2899_v36 = vpop.f32.mrf.mxu0  ;;  %v3093_v18 = vsel %vm3091_vm8, %v3002_v30, 0 }
 0x179   :  { %v2994_v27 = vmul.f32 0.3, %v2986_v22  ;;  %v18267_v33 = vsel %vm2989_vm4, %v2985_v58, %v2993_v23  ;;  %v2820_v31 = vadd.f32 %v2819_v24, %v2744_v7  ;;  %vm2990_vm5 = vcmp.ge.f32.partialorder %v2986_v22, 0.0 }
 0x17a   :  { %v2746_v45 = vadd.f32 %v2745_v41, %v2669_v53  ;;  %v2821_v6 = vpop.f32.mrf.mxu1  ;;  %3056 = vrot.lane.b32.xlu1 %v18267_v33, %s17735_s2  ;;  %v18346_v34 = vand.u32 4294901760, %v3093_v18  ;;  %v3086_v53 = vrot.slane %v17987_v56, %v3073_v29 }
 0x17b   :  { %v2898_v38 = vadd.f32 %v2897_v43, %v2820_v31  ;;  %v18272_v20 = vsel %vm2990_vm5, %v2986_v22, %v2994_v27  ;;  %v3082_v22 = vrot.slane %v17982_v55, %v3073_v29 }
 0x17c   :  { %v2822_v1 = vadd.f32 %v2821_v6, %v2746_v45  ;;  %v2971_v42 = vpop.f32.mrf.mxu1  ;;  %v18350_v26 = vsub.f32 %v3093_v18, %v18346_v34 }
 0x17d   :  { %v2972_v61 = vadd.f32 %v2971_v42, %v2898_v38 }
 0x17e   :  { %v2900_v28 = vadd.f32 %v2899_v36, %v2822_v1  ;;  %v2973_v2 = vpop.f32.mrf.mxu1  ;;  %3058 = vrot.lane.b32.xlu1 %v18272_v20, %s17735_s2  ;;  %v18358_v49 = vand.u32 4294901760, %v18350_v26  ;;  %v18369_v1 = vsub.s32 0, %v17803_v5 }
 0x17f   :  { %v2978_v37 = vadd.f32 %v2972_v61, %v1989_v57 }
 0x180   :  { %v2974_v3 = vadd.f32 %v2973_v2, %v2900_v28  ;;  %v3178_v31 = vsub.f32 %v18350_v26, %v18358_v49 }
 0x181   :  { %v2987_v9 = vadd.f32 %v2983_v51, %v2978_v37 }
 0x182   :  { %v2979_v44 = vadd.f32 %v2974_v3, %v1991_v47  ;;  %v3179_v28 = vand.u32 4294901760, %v3178_v31 }
 0x183   :  { %vm2991_vm6 = vcmp.ge.f32.partialorder %v2987_v9, 0.0  ;;  %v2995_v10 = vmul.f32 0.3, %v2987_v9 }
 0x184   :  { %v2988_v46 = vadd.f32 %v2983_v51, %v2979_v44 }
 0x185   :  { %v18276_v21 = vsel %vm2991_vm6, %v2987_v9, %v2995_v10  ;;  %v3040_v9 = vrot.slane %v17974_v52, %v18369_v1 }
 0x186   :  { %vm2992_vm7 = vcmp.ge.f32.partialorder %v2988_v46, 0.0  ;;  %v2996_v35 = vmul.f32 0.3, %v2988_v46  ;;  %3060 = vrot.lane.b32.xlu1 %v18276_v21, %s17735_s2 }
 0x188   :  { %v18279_v25 = vsel %vm2992_vm7, %v2988_v46, %v2996_v35  ;;  %v3001_v46 = vld [vmem:[%s19723_s4] sm:$0x7f] }
 0x189   :  { %3053 = vrot.lane.b32.xlu0 %v18279_v25, %s17735_s2  ;;  %v4039_v18 = vsel %vm3091_vm8, %v3001_v46, 0  ;;  %v18453_v46 = vld [vmem:[%s19720_s1 + $0x8] sm:$0xff] }
 0x18a   :  { %3020 = vrot.lane.b32.xlu1 %v18272_v20, %s17736_s11 }
 0x18d   :  { %3018 = vrot.lane.b32.xlu0 %v18267_v33, %s17736_s11 }
 0x18e   :  { %3022 = vrot.lane.b32.xlu1 %v18276_v21, %s17736_s11 }
 0x191   :  { %3012 = vrot.lane.b32.xlu0 %v18279_v25, %s17736_s11 }
 0x192   :  { %4988 = vrot.lane.b32.xlu1 %v18272_v20, %s17737_s12 }
 0x195   :  { %4986 = vrot.lane.b32.xlu0 %v18267_v33, %s17737_s12 }
 0x196   :  { %4990 = vrot.lane.b32.xlu1 %v18276_v21, %s17737_s12 }
 0x199   :  { %4983 = vrot.lane.b32.xlu0 %v18279_v25, %s17737_s12 }
 0x19a   :  { %5974 = vrot.lane.b32.xlu1 %v18272_v20, %s17732_s0 }
 0x19d   :  { %5972 = vrot.lane.b32.xlu0 %v18267_v33, %s17732_s0 }
 0x19e   :  { %5976 = vrot.lane.b32.xlu1 %v18276_v21, %s17732_s0 }
 0x1a1   :  { %5969 = vrot.lane.b32.xlu0 %v18279_v25, %s17732_s0 }
 0x1a2   :  { %7888 = vrot.lane.b32.xlu1 %v18276_v21, %s17733_s17 }
 0x1a5   :  { %7886 = vrot.lane.b32.xlu0 %v18272_v20, %s17733_s17 }
 0x1a6   :  { %7890 = vrot.lane.b32.xlu1 %v18279_v25, %s17733_s17 }
 0x1a9   :  { %7884 = vrot.lane.b32.xlu0 %v18267_v33, %s17733_s17 }
 0x1aa   :  { %8858 = vrot.lane.b32.xlu1 %v18276_v21, %s17738_s13 }
 0x1ad   :  { %8856 = vrot.lane.b32.xlu0 %v18272_v20, %s17738_s13 }
 0x1ae   :  { %8860 = vrot.lane.b32.xlu1 %v18279_v25, %s17738_s13 }
 0x1b1   :  { %8854 = vrot.lane.b32.xlu0 %v18267_v33, %s17738_s13 }
 0x1b2   :  { %9845 = vrot.lane.b32.xlu1 %v18276_v21, %s17739_s14 }
 0x1b5   :  { %9843 = vrot.lane.b32.xlu0 %v18272_v20, %s17739_s14 }
 0x1b6   :  { %9847 = vrot.lane.b32.xlu1 %v18279_v25, %s17739_s14 }
 0x1b9   :  { %9841 = vrot.lane.b32.xlu0 %v18267_v33, %s17739_s14 }
 0x1ba   :  { %10832 = vrot.lane.b32.xlu1 %v18276_v21, %s17740_s15 }
 0x1bd   :  { %10830 = vrot.lane.b32.xlu0 %v18272_v20, %s17740_s15 }
 0x1be   :  { %10834 = vrot.lane.b32.xlu1 %v18279_v25, %s17740_s15 }
 0x1c1   :  { %10828 = vrot.lane.b32.xlu0 %v18267_v33, %s17740_s15 }
 0x1c2   :  { %11835 = vrot.lane.b32.xlu1 %v17833_v17, %s17737_s12 }
 0x1c5   :  { %11833 = vrot.lane.b32.xlu0 %v17817_v13, %s17737_s12 }
 0x1c6   :  { %11837 = vrot.lane.b32.xlu1 %v17820_v14, %s17737_s12 }
 0x1c9   :  { %11830 = vrot.lane.b32.xlu0 %v17829_v16, %s17737_s12 }
 0x1ca   :  { %15607 = vrot.lane.b32.xlu1 %v17820_v14, %s17738_s13 }
 0x1cd   :  { %15605 = vrot.lane.b32.xlu0 %v17833_v17, %s17738_s13 }
 0x1ce   :  { %15609 = vrot.lane.b32.xlu1 %v17829_v16, %s17738_s13 }
 0x1d1   :  { %15603 = vrot.lane.b32.xlu0 %v17817_v13, %s17738_s13 }
 0x1d5   :  { %16575 = vperm.xlu0 %17701, %v11829_v19  }
 0x1d9   :  { %16626 = vperm.xlu0 %17701, %v16623_v62   ;;  %v3036_v62 = vrot.slane %v17966_v50, %v18369_v1 }
 0x1ec   :  { %v3057_v51 = vpop.permute.xlu1 %3056 }
 0x1f0   :  { %v3059_v12 = vpop.permute.xlu1 %3058 }
 0x1f1   :  { %v3063_v8 = vsel %vm3062_vm9, %v3057_v51, %v3059_v12 }
 0x1f2   :  { %v3088_v60 = vmul.f32 %v3078_v15, %v3063_v8 }
 0x1f4   :  { %v3100_v58 = vsel %vm3095_vm10, %v3088_v60, 0  ;;  %v18393_v60 = vand.u32 4294901760, %v4039_v18 }
 0x1f5   :  { %v18353_v32 = vand.u32 4294901760, %v3100_v58 }
 0x1f7   :  { %v3217_v41 = vsub.f32 %v3100_v58, %v18353_v32  ;;  %3139 = vmatprep.subr.mxu0 %v18353_v32 }
 0x1f8   :  { %v3061_v23 = vpop.permute.xlu1 %3060 }
 0x1f9   :  { %v3064_v7 = vsel %vm3062_vm9, %v3059_v12, %v3061_v23  ;;  %v3218_v24 = vand.u32 4294901760, %v3217_v41 }
 0x1fa   :  { %v3089_v43 = vmul.f32 %v3082_v22, %v3064_v7 }
 0x1fb   :  { %v3054_v4 = vpop.permute.xlu0 %3053  ;;  %v3219_v27 = vsub.f32 %v3217_v41, %v3218_v24 }
 0x1fc   :  { %v3065_v45 = vsel %vm3062_vm9, %v3061_v23, %v3054_v4  ;;  %v3070_v6 = vsel %vm3062_vm9, %v3054_v4, %v3057_v51  ;;  %v3103_v2 = vsel %vm3095_vm10, %v3089_v43, 0  ;;  %v3021_v3 = vpop.permute.xlu1 %3020  ;;  %v3048_v4 = vrot.slane %v17987_v56, %v18369_v1 }
 0x1fd   :  { %v3087_v38 = vmul.f32 %v3074_v48, %v3070_v6  ;;  %v3090_v39 = vmul.f32 %v3086_v53, %v3065_v45  ;;  %v3220_v42 = vand.u32 4294901760, %v3219_v27  ;;  %v18382_v35 = vand.u32 4294901760, %v3103_v2 }
 0x1fe   :  { %v18404_v53 = vsub.f32 %v4039_v18, %v18393_v60  ;;  %v3044_v45 = vrot.slane %v17982_v55, %v18369_v1  ;;  %v18475_v18 = vld [vmem:[%s19720_s1] sm:$0xff] }
 0x1ff   :  { %v3097_v57 = vsel %vm3095_vm10, %v3087_v38, 0  ;;  %v3106_v36 = vsel %vm3095_vm10, %v3090_v39, 0  ;;  %v3019_v61 = vpop.permute.xlu0 %3018  ;;  %3221 = vmatprep.subr.mxu1 %v3220_v42  ;;  %v3688_v15 = vsub.f32 %v3103_v2, %v18382_v35  ;;  %v18434_v2 = vsub.s32 2, %v17803_v5 }
 0x200   :  { %v3140_v37 = vand.u32 4294901760, %v3097_v57  ;;  %v18374_v47 = vand.u32 4294901760, %v3106_v36  ;;  %v3025_v10 = vsel %vm3024_vm11, %v3019_v61, %v3021_v3  ;;  %v18420_v38 = vand.u32 4294901760, %v18404_v53 }
 0x201   :  { %v3050_v30 = vmul.f32 %v3040_v9, %v3025_v10  ;;  %v3689_v22 = vand.u32 4294901760, %v3688_v15 }
 0x202   :  { %v3223_v44 = vsub.f32 %v3097_v57, %v3140_v37  ;;  %3141 = vmatpush1.msra.mxu0 %v3140_v37  ;;  %v3682_v52 = vsub.f32 %v3106_v36, %v18374_v47  ;;  %v4123_v36 = vsub.f32 %v18404_v53, %v18420_v38 }
 0x203   :  { %3180 = vmatmul.mubr.f32.vlgmr.msra.gmra.mxu0 %v3179_v28  ;;  %3300 = vmatprep.subr.mxu0 %v3217_v41  ;;  %v3013_v19 = vpop.permute.xlu0 %3012  ;;  %v4045_v58 = vsel %vm3095_vm10, %v3050_v30, 0  ;;  %v3690_v43 = vsub.f32 %v3688_v15, %v3689_v22  ;;  %v3003_v30 = vld [vmem:[%s19723_s4 + $0x10] sm:$0x7f] }
 0x204   :  { %3303 = vmatpush1.msra.mxu0 %v3223_v44  ;;  %3336 = vmatprep.mubr.f32.mxu0 %v19841_v11  ;;  %v3032_v29 = vsel %vm3024_vm11, %v3013_v19, %v3019_v61  ;;  %v3224_v51 = vand.u32 4294901760, %v3223_v44  ;;  %v3683_v50 = vand.u32 4294901760, %v3682_v52  ;;  %v18398_v23 = vand.u32 4294901760, %v4045_v58 }
 0x205   :  { %3454 = vmatprep.subr.mxu0 %v3218_v24  ;;  %v3049_v8 = vmul.f32 %v3036_v62, %v3032_v29  ;;  %v3023_v24 = vpop.permute.xlu1 %3022  ;;  %v3691_v55 = vand.u32 4294901760, %v3690_v43  ;;  %v18446_v9 = vand.u32 4294901760, %v4123_v36 }
 0x206   :  { %v3225_v12 = vsub.f32 %v3223_v44, %v3224_v51  ;;  %v3684_v48 = vsub.f32 %v3682_v52, %v3683_v50  ;;  %v3027_v27 = vsel %vm3024_vm11, %v3023_v24, %v3013_v19  ;;  %v4162_v6 = vsub.f32 %v4045_v58, %v18398_v23 }
 0x207   :  { %3339 = vmatmul.mubr.f32.vlgmr.msra.gmra.mxu0 %v18350_v26  ;;  %v4042_v7 = vsel %vm3095_vm10, %v3049_v8, 0  ;;  %v3052_v39 = vmul.f32 %v3048_v4, %v3027_v27  ;;  %v4987_v57 = vpop.permute.xlu0 %4986  ;;  %v18457_v19 = vrot.slane %v18453_v46, %v18434_v2  ;;  %v5021_v58 = vsel %vm3091_vm8, %v3003_v30, 0 }
 0x208   :  { %3458 = vmatpush1.msra.mxu0 %v3224_v51  ;;  %3491 = vmatprep.mubr.f32.mxu0 %v19841_v11  ;;  %v3226_v41 = vand.u32 4294901760, %v3225_v12  ;;  %v18411_v31 = vand.u32 4294901760, %v4042_v7  ;;  %v3685_v56 = vand.u32 4294901760, %v3684_v48  ;;  %v4163_v61 = vand.u32 4294901760, %v4162_v6 }
 0x209   :  { %3604 = vmatprep.subr.mxu0 %v18374_v47  ;;  %v18448_v10 = vpop.permute.xlu1 %4988 }
 0x20a   :  { %3227 = vmatpush1.msra.mxu1 %v3226_v41  ;;  %v18424_v42 = vsub.f32 %v4042_v7, %v18411_v31  ;;  %v4164_v44 = vsub.f32 %v4162_v6, %v4163_v61  ;;  %v4992_v62 = vsel %vm105_vm0, %v4987_v57, %v18448_v10  ;;  %v18495_v7 = vand.u32 4294901760, %v5021_v58 }
 0x20b   :  { %3493 = vmatmul.mubr.f32.vlgmr.msra.gmra.mxu0 %v18346_v34  ;;  %3262 = vmatmul.mubr.f32.vlgmr.msra.gmra.mxu1 %v18346_v34  ;;  %v5017_v8 = vmul.f32 %v18457_v19, %v4992_v62 }
 0x20c   :  { %3376 = vmatprep.subr.mxu1 %v18353_v32  ;;  %3606 = vmatpush1.msra.mxu0 %v18382_v35  ;;  %v18508_v43 = vsub.f32 %v5021_v58, %v18495_v7 }
 0x20d   :  { %3378 = vmatpush1.msra.mxu1 %v3140_v37  ;;  %3765 = vmatprep.subr.mxu0 %v3682_v52  ;;  %v4984_v52 = vpop.permute.xlu0 %4983  ;;  %v5027_v48 = vsel %vm3095_vm10, %v5017_v8, 0 }
 0x20e   :  { %3530 = vmatprep.subr.mxu1 %v18353_v32  ;;  %3411 = vmatprep.mubr.f32.mxu1 %v19841_v11  ;;  %v3026_v32 = vsel %vm3024_vm11, %v3021_v3, %v3023_v24  ;;  %v18502_v4 = vand.u32 4294901760, %v5027_v48  ;;  %v18540_v36 = vand.u32 4294901760, %v18508_v43 }
 0x20f   :  { %3639 = vmatprep.mubr.f32.mxu0 %v19841_v11  ;;  %3415 = vmatmul.mubr.f32.vlgmr.msra.gmra.mxu1 %v18358_v49  ;;  %v3051_v1 = vmul.f32 %v3044_v45, %v3026_v32  ;;  %v4991_v45 = vpop.permute.xlu1 %4990 }
 0x210   :  { %3645 = vmatmul.mubr.f32.vlgmr.msra.gmra.mxu0 %v3179_v28  ;;  %3532 = vmatpush1.msra.mxu1 %v3140_v37  ;;  %v4051_v28 = vsel %vm3095_vm10, %v3052_v39, 0  ;;  %v4994_v32 = vsel %vm105_vm0, %v4991_v45, %v4984_v52 }
 0x211   :  { %3768 = vmatpush1.msra.mxu0 %v3688_v15  ;;  %3686 = vmatprep.subr.mxu1 %v3685_v56  ;;  %v4048_v37 = vsel %vm3095_vm10, %v3051_v1, 0  ;;  %v18442_v3 = vand.u32 4294901760, %v4051_v28  ;;  %v4165_v15 = vand.u32 4294901760, %v4164_v44  ;;  %v18513_v56 = vld [vmem:[%s19720_s1 + $0x18] sm:$0xff] }
 0x212   :  { %3919 = vmatprep.subr.mxu0 %v3683_v50  ;;  %3565 = vmatprep.mubr.f32.mxu1 %v19841_v11  ;;  %v18467_v29 = vand.u32 4294901760, %v4048_v37  ;;  %v4999_v50 = vsel %vm105_vm0, %v4984_v52, %v4987_v57  ;;  %v5144_v57 = vsub.f32 %v5027_v48, %v18502_v4 }
 0x213   :  { %3801 = vmatprep.mubr.f32.mxu0 %v19841_v11  ;;  %3567 = vmatmul.mubr.f32.vlgmr.msra.gmra.mxu1 %v18346_v34  ;;  %v4627_v12 = vsub.f32 %v4051_v28, %v18442_v3 }
 0x214   :  { %3804 = vmatmul.mubr.f32.vlgmr.msra.gmra.mxu0 %v18350_v26  ;;  %3692 = vmatpush1.msra.mxu1 %v3691_v55  ;;  %v4169_v26 = vand.u32 4294901760, %v18424_v42  ;;  %v4633_v41 = vsub.f32 %v4048_v37, %v18467_v29  ;;  %v18530_v55 = vld [vmem:[%s19720_s1 + $0x10] sm:$0xff]  ;;  %v5145_v44 = vand.u32 4294901760, %v5144_v57 }
 0x215   :  { %3923 = vmatpush1.msra.mxu0 %v3689_v22  ;;  %3841 = vmatprep.subr.mxu1 %v18374_v47  ;;  %v18534_v1 = vrot.slane %v18530_v55, %v18434_v2 }
 0x216   :  { %4084 = vmatprep.subr.mxu0 %v18398_v23  ;;  %3725 = vmatprep.mubr.f32.mxu1 %v19841_v11  ;;  %v4170_v51 = vsub.f32 %v18424_v42, %v4169_v26  ;;  %v4634_v24 = vand.u32 4294901760, %v4633_v41 }
 0x217   :  { %3956 = vmatprep.mubr.f32.mxu0 %v19841_v11  ;;  %3727 = vmatmul.mubr.f32.vlgmr.msra.gmra.mxu1 %v18346_v34 }
 0x218   :  { %3958 = vmatmul.mubr.f32.vlgmr.msra.gmra.mxu0 %v18346_v34  ;;  %3843 = vmatpush1.msra.mxu1 %v18382_v35 }
 0x219   :  { %4086 = vmatpush1.msra.mxu0 %v18411_v31  ;;  %3995 = vmatprep.subr.mxu1 %v18374_v47  ;;  %v18479_v47 = vrot.slane %v18475_v18, %v18434_v2 }
 0x21a   :  { %4245 = vmatprep.subr.mxu0 %v4162_v6  ;;  %3876 = vmatprep.mubr.f32.mxu1 %v19841_v11  ;;  %v18517_v6 = vrot.slane %v18513_v56, %v18434_v2 }
 0x21b   :  { %4119 = vmatprep.mubr.f32.mxu0 %v19841_v11  ;;  %3880 = vmatmul.mubr.f32.vlgmr.msra.gmra.mxu1 %v18358_v49  ;;  %v4171_v49 = vand.u32 4294901760, %v4170_v51  ;;  %v5016_v22 = vmul.f32 %v18479_v47, %v4999_v50  ;;  %v5146_v51 = vsub.f32 %v5144_v57, %v5145_v44  ;;  %v3004_v50 = vld [vmem:[%s19723_s4 + $0x18] sm:$0x7f] }
 0x21c   :  { %4125 = vmatmul.mubr.f32.vlgmr.msra.gmra.mxu0 %v18446_v9  ;;  %3997 = vmatpush1.msra.mxu1 %v18382_v35  ;;  %v4628_v35 = vand.u32 4294901760, %v4627_v12  ;;  %v5019_v28 = vmul.f32 %v18517_v6, %v4994_v32  ;;  %v5991_v48 = vsel %vm3091_vm8, %v3004_v50, 0 }
 0x21d   :  { %4248 = vmatpush1.msra.mxu0 %v18424_v42  ;;  %4166 = vmatprep.subr.mxu1 %v4165_v15  ;;  %v4635_v42 = vsub.f32 %v4633_v41, %v4634_v24  ;;  %v5975_v15 = vpop.permute.xlu1 %5974 }
 0x21e   :  { %4399 = vmatprep.subr.mxu0 %v4163_v61  ;;  %4030 = vmatprep.mubr.f32.mxu1 %v19841_v11  ;;  %v4629_v27 = vsub.f32 %v4627_v12, %v4628_v35  ;;  %v4993_v61 = vsel %vm105_vm0, %v18448_v10, %v4991_v45  ;;  %v5033_v10 = vsel %vm3095_vm10, %v5019_v28, 0 }
 0x21f   :  { %4281 = vmatprep.mubr.f32.mxu0 %v19841_v11  ;;  %4032 = vmatmul.mubr.f32.vlgmr.msra.gmra.mxu1 %v18346_v34  ;;  %v5024_v34 = vsel %vm3095_vm10, %v5016_v22, 0  ;;  %v5018_v37 = vmul.f32 %v18534_v1, %v4993_v61 }
 0x220   :  { %4284 = vmatmul.mubr.f32.vlgmr.msra.gmra.mxu0 %v18404_v53  ;;  %4172 = vmatpush1.msra.mxu1 %v4171_v49  ;;  %v18523_v39 = vand.u32 4294901760, %v5024_v34  ;;  %v5147_v49 = vand.u32 4294901760, %v5146_v51 }
 0x221   :  { %4403 = vmatpush1.msra.mxu0 %v4169_v26  ;;  %4321 = vmatprep.subr.mxu1 %v18398_v23  ;;  %v4636_v26 = vand.u32 4294901760, %v4635_v42  ;;  %v5030_v52 = vsel %vm3095_vm10, %v5018_v37, 0 }
 0x222   :  { %4549 = vmatprep.subr.mxu0 %v18442_v3  ;;  %4205 = vmatprep.mubr.f32.mxu1 %v19841_v11  ;;  %v5150_v2 = vsub.f32 %v5024_v34, %v18523_v39  ;;  %v18571_v58 = vand.u32 4294901760, %v5030_v52 }
 0x223   :  { %4436 = vmatprep.mubr.f32.mxu0 %v19841_v11  ;;  %4207 = vmatmul.mubr.f32.vlgmr.msra.gmra.mxu1 %v18393_v60 }
 0x224   :  { %4438 = vmatmul.mubr.f32.vlgmr.msra.gmra.mxu0 %v18393_v60  ;;  %4323 = vmatpush1.msra.mxu1 %v18411_v31  ;;  %v5151_v62 = vand.u32 4294901760, %v5150_v2 }
 0x225   :  { %4551 = vmatpush1.msra.mxu0 %v18467_v29  ;;  %4475 = vmatprep.subr.mxu1 %v18398_v23  ;;  %v4630_v23 = vand.u32 4294901760, %v4629_v27 }
 0x226   :  { %4710 = vmatprep.subr.mxu0 %v4627_v12  ;;  %4356 = vmatprep.mubr.f32.mxu1 %v19841_v11 }
 0x227   :  { %4584 = vmatprep.mubr.f32.mxu0 %v19841_v11  ;;  %4360 = vmatmul.mubr.f32.vlgmr.msra.gmra.mxu1 %v18420_v38 }
 0x228   :  { %4590 = vmatmul.mubr.f32.vlgmr.msra.gmra.mxu0 %v18446_v9  ;;  %4477 = vmatpush1.msra.mxu1 %v18411_v31  ;;  %v5973_v9 = vpop.permute.xlu0 %5972  ;;  %v5105_v31 = vsub.f32 %v18508_v43, %v18540_v36 }
 0x229   :  { %4713 = vmatpush1.msra.mxu0 %v4633_v41  ;;  %4631 = vmatprep.subr.mxu1 %v4630_v23  ;;  %v5978_v12 = vsel %vm76_vm2, %v5973_v9, %v5975_v15  ;;  %v5152_v41 = vsub.f32 %v5150_v2, %v5151_v62  ;;  %v5977_v23 = vpop.permute.xlu1 %5976 }
 0x22a   :  { %4864 = vmatprep.subr.mxu0 %v4628_v35  ;;  %4510 = vmatprep.mubr.f32.mxu1 %v19841_v11  ;;  %v5106_v30 = vand.u32 4294901760, %v5105_v31 }
 0x22b   :  { %4746 = vmatprep.mubr.f32.mxu0 %v19841_v11  ;;  %4512 = vmatmul.mubr.f32.vlgmr.msra.gmra.mxu1 %v18393_v60 }
 0x22c   :  { %4749 = vmatmul.mubr.f32.vlgmr.msra.gmra.mxu0 %v18404_v53  ;;  %4637 = vmatpush1.msra.mxu1 %v4636_v26  ;;  %v18560_v53 = vand.u32 4294901760, %v5033_v10  ;;  %v5970_v8 = vpop.permute.xlu0 %5969 }
 0x22d   :  { %4868 = vmatpush1.msra.mxu0 %v4634_v24  ;;  %4786 = vmatprep.subr.mxu1 %v18442_v3  ;;  %v5985_v35 = vsel %vm76_vm2, %v5970_v8, %v5973_v9  ;;  %v5615_v24 = vsub.f32 %v5030_v52, %v18571_v58  ;;  %v5979_v9 = vsel %vm76_vm2, %v5975_v15, %v5977_v23  ;;  %v3005_v15 = vld [vmem:[%s19723_s4 + $0x20] sm:$0x7f] }
 0x22e   :  { %5066 = vmatprep.subr.mxu0 %v18502_v4  ;;  %4670 = vmatprep.mubr.f32.mxu1 %v19841_v11  ;;  %v5609_v22 = vsub.f32 %v5033_v10, %v18560_v53  ;;  %v5986_v34 = vmul.f32 %v5985_v35, %v17977_v54  ;;  %v5988_v10 = vmul.f32 %v5979_v9, %v17998_v63 }
 0x22f   :  { %4901 = vmatprep.mubr.f32.mxu0 %v19841_v11  ;;  %4672 = vmatmul.mubr.f32.vlgmr.msra.gmra.mxu1 %v18393_v60  ;;  %v5616_v54 = vand.u32 4294901760, %v5615_v24 }
 0x230   :  { %4903 = vmatmul.mubr.f32.vlgmr.msra.gmra.mxu0 %v18393_v60  ;;  %4788 = vmatpush1.msra.mxu1 %v18467_v29  ;;  %v6000_v52 = vsel %vm3095_vm10, %v5988_v10, 0 }
 0x231   :  { %5068 = vmatpush1.msra.mxu0 %v18523_v39  ;;  %4940 = vmatprep.subr.mxu1 %v18442_v3  ;;  %v5987_v3 = vmul.f32 %v5978_v12, %v17993_v59  ;;  %v5610_v59 = vand.u32 4294901760, %v5609_v22  ;;  %v5617_v28 = vsub.f32 %v5615_v24, %v5616_v54  ;;  %v18642_v12 = vand.u32 4294901760, %v6000_v52 }
 0x232   :  { %5227 = vmatprep.subr.mxu0 %v5144_v57  ;;  %4821 = vmatprep.mubr.f32.mxu1 %v19841_v11  ;;  %v5980_v57 = vsel %vm76_vm2, %v5977_v23, %v5970_v8 }
 0x233   :  { %5101 = vmatprep.mubr.f32.mxu0 %v19841_v11  ;;  %4825 = vmatmul.mubr.f32.vlgmr.msra.gmra.mxu1 %v18420_v38  ;;  %v5153_v38 = vand.u32 4294901760, %v5152_v41  ;;  %v5997_v27 = vsel %vm3095_vm10, %v5987_v3, 0  ;;  %v5611_v32 = vsub.f32 %v5609_v22, %v5610_v59 }
 0x234   :  { %5107 = vmatmul.mubr.f32.vlgmr.msra.gmra.mxu0 %v5106_v30  ;;  %4942 = vmatpush1.msra.mxu1 %v18467_v29  ;;  %v18587_v29 = vand.u32 4294901760, %v5991_v48  ;;  %v18594_v45 = vand.u32 4294901760, %v5997_v27 }
 0x235   :  { %5230 = vmatpush1.msra.mxu0 %v5150_v2  ;;  %5148 = vmatprep.subr.mxu1 %v5147_v49  ;;  %v5612_v2 = vand.u32 4294901760, %v5611_v32  ;;  %v6585_v49 = vsub.f32 %v6000_v52, %v18642_v12 }
 0x236   :  { %5381 = vmatprep.subr.mxu0 %v5145_v44  ;;  %4975 = vmatprep.mubr.f32.mxu1 %v19841_v11  ;;  %v18600_v42 = vsub.f32 %v5991_v48, %v18587_v29  ;;  %v6114_v26 = vsub.f32 %v5997_v27, %v18594_v45  ;;  %v5618_v44 = vand.u32 4294901760, %v5617_v28 }
 0x237   :  { %5263 = vmatprep.mubr.f32.mxu0 %v19841_v11  ;;  %4977 = vmatmul.mubr.f32.vlgmr.msra.gmra.mxu1 %v18393_v60  ;;  %v5994_v60 = vsel %vm3095_vm10, %v5986_v34, 0  ;;  %v6586_v35 = vand.u32 4294901760, %v6585_v49 }
 0x238   :  { %5266 = vmatmul.mubr.f32.vlgmr.msra.gmra.mxu0 %v18508_v43  ;;  %5154 = vmatpush1.msra.mxu1 %v5153_v38  ;;  %v18606_v61 = vand.u32 4294901760, %v5994_v60  ;;  %v18613_v37 = vand.u32 4294901760, %v18600_v42 }
 0x239   :  { %5385 = vmatpush1.msra.mxu0 %v5151_v62  ;;  %5303 = vmatprep.subr.mxu1 %v18502_v4  ;;  %v6587_v38 = vsub.f32 %v6585_v49, %v6586_v35 }
 0x23a   :  { %5531 = vmatprep.subr.mxu0 %v18560_v53  ;;  %5187 = vmatprep.mubr.f32.mxu1 %v19841_v11  ;;  %v6120_v31 = vsub.f32 %v5994_v60, %v18606_v61  ;;  %v7887_v60 = vpop.permute.xlu0 %7886 }
 0x23b   :  { %5418 = vmatprep.mubr.f32.mxu0 %v19841_v11  ;;  %5189 = vmatmul.mubr.f32.vlgmr.msra.gmra.mxu1 %v18495_v7 }
 0x23c   :  { %5420 = vmatmul.mubr.f32.vlgmr.msra.gmra.mxu0 %v18495_v7  ;;  %5305 = vmatpush1.msra.mxu1 %v18523_v39  ;;  %v6121_v63 = vand.u32 4294901760, %v6120_v31 }
 0x23d   :  { %5533 = vmatpush1.msra.mxu0 %v18571_v58  ;;  %5457 = vmatprep.subr.mxu1 %v18502_v4  ;;  %v5989_v4 = vmul.f32 %v5980_v57, %v18001_v0  ;;  %v6075_v0 = vsub.f32 %v18600_v42, %v18613_v37  ;;  %v6948_v57 = vsel %vm3095_vm10, %v18279_v25, 0  ;;  %v6946_v25 = vsel %vm3095_vm10, %v18276_v21, 0 }
 0x23e   :  { %5692 = vmatprep.subr.mxu0 %v5609_v22  ;;  %5338 = vmatprep.mubr.f32.mxu1 %v19841_v11  ;;  %v6122_v8 = vsub.f32 %v6120_v31, %v6121_v63 }
 0x23f   :  { %5566 = vmatprep.mubr.f32.mxu0 %v19841_v11  ;;  %5342 = vmatmul.mubr.f32.vlgmr.msra.gmra.mxu1 %v18540_v36  ;;  %v6003_v62 = vsel %vm3095_vm10, %v5989_v4, 0  ;;  %v7885_v4 = vpop.permute.xlu0 %7884 }
 0x240   :  { %5572 = vmatmul.mubr.f32.vlgmr.msra.gmra.mxu0 %v5106_v30  ;;  %5459 = vmatpush1.msra.mxu1 %v18523_v39  ;;  %v6115_v39 = vand.u32 4294901760, %v6114_v26  ;;  %v6076_v30 = vand.u32 4294901760, %v6075_v0  ;;  %v6123_v22 = vand.u32 4294901760, %v6122_v8 }
 0x241   :  { %5695 = vmatpush1.msra.mxu0 %v5615_v24  ;;  %5613 = vmatprep.subr.mxu1 %v5612_v2  ;;  %v6942_v24 = vsel %vm3095_vm10, %v18267_v33, 0  ;;  %v18700_v2 = vand.u32 4294901760, %v6948_v57 }
 0x242   :  { %5846 = vmatprep.subr.mxu0 %v5610_v59  ;;  %5492 = vmatprep.mubr.f32.mxu1 %v19841_v11  ;;  %v6116_v51 = vsub.f32 %v6114_v26, %v6115_v39  ;;  %v18677_v34 = vand.u32 4294901760, %v6942_v24 }
 0x243   :  { %5728 = vmatprep.mubr.f32.mxu0 %v19841_v11  ;;  %5494 = vmatmul.mubr.f32.vlgmr.msra.gmra.mxu1 %v18495_v7  ;;  %v7524_v0 = vsub.f32 %v6948_v57, %v18700_v2  ;;  %v18768_v57 = vsub.s32 6, %v17803_v5 }
 0x244   :  { %5731 = vmatmul.mubr.f32.vlgmr.msra.gmra.mxu0 %v18508_v43  ;;  %5619 = vmatpush1.msra.mxu1 %v5618_v44  ;;  %v18632_v43 = vand.u32 4294901760, %v6003_v62  ;;  %v6117_v50 = vand.u32 4294901760, %v6116_v51  ;;  %v18713_v44 = vand.u32 4294901760, %v6946_v25 }
 0x245   :  { %5850 = vmatpush1.msra.mxu0 %v5616_v54  ;;  %5768 = vmatprep.subr.mxu1 %v18560_v53  ;;  %v6588_v54 = vand.u32 4294901760, %v6587_v38 }
 0x246   :  { %6036 = vmatprep.subr.mxu0 %v18594_v45  ;;  %5652 = vmatprep.mubr.f32.mxu1 %v19841_v11  ;;  %v6579_v41 = vsub.f32 %v6003_v62, %v18632_v43  ;;  %v7892_v62 = vsel %vm2001_vm3, %v7885_v4, %v7887_v60  ;;  %v7530_v52 = vsub.f32 %v6946_v25, %v18713_v44 }
 0x247   :  { %5883 = vmatprep.mubr.f32.mxu0 %v19841_v11  ;;  %5654 = vmatmul.mubr.f32.vlgmr.msra.gmra.mxu1 %v18495_v7 }
 0x248   :  { %5885 = vmatmul.mubr.f32.vlgmr.msra.gmra.mxu0 %v18495_v7  ;;  %5770 = vmatpush1.msra.mxu1 %v18571_v58 }
 0x249   :  { %6038 = vmatpush1.msra.mxu0 %v18606_v61  ;;  %5922 = vmatprep.subr.mxu1 %v18560_v53  ;;  %v6940_v53 = vsel %vm3091_vm8, %v3005_v15, 0 }
 0x24a   :  { %6197 = vmatprep.subr.mxu0 %v6114_v26  ;;  %5803 = vmatprep.mubr.f32.mxu1 %v19841_v11  ;;  %v18655_v3 = vand.u32 4294901760, %v6940_v53  ;;  %v7889_v26 = vpop.permute.xlu1 %7888 }
 0x24b   :  { %6071 = vmatprep.mubr.f32.mxu0 %v19841_v11  ;;  %5807 = vmatmul.mubr.f32.vlgmr.msra.gmra.mxu1 %v18540_v36  ;;  %v6580_v36 = vand.u32 4294901760, %v6579_v41  ;;  %v7893_v9 = vsel %vm2001_vm3, %v7887_v60, %v7889_v26  ;;  %v8857_v60 = vpop.permute.xlu0 %8856 }
 0x24c   :  { %6077 = vmatmul.mubr.f32.vlgmr.msra.gmra.mxu0 %v6076_v30  ;;  %5924 = vmatpush1.msra.mxu1 %v18571_v58  ;;  %v6944_v58 = vsel %vm3095_vm10, %v18272_v20, 0  ;;  %v18670_v20 = vsub.f32 %v6940_v53, %v18655_v3 }
 0x24d   :  { %6200 = vmatpush1.msra.mxu0 %v6120_v31  ;;  %6118 = vmatprep.subr.mxu1 %v6117_v50  ;;  %v18665_v48 = vand.u32 4294901760, %v6944_v58  ;;  %v3006_v31 = vld [vmem:[%s19723_s4 + $0x28] sm:$0x7f] }
 0x24e   :  { %6351 = vmatprep.subr.mxu0 %v6115_v39  ;;  %5957 = vmatprep.mubr.f32.mxu1 %v19841_v11  ;;  %v18682_v27 = vand.u32 4294901760, %v18670_v20  ;;  %v7902_v39 = vmul.f32 %v7893_v9, %v18029_v40  ;;  %v7525_v40 = vand.u32 4294901760, %v7524_v0  ;;  %v7891_v53 = vpop.permute.xlu1 %7890  ;;  %v18783_v9 = vrot.slane %v18453_v46, %v18768_v57 }
 0x24f   :  { %6233 = vmatprep.mubr.f32.mxu0 %v19841_v11  ;;  %5959 = vmatmul.mubr.f32.vlgmr.msra.gmra.mxu1 %v18495_v7  ;;  %v6581_v7 = vsub.f32 %v6579_v41, %v6580_v36  ;;  %v7059_v59 = vsub.f32 %v6944_v58, %v18665_v48 }
 0x250   :  { %6236 = vmatmul.mubr.f32.vlgmr.msra.gmra.mxu0 %v18600_v42  ;;  %6124 = vmatpush1.msra.mxu1 %v6123_v22  ;;  %v7020_v32 = vsub.f32 %v18670_v20, %v18682_v27  ;;  %v7912_v15 = vsel %vm3095_vm10, %v7902_v39, 0  ;;  %v7526_v50 = vsub.f32 %v7524_v0, %v7525_v40  ;;  %v18799_v39 = vrot.slane %v18475_v18, %v18768_v57 }
 0x251   :  { %6355 = vmatpush1.msra.mxu0 %v6121_v63  ;;  %6273 = vmatprep.subr.mxu1 %v18594_v45  ;;  %v6582_v33 = vand.u32 4294901760, %v6581_v7  ;;  %v7060_v23 = vand.u32 4294901760, %v7059_v59  ;;  %v7906_v63 = vsel %vm3091_vm8, %v3006_v31, 0  ;;  %v18734_v8 = vand.u32 4294901760, %v7912_v15  ;;  %v8855_v31 = vpop.permute.xlu0 %8854 }
 0x252   :  { %6501 = vmatprep.subr.mxu0 %v18632_v43  ;;  %6157 = vmatprep.mubr.f32.mxu1 %v19841_v11  ;;  %v18727_v51 = vand.u32 4294901760, %v7906_v63  ;;  %v7527_v58 = vand.u32 4294901760, %v7526_v50 }
 0x253   :  { %6388 = vmatprep.mubr.f32.mxu0 %v19841_v11  ;;  %6159 = vmatmul.mubr.f32.vlgmr.msra.gmra.mxu1 %v18587_v29  ;;  %v7061_v28 = vsub.f32 %v7059_v59, %v7060_v23 }
 0x254   :  { %6390 = vmatmul.mubr.f32.vlgmr.msra.gmra.mxu0 %v18587_v29  ;;  %6275 = vmatpush1.msra.mxu1 %v18606_v61 }
 0x255   :  { %6503 = vmatpush1.msra.mxu0 %v18642_v12  ;;  %6427 = vmatprep.subr.mxu1 %v18594_v45  ;;  %v7065_v45 = vsub.f32 %v6942_v24, %v18677_v34  ;;  %v7062_v10 = vand.u32 4294901760, %v7061_v28  ;;  %v7894_v24 = vsel %vm2001_vm3, %v7889_v26, %v7891_v53  ;;  %v18779_v26 = vpop.permute.xlu1 %8858 }
 0x256   :  { %6662 = vmatprep.subr.mxu0 %v6579_v41  ;;  %6308 = vmatprep.mubr.f32.mxu1 %v19841_v11  ;;  %v18740_v41 = vsub.f32 %v7906_v63, %v18727_v51 }
 0x257   :  { %6536 = vmatprep.mubr.f32.mxu0 %v19841_v11  ;;  %6312 = vmatmul.mubr.f32.vlgmr.msra.gmra.mxu1 %v18613_v37 }
 0x258   :  { %6542 = vmatmul.mubr.f32.vlgmr.msra.gmra.mxu0 %v6076_v30  ;;  %6429 = vmatpush1.msra.mxu1 %v18606_v61  ;;  %v7066_v61 = vand.u32 4294901760, %v7065_v45  ;;  %v18753_v7 = vand.u32 4294901760, %v18740_v41 }
 0x259   :  { %6665 = vmatpush1.msra.mxu0 %v6585_v49  ;;  %6583 = vmatprep.subr.mxu1 %v6582_v33  ;;  %v7900_v49 = vsel %vm2001_vm3, %v7891_v53, %v7885_v4  ;;  %v8864_v4 = vsel %vm8862_vm12, %v8857_v60, %v18779_v26 }
 0x25a   :  { %6816 = vmatprep.subr.mxu0 %v6580_v36  ;;  %6462 = vmatprep.mubr.f32.mxu1 %v19841_v11  ;;  %v7067_v21 = vsub.f32 %v7065_v45, %v7066_v61  ;;  %v8889_v63 = vmul.f32 %v18783_v9, %v8864_v4 }
 0x25b   :  { %6698 = vmatprep.mubr.f32.mxu0 %v19841_v11  ;;  %6464 = vmatmul.mubr.f32.vlgmr.msra.gmra.mxu1 %v18587_v29 }
 0x25c   :  { %6701 = vmatmul.mubr.f32.vlgmr.msra.gmra.mxu0 %v18600_v42  ;;  %6589 = vmatpush1.msra.mxu1 %v6588_v54  ;;  %v7021_v42 = vand.u32 4294901760, %v7020_v32  ;;  %v19861_v54 = vld [vmem:[#allocation45_spill] sm:$0xff] }
 0x25d   :  { %6820 = vmatpush1.msra.mxu0 %v6586_v35  ;;  %6738 = vmatprep.subr.mxu1 %v18632_v43  ;;  %v8029_v35 = vsub.f32 %v7912_v15, %v18734_v8  ;;  %v8899_v15 = vsel %vm3095_vm10, %v8889_v63, 0 }
 0x25e   :  { %6981 = vmatprep.subr.mxu0 %v18665_v48  ;;  %6622 = vmatprep.mubr.f32.mxu1 %v19841_v11 }
 0x25f   :  { %6853 = vmatprep.mubr.f32.mxu0 %v19841_v11  ;;  %6624 = vmatmul.mubr.f32.vlgmr.msra.gmra.mxu1 %v18587_v29  ;;  %v8030_v32 = vand.u32 4294901760, %v8029_v35 }
 0x260   :  { %6855 = vmatmul.mubr.f32.vlgmr.msra.gmra.mxu0 %v18587_v29  ;;  %6740 = vmatpush1.msra.mxu1 %v18642_v12 }
 0x261   :  { %6983 = vmatpush1.msra.mxu0 %v18677_v34  ;;  %6892 = vmatprep.subr.mxu1 %v18632_v43  ;;  %v19859_v43 = vld [vmem:[#allocation35_spill] sm:$0xff]  ;;  %v8031_v25 = vsub.f32 %v8029_v35, %v8030_v32 }
 0x262   :  { %7142 = vmatprep.subr.mxu0 %v7059_v59  ;;  %6773 = vmatprep.mubr.f32.mxu1 %v19841_v11  ;;  %v7901_v30 = vmul.f32 %v7892_v62, %v19859_v43 }
 0x263   :  { %7016 = vmatprep.mubr.f32.mxu0 %v19841_v11  ;;  %6777 = vmatmul.mubr.f32.vlgmr.msra.gmra.mxu1 %v18613_v37  ;;  %v7068_v37 = vand.u32 4294901760, %v7067_v21  ;;  %v3007_v21 = vld [vmem:[%s19723_s4 + $0x30] sm:$0x7f] }
 0x264   :  { %7022 = vmatmul.mubr.f32.vlgmr.msra.gmra.mxu0 %v7021_v42  ;;  %6894 = vmatpush1.msra.mxu1 %v18642_v12  ;;  %v7531_v12 = vand.u32 4294901760, %v7530_v52 }
 0x265   :  { %7145 = vmatpush1.msra.mxu0 %v7065_v45  ;;  %7063 = vmatprep.subr.mxu1 %v7062_v10  ;;  %v7903_v45 = vmul.f32 %v7894_v24, %v19861_v54 }
 0x266   :  { %7296 = vmatprep.subr.mxu0 %v7060_v23  ;;  %6927 = vmatprep.mubr.f32.mxu1 %v19841_v11  ;;  %v7532_v36 = vsub.f32 %v7530_v52, %v7531_v12 }
 0x267   :  { %7178 = vmatprep.mubr.f32.mxu0 %v19841_v11  ;;  %6929 = vmatmul.mubr.f32.vlgmr.msra.gmra.mxu1 %v18587_v29  ;;  %v7909_v29 = vsel %vm3095_vm10, %v7901_v30, 0 }
 0x268   :  { %7181 = vmatmul.mubr.f32.vlgmr.msra.gmra.mxu0 %v18670_v20  ;;  %7069 = vmatpush1.msra.mxu1 %v7068_v37  ;;  %v18746_v22 = vand.u32 4294901760, %v7909_v29  ;;  %v7533_v59 = vand.u32 4294901760, %v7532_v36  ;;  %v8863_v37 = vsel %vm8862_vm12, %v8855_v31, %v8857_v60  ;;  %v18830_v36 = vrot.slane %v18513_v56, %v18768_v57 }
 0x269   :  { %7300 = vmatpush1.msra.mxu0 %v7066_v61  ;;  %7218 = vmatprep.subr.mxu1 %v18665_v48  ;;  %v7915_v61 = vsel %vm3095_vm10, %v7903_v45, 0  ;;  %v8888_v30 = vmul.f32 %v18799_v39, %v8863_v37 }
 0x26a   :  { %7446 = vmatprep.subr.mxu0 %v18700_v2  ;;  %7102 = vmatprep.mubr.f32.mxu1 %v19841_v11  ;;  %v8035_v33 = vsub.f32 %v7909_v29, %v18746_v22  ;;  %v18793_v10 = vand.u32 4294901760, %v7915_v61  ;;  %v18820_v29 = vand.u32 4294901760, %v8899_v15 }
 0x26b   :  { %7333 = vmatprep.mubr.f32.mxu0 %v19841_v11  ;;  %7104 = vmatmul.mubr.f32.vlgmr.msra.gmra.mxu1 %v18655_v3 }
 0x26c   :  { %7335 = vmatmul.mubr.f32.vlgmr.msra.gmra.mxu0 %v18655_v3  ;;  %7220 = vmatpush1.msra.mxu1 %v18677_v34  ;;  %v8500_v43 = vsub.f32 %v7915_v61, %v18793_v10 }
 0x26d   :  { %7448 = vmatpush1.msra.mxu0 %v18713_v44  ;;  %7372 = vmatprep.subr.mxu1 %v18665_v48  ;;  %v19860_v48 = vld [vmem:[#allocation42_spill] sm:$0xff] }
 0x26e   :  { %7607 = vmatprep.subr.mxu0 %v7524_v0  ;;  %7253 = vmatprep.mubr.f32.mxu1 %v19841_v11  ;;  %v7904_v38 = vmul.f32 %v7900_v49, %v19860_v48  ;;  %v8861_v49 = vpop.permute.xlu1 %8860  ;;  %v18842_v48 = vrot.slane %v18530_v55, %v18768_v57 }
 0x26f   :  { %7481 = vmatprep.mubr.f32.mxu0 %v19841_v11  ;;  %7257 = vmatmul.mubr.f32.vlgmr.msra.gmra.mxu1 %v18682_v27 }
 0x270   :  { %7487 = vmatmul.mubr.f32.vlgmr.msra.gmra.mxu0 %v7021_v42  ;;  %7374 = vmatpush1.msra.mxu1 %v18677_v34  ;;  %v7990_v34 = vsub.f32 %v18740_v41, %v18753_v7  ;;  %v7918_v23 = vsel %vm3095_vm10, %v7904_v38, 0 }
 0x271   :  { %7610 = vmatpush1.msra.mxu0 %v7530_v52  ;;  %7528 = vmatprep.subr.mxu1 %v7527_v58  ;;  %v18775_v42 = vand.u32 4294901760, %v7918_v23  ;;  %v8893_v52 = vsel %vm3091_vm8, %v3007_v21, 0  ;;  %v8871_v58 = vsel %vm8862_vm12, %v8861_v49, %v8855_v31 }
 0x272   :  { %7761 = vmatprep.subr.mxu0 %v7525_v40  ;;  %7407 = vmatprep.mubr.f32.mxu1 %v19841_v11  ;;  %v7991_v28 = vand.u32 4294901760, %v7990_v34  ;;  %v8891_v54 = vmul.f32 %v18830_v36, %v8871_v58 }
 0x273   :  { %7643 = vmatprep.mubr.f32.mxu0 %v19841_v11  ;;  %7409 = vmatmul.mubr.f32.vlgmr.msra.gmra.mxu1 %v18655_v3  ;;  %v8494_v62 = vsub.f32 %v7918_v23, %v18775_v42 }
 0x274   :  { %7646 = vmatmul.mubr.f32.vlgmr.msra.gmra.mxu0 %v18670_v20  ;;  %7534 = vmatpush1.msra.mxu1 %v7533_v59  ;;  %v8036_v20 = vand.u32 4294901760, %v8035_v33  ;;  %v8865_v59 = vsel %vm8862_vm12, %v18779_v26, %v8861_v49  ;;  %v8905_v57 = vsel %vm3095_vm10, %v8891_v54, 0  ;;  %v18874_v26 = vpop.permute.xlu1 %9845 }
 0x275   :  { %7765 = vmatpush1.msra.mxu0 %v7531_v12  ;;  %7683 = vmatprep.subr.mxu1 %v18700_v2  ;;  %v8495_v40 = vand.u32 4294901760, %v8494_v62  ;;  %v8501_v12 = vand.u32 4294901760, %v8500_v43  ;;  %v8890_v34 = vmul.f32 %v18842_v48, %v8865_v59 }
 0x276   :  { %7951 = vmatprep.subr.mxu0 %v18734_v8  ;;  %7567 = vmatprep.mubr.f32.mxu1 %v19841_v11  ;;  %v8037_v0 = vsub.f32 %v8035_v33, %v8036_v20 }
 0x277   :  { %7798 = vmatprep.mubr.f32.mxu0 %v19841_v11  ;;  %7569 = vmatmul.mubr.f32.vlgmr.msra.gmra.mxu1 %v18655_v3  ;;  %v8496_v50 = vsub.f32 %v8494_v62, %v8495_v40  ;;  %v8502_v24 = vsub.f32 %v8500_v43, %v8501_v12  ;;  %v8902_v61 = vsel %vm3095_vm10, %v8890_v34, 0 }
 0x278   :  { %7800 = vmatmul.mubr.f32.vlgmr.msra.gmra.mxu0 %v18655_v3  ;;  %7685 = vmatpush1.msra.mxu1 %v18713_v44  ;;  %v9848_v49 = vpop.permute.xlu1 %9847 }
 0x279   :  { %7953 = vmatpush1.msra.mxu0 %v18746_v22  ;;  %7837 = vmatprep.subr.mxu1 %v18700_v2  ;;  %v8032_v2 = vand.u32 4294901760, %v8031_v25  ;;  %v8497_v38 = vand.u32 4294901760, %v8496_v50  ;;  %v8503_v60 = vand.u32 4294901760, %v8502_v24 }
 0x27a   :  { %8112 = vmatprep.subr.mxu0 %v8029_v35  ;;  %7718 = vmatprep.mubr.f32.mxu1 %v19841_v11 }
 0x27b   :  { %7986 = vmatprep.mubr.f32.mxu0 %v19841_v11  ;;  %7722 = vmatmul.mubr.f32.vlgmr.msra.gmra.mxu1 %v18682_v27  ;;  %v8038_v27 = vand.u32 4294901760, %v8037_v0  ;;  %v3008_v0 = vld [vmem:[%s19723_s4 + $0x38] sm:$0x7f] }
 0x27c   :  { %7992 = vmatmul.mubr.f32.vlgmr.msra.gmra.mxu0 %v7991_v28  ;;  %7839 = vmatpush1.msra.mxu1 %v18713_v44  ;;  %v18813_v44 = vand.u32 4294901760, %v8893_v52 }
 0x27d   :  { %8115 = vmatpush1.msra.mxu0 %v8035_v33  ;;  %8033 = vmatprep.subr.mxu1 %v8032_v2  ;;  %v9016_v33 = vsub.f32 %v8899_v15, %v18820_v29  ;;  %v18886_v2 = vand.u32 4294901760, %v8902_v61 }
 0x27e   :  { %8266 = vmatprep.subr.mxu0 %v8030_v32  ;;  %7872 = vmatprep.mubr.f32.mxu1 %v19841_v11  ;;  %v18826_v53 = vsub.f32 %v8893_v52, %v18813_v44  ;;  %v9844_v32 = vpop.permute.xlu0 %9843 }
 0x27f   :  { %8148 = vmatprep.mubr.f32.mxu0 %v19841_v11  ;;  %7874 = vmatmul.mubr.f32.vlgmr.msra.gmra.mxu1 %v18655_v3  ;;  %v8896_v3 = vsel %vm3095_vm10, %v8888_v30, 0  ;;  %v9017_v23 = vand.u32 4294901760, %v9016_v33  ;;  %v9851_v31 = vsel %vm9849_vm13, %v9844_v32, %v18874_v26 }
 0x280   :  { %8151 = vmatmul.mubr.f32.vlgmr.msra.gmra.mxu0 %v18740_v41  ;;  %8039 = vmatpush1.msra.mxu1 %v8038_v27  ;;  %v18836_v35 = vand.u32 4294901760, %v8896_v3  ;;  %v9487_v27 = vsub.f32 %v8902_v61, %v18886_v2 }
 0x281   :  { %8270 = vmatpush1.msra.mxu0 %v8036_v20  ;;  %8188 = vmatprep.subr.mxu1 %v18734_v8  ;;  %v18863_v20 = vsub.s32 7, %v17803_v5  ;;  %v9018_v25 = vsub.f32 %v9016_v33, %v9017_v23 }
 0x282   :  { %8416 = vmatprep.subr.mxu0 %v18775_v42  ;;  %8072 = vmatprep.mubr.f32.mxu1 %v19841_v11  ;;  %v9022_v45 = vsub.f32 %v8896_v3, %v18836_v35  ;;  %v9842_v21 = vpop.permute.xlu0 %9841  ;;  %v9488_v15 = vand.u32 4294901760, %v9487_v27 }
 0x283   :  { %8303 = vmatprep.mubr.f32.mxu0 %v19841_v11  ;;  %8074 = vmatmul.mubr.f32.vlgmr.msra.gmra.mxu1 %v18727_v51  ;;  %v9866_v4 = vrot.slane %v18453_v46, %v18863_v20  ;;  %v9019_v63 = vand.u32 4294901760, %v9018_v25  ;;  %v9850_v52 = vsel %vm9849_vm13, %v9842_v21, %v9844_v32  ;;  %v9874_v58 = vrot.slane %v18513_v56, %v18863_v20  ;;  %v18954_v25 = vpop.permute.xlu1 %10832 }
 0x284   :  { %8305 = vmatmul.mubr.f32.vlgmr.msra.gmra.mxu0 %v18727_v51  ;;  %8190 = vmatpush1.msra.mxu1 %v18746_v22  ;;  %v9858_v24 = vsel %vm9849_vm13, %v9848_v49, %v9842_v21  ;;  %v9870_v59 = vrot.slane %v18530_v55, %v18863_v20  ;;  %v3009_v21 = vld [vmem:[%s19723_s4 + $0x40] sm:$0x7f] }
 0x285   :  { %8418 = vmatpush1.msra.mxu0 %v18793_v10  ;;  %8342 = vmatprep.subr.mxu1 %v18734_v8  ;;  %v18847_v8 = vand.u32 4294901760, %v18826_v53  ;;  %v9876_v37 = vmul.f32 %v9866_v4, %v9851_v31 }
 0x286   :  { %8577 = vmatprep.subr.mxu0 %v8494_v62  ;;  %8223 = vmatprep.mubr.f32.mxu1 %v19841_v11  ;;  %v9862_v62 = vrot.slane %v18475_v18, %v18863_v20 }
 0x287   :  { %8451 = vmatprep.mubr.f32.mxu0 %v19841_v11  ;;  %8227 = vmatmul.mubr.f32.vlgmr.msra.gmra.mxu1 %v18753_v7 }
 0x288   :  { %8457 = vmatmul.mubr.f32.vlgmr.msra.gmra.mxu0 %v7991_v28  ;;  %8344 = vmatpush1.msra.mxu1 %v18746_v22  ;;  %v8977_v22 = vsub.f32 %v18826_v53, %v18847_v8  ;;  %v18870_v28 = vand.u32 4294901760, %v8905_v57 }
 0x289   :  { %8580 = vmatpush1.msra.mxu0 %v8500_v43  ;;  %8498 = vmatprep.subr.mxu1 %v8497_v38  ;;  %v9880_v43 = vsel %vm3091_vm8, %v3008_v0, 0 }
 0x28a   :  { %8731 = vmatprep.subr.mxu0 %v8495_v40  ;;  %8377 = vmatprep.mubr.f32.mxu1 %v19841_v11  ;;  %v8978_v5 = vand.u32 4294901760, %v8977_v22  ;;  %v18902_v40 = vand.u32 4294901760, %v9880_v43  ;;  %v10831_v22 = vpop.permute.xlu0 %10830 }
 0x28b   :  { %8613 = vmatprep.mubr.f32.mxu0 %v19841_v11  ;;  %8379 = vmatmul.mubr.f32.vlgmr.msra.gmra.mxu1 %v18727_v51  ;;  %v10838_v4 = vsel %vm10836_vm14, %v10831_v22, %v18954_v25 }
 0x28c   :  { %8616 = vmatmul.mubr.f32.vlgmr.msra.gmra.mxu0 %v18740_v41  ;;  %8504 = vmatpush1.msra.mxu1 %v8503_v60  ;;  %v9023_v41 = vand.u32 4294901760, %v9022_v45  ;;  %v18915_v50 = vsub.f32 %v9880_v43, %v18902_v40  ;;  %v9878_v60 = vmul.f32 %v9874_v58, %v9858_v24 }
 0x28d   :  { %8735 = vmatpush1.msra.mxu0 %v8501_v12  ;;  %8653 = vmatprep.subr.mxu1 %v18775_v42 }
 0x28e   :  { %8938 = vmatprep.subr.mxu0 %v18820_v29  ;;  %8537 = vmatprep.mubr.f32.mxu1 %v19841_v11  ;;  %v9024_v46 = vsub.f32 %v9022_v45, %v9023_v41  ;;  %v10829_v31 = vpop.permute.xlu0 %10828 }
 0x28f   :  { %8768 = vmatprep.mubr.f32.mxu0 %v19841_v11  ;;  %8539 = vmatmul.mubr.f32.vlgmr.msra.gmra.mxu1 %v18727_v51 }
 0x290   :  { %8770 = vmatmul.mubr.f32.vlgmr.msra.gmra.mxu0 %v18727_v51  ;;  %8655 = vmatpush1.msra.mxu1 %v18793_v10  ;;  %v9025_v18 = vand.u32 4294901760, %v9024_v46 }
 0x291   :  { %8940 = vmatpush1.msra.mxu0 %v18836_v35  ;;  %8807 = vmatprep.subr.mxu1 %v18775_v42  ;;  %v9481_v42 = vsub.f32 %v8905_v57, %v18870_v28  ;;  %v9892_v57 = vsel %vm3095_vm10, %v9878_v60, 0 }
 0x292   :  { %9099 = vmatprep.subr.mxu0 %v9016_v33  ;;  %8688 = vmatprep.mubr.f32.mxu1 %v19841_v11  ;;  %v9489_v33 = vsub.f32 %v9487_v27, %v9488_v15 }
 0x293   :  { %8973 = vmatprep.mubr.f32.mxu0 %v19841_v11  ;;  %8692 = vmatmul.mubr.f32.vlgmr.msra.gmra.mxu1 %v18753_v7  ;;  %v9875_v7 = vmul.f32 %v9862_v62, %v9850_v52  ;;  %v9482_v30 = vand.u32 4294901760, %v9481_v42  ;;  %v10867_v52 = vsel %vm3091_vm8, %v3009_v21, 0 }
 0x294   :  { %8979 = vmatmul.mubr.f32.vlgmr.msra.gmra.mxu0 %v8978_v5  ;;  %8809 = vmatpush1.msra.mxu1 %v18793_v10  ;;  %v9886_v10 = vsel %vm3095_vm10, %v9876_v37, 0  ;;  %v9490_v34 = vand.u32 4294901760, %v9489_v33  ;;  %v10837_v37 = vsel %vm10836_vm14, %v10829_v31, %v10831_v22 }
 0x295   :  { %9102 = vmatpush1.msra.mxu0 %v9022_v45  ;;  %9020 = vmatprep.subr.mxu1 %v9019_v63  ;;  %v18909_v12 = vand.u32 4294901760, %v9886_v10  ;;  %v9483_v3 = vsub.f32 %v9481_v42, %v9482_v30  ;;  %v18932_v45 = vand.u32 4294901760, %v18915_v50 }
 0x296   :  { %9253 = vmatprep.subr.mxu0 %v9017_v23  ;;  %8842 = vmatprep.mubr.f32.mxu1 %v19841_v11 }
 0x297   :  { %9135 = vmatprep.mubr.f32.mxu0 %v19841_v11  ;;  %8844 = vmatmul.mubr.f32.vlgmr.msra.gmra.mxu1 %v18727_v51  ;;  %v9883_v51 = vsel %vm3095_vm10, %v9875_v7, 0  ;;  %v9484_v56 = vand.u32 4294901760, %v9483_v3  ;;  %v10003_v54 = vsub.f32 %v9886_v10, %v18909_v12  ;;  %v9964_v23 = vsub.f32 %v18915_v50, %v18932_v45  ;;  %v10835_v3 = vpop.permute.xlu1 %10834 }
 0x298   :  { %9138 = vmatmul.mubr.f32.vlgmr.msra.gmra.mxu0 %v18826_v53  ;;  %9026 = vmatpush1.msra.mxu1 %v9025_v18  ;;  %v18923_v38 = vand.u32 4294901760, %v9883_v51  ;;  %v18984_v7 = vand.u32 4294901760, %v10867_v52  ;;  %v10845_v58 = vsel %vm10836_vm14, %v10835_v3, %v10829_v31 }
 0x299   :  { %9257 = vmatpush1.msra.mxu0 %v9023_v41  ;;  %9175 = vmatprep.subr.mxu1 %v18820_v29  ;;  %v18950_v41 = vand.u32 4294901760, %v9892_v57  ;;  %v9965_v61 = vand.u32 4294901760, %v9964_v23 }
 0x29a   :  { %9403 = vmatprep.subr.mxu0 %v18870_v28  ;;  %9059 = vmatprep.mubr.f32.mxu1 %v19841_v11  ;;  %v10009_v55 = vsub.f32 %v9883_v51, %v18923_v38  ;;  %v18997_v51 = vsub.f32 %v10867_v52, %v18984_v7 }
 0x29b   :  { %9290 = vmatprep.mubr.f32.mxu0 %v19841_v11  ;;  %9061 = vmatmul.mubr.f32.vlgmr.msra.gmra.mxu1 %v18813_v44  ;;  %v10468_v63 = vsub.f32 %v9892_v57, %v18950_v41 }
 0x29c   :  { %9292 = vmatmul.mubr.f32.vlgmr.msra.gmra.mxu0 %v18813_v44  ;;  %9177 = vmatpush1.msra.mxu1 %v18836_v35  ;;  %v10010_v20 = vand.u32 4294901760, %v10009_v55 }
 0x29d   :  { %9405 = vmatpush1.msra.mxu0 %v18886_v2  ;;  %9329 = vmatprep.subr.mxu1 %v18820_v29  ;;  %v9852_v29 = vsel %vm9849_vm13, %v18874_v26, %v9848_v49  ;;  %v17686_v26 = vld [vmem:[%s19720_s1 + $0x28] ss:$0 sm:$0xff]  ;;  %v10469_v18 = vand.u32 4294901760, %v10468_v63  ;;  %v17688_v49 = vld [vmem:[%s19720_s1 + $0x38] ss:$0 sm:$0xff] }
 0x29e   :  { %9564 = vmatprep.subr.mxu0 %v9481_v42  ;;  %9210 = vmatprep.mubr.f32.mxu1 %v19841_v11  ;;  %v9877_v32 = vmul.f32 %v9870_v59, %v9852_v29  ;;  %v10011_v46 = vsub.f32 %v10009_v55, %v10010_v20  ;;  %v10863_v42 = vmul.f32 %v17686_v26, %v10838_v4 }
 0x29f   :  { %9438 = vmatprep.mubr.f32.mxu0 %v19841_v11  ;;  %9214 = vmatmul.mubr.f32.vlgmr.msra.gmra.mxu1 %v18847_v8  ;;  %v10839_v29 = vsel %vm10836_vm14, %v18954_v25, %v10835_v3  ;;  %v10865_v60 = vmul.f32 %v17688_v49, %v10845_v58 }
 0x2a0   :  { %9444 = vmatmul.mubr.f32.vlgmr.msra.gmra.mxu0 %v8978_v5  ;;  %9331 = vmatpush1.msra.mxu1 %v18836_v35  ;;  %v10004_v35 = vand.u32 4294901760, %v10003_v54  ;;  %v10012_v43 = vand.u32 4294901760, %v10011_v46 }
 0x2a1   :  { %9567 = vmatpush1.msra.mxu0 %v9487_v27  ;;  %9485 = vmatprep.subr.mxu1 %v9484_v56 }
 0x2a2   :  { %9718 = vmatprep.subr.mxu0 %v9482_v30  ;;  %9364 = vmatprep.mubr.f32.mxu1 %v19841_v11  ;;  %v10005_v5 = vsub.f32 %v10003_v54, %v10004_v35 }
 0x2a3   :  { %9600 = vmatprep.mubr.f32.mxu0 %v19841_v11  ;;  %9366 = vmatmul.mubr.f32.vlgmr.msra.gmra.mxu1 %v18813_v44 }
 0x2a4   :  { %9603 = vmatmul.mubr.f32.vlgmr.msra.gmra.mxu0 %v18826_v53  ;;  %9491 = vmatpush1.msra.mxu1 %v9490_v34  ;;  %v9889_v53 = vsel %vm3095_vm10, %v9877_v32, 0  ;;  %v10006_v62 = vand.u32 4294901760, %v10005_v5 }
 0x2a5   :  { %9722 = vmatpush1.msra.mxu0 %v9488_v15  ;;  %9640 = vmatprep.subr.mxu1 %v18870_v28  ;;  %v18967_v0 = vand.u32 4294901760, %v9889_v53  ;;  %v10470_v15 = vsub.f32 %v10468_v63, %v10469_v18 }
 0x2a6   :  { %9925 = vmatprep.subr.mxu0 %v18909_v12  ;;  %9524 = vmatprep.mubr.f32.mxu1 %v19841_v11 }
 0x2a7   :  { %9755 = vmatprep.mubr.f32.mxu0 %v19841_v11  ;;  %9526 = vmatmul.mubr.f32.vlgmr.msra.gmra.mxu1 %v18813_v44  ;;  %v10471_v59 = vand.u32 4294901760, %v10470_v15 }
 0x2a8   :  { %9757 = vmatmul.mubr.f32.vlgmr.msra.gmra.mxu0 %v18813_v44  ;;  %9642 = vmatpush1.msra.mxu1 %v18886_v2 }
 0x2a9   :  { %9927 = vmatpush1.msra.mxu0 %v18923_v38  ;;  %9794 = vmatprep.subr.mxu1 %v18870_v28  ;;  %v17685_v28 = vld [vmem:[%s19720_s1 + $0x20] ss:$0 sm:$0xff] }
 0x2aa   :  { %10086 = vmatprep.subr.mxu0 %v10003_v54  ;;  %9675 = vmatprep.mubr.f32.mxu1 %v19841_v11  ;;  %v10862_v27 = vmul.f32 %v17685_v28, %v10837_v37  ;;  %v19013_v54 = vand.u32 4294901760, %v18997_v51 }
 0x2ab   :  { %9960 = vmatprep.mubr.f32.mxu0 %v19841_v11  ;;  %9679 = vmatmul.mubr.f32.vlgmr.msra.gmra.mxu1 %v18847_v8  ;;  %v10474_v8 = vsub.f32 %v9889_v53, %v18967_v0 }
 0x2ac   :  { %9966 = vmatmul.mubr.f32.vlgmr.msra.gmra.mxu0 %v9965_v61  ;;  %9796 = vmatpush1.msra.mxu1 %v18886_v2  ;;  %v10873_v2 = vsel %vm3095_vm10, %v10863_v42, 0  ;;  %v10951_v22 = vsub.f32 %v18997_v51, %v19013_v54 }
 0x2ad   :  { %10089 = vmatpush1.msra.mxu0 %v10009_v55  ;;  %10007 = vmatprep.subr.mxu1 %v10006_v62  ;;  %v10475_v30 = vand.u32 4294901760, %v10474_v8  ;;  %v18991_v10 = vand.u32 4294901760, %v10873_v2 }
 0x2ae   :  { %10240 = vmatprep.subr.mxu0 %v10004_v35  ;;  %9829 = vmatprep.mubr.f32.mxu1 %v19841_v11 }
 0x2af   :  { %10122 = vmatprep.mubr.f32.mxu0 %v19841_v11  ;;  %9831 = vmatmul.mubr.f32.vlgmr.msra.gmra.mxu1 %v18813_v44  ;;  %v10870_v44 = vsel %vm3095_vm10, %v10862_v27, 0  ;;  %v10476_v33 = vsub.f32 %v10474_v8, %v10475_v30  ;;  %v10990_v56 = vsub.f32 %v10873_v2, %v18991_v10 }
 0x2b0   :  { %10125 = vmatmul.mubr.f32.vlgmr.msra.gmra.mxu0 %v18915_v50  ;;  %10013 = vmatpush1.msra.mxu1 %v10012_v43  ;;  %v19006_v24 = vand.u32 4294901760, %v10870_v44 }
 0x2b1   :  { %10244 = vmatpush1.msra.mxu0 %v10010_v20  ;;  %10162 = vmatprep.subr.mxu1 %v18909_v12  ;;  %v10477_v34 = vand.u32 4294901760, %v10476_v33  ;;  %v10991_v23 = vand.u32 4294901760, %v10990_v56  ;;  %v10952_v20 = vand.u32 4294901760, %v10951_v22 }
 0x2b2   :  { %10390 = vmatprep.subr.mxu0 %v18950_v41  ;;  %10046 = vmatprep.mubr.f32.mxu1 %v19841_v11  ;;  %v10996_v55 = vsub.f32 %v10870_v44, %v19006_v24 }
 0x2b3   :  { %10277 = vmatprep.mubr.f32.mxu0 %v19841_v11  ;;  %10048 = vmatmul.mubr.f32.vlgmr.msra.gmra.mxu1 %v18902_v40  ;;  %v10992_v53 = vsub.f32 %v10990_v56, %v10991_v23 }
 0x2b4   :  { %10279 = vmatmul.mubr.f32.vlgmr.msra.gmra.mxu0 %v18902_v40  ;;  %10164 = vmatpush1.msra.mxu1 %v18923_v38  ;;  %v10997_v35 = vand.u32 4294901760, %v10996_v55 }
 0x2b5   :  { %10392 = vmatpush1.msra.mxu0 %v18967_v0  ;;  %10316 = vmatprep.subr.mxu1 %v18909_v12  ;;  %v17687_v12 = vld [vmem:[%s19720_s1 + $0x30] ss:$0 sm:$0xff]  ;;  %v10993_v4 = vand.u32 4294901760, %v10992_v53 }
 0x2b6   :  { %10551 = vmatprep.subr.mxu0 %v10468_v63  ;;  %10197 = vmatprep.mubr.f32.mxu1 %v19841_v11  ;;  %v10864_v32 = vmul.f32 %v17687_v12, %v10839_v29  ;;  %v10998_v26 = vsub.f32 %v10996_v55, %v10997_v35  ;;  %v11834_v12 = vpop.permute.xlu0 %11833 }
 0x2b7   :  { %10425 = vmatprep.mubr.f32.mxu0 %v19841_v11  ;;  %10201 = vmatmul.mubr.f32.vlgmr.msra.gmra.mxu1 %v18932_v45 }
 0x2b8   :  { %10431 = vmatmul.mubr.f32.vlgmr.msra.gmra.mxu0 %v9965_v61  ;;  %10318 = vmatpush1.msra.mxu1 %v18923_v38  ;;  %v10879_v38 = vsel %vm3095_vm10, %v10865_v60, 0  ;;  %v10876_v57 = vsel %vm3095_vm10, %v10864_v32, 0  ;;  %v11825_v61 = vld [vmem:[%s19725_s6 + $0x8] sm:$0x7f] }
 0x2b9   :  { %10554 = vmatpush1.msra.mxu0 %v10474_v8  ;;  %10472 = vmatprep.subr.mxu1 %v10471_v59  ;;  %v19044_v5 = vand.u32 4294901760, %v10876_v57  ;;  %v11852_v21 = vsel %vm105_vm0, %v11825_v61, 0 }
 0x2ba   :  { %10705 = vmatprep.subr.mxu0 %v10469_v18  ;;  %10351 = vmatprep.mubr.f32.mxu1 %v19841_v11 }
 0x2bb   :  { %10587 = vmatprep.mubr.f32.mxu0 %v19841_v11  ;;  %10353 = vmatmul.mubr.f32.vlgmr.msra.gmra.mxu1 %v18902_v40  ;;  %v11461_v46 = vsub.f32 %v10876_v57, %v19044_v5 }
 0x2bc   :  { %10590 = vmatmul.mubr.f32.vlgmr.msra.gmra.mxu0 %v18915_v50  ;;  %10478 = vmatpush1.msra.mxu1 %v10477_v34  ;;  %v19034_v50 = vand.u32 4294901760, %v10879_v38 }
 0x2bd   :  { %10709 = vmatpush1.msra.mxu0 %v10475_v30  ;;  %10627 = vmatprep.subr.mxu1 %v18950_v41  ;;  %v11462_v37 = vand.u32 4294901760, %v11461_v46 }
 0x2be   :  { %10912 = vmatprep.subr.mxu0 %v18991_v10  ;;  %10511 = vmatprep.mubr.f32.mxu1 %v19841_v11  ;;  %v11455_v31 = vsub.f32 %v10879_v38, %v19034_v50  ;;  %v19084_v38 = vpop.permute.xlu1 %11835 }
 0x2bf   :  { %10742 = vmatprep.mubr.f32.mxu0 %v19841_v11  ;;  %10513 = vmatmul.mubr.f32.vlgmr.msra.gmra.mxu1 %v18902_v40  ;;  %v11463_v44 = vsub.f32 %v11461_v46, %v11462_v37 }
 0x2c0   :  { %10744 = vmatmul.mubr.f32.vlgmr.msra.gmra.mxu0 %v18902_v40  ;;  %10629 = vmatpush1.msra.mxu1 %v18967_v0  ;;  %v11456_v63 = vand.u32 4294901760, %v11455_v31 }
 0x2c1   :  { %10914 = vmatpush1.msra.mxu0 %v19006_v24  ;;  %10781 = vmatprep.subr.mxu1 %v18950_v41 }
 0x2c2   :  { %11073 = vmatprep.subr.mxu0 %v10990_v56  ;;  %10662 = vmatprep.mubr.f32.mxu1 %v19841_v11 }
 0x2c3   :  { %10947 = vmatprep.mubr.f32.mxu0 %v19841_v11  ;;  %v3181_v25 = vpop.f32.mrf.mxu0  ;;  %10666 = vmatmul.mubr.f32.vlgmr.msra.gmra.mxu1 %v18932_v45  ;;  %v10999_v45 = vand.u32 4294901760, %v10998_v26  ;;  %v19094_v26 = vpop.permute.xlu0 %11830 }
 0x2c4   :  { %10953 = vmatmul.mubr.f32.vlgmr.msra.gmra.mxu0 %v10952_v20  ;;  %10783 = vmatpush1.msra.mxu1 %v18967_v0  ;;  %v19057_v0 = vand.u32 4294901760, %v11852_v21 }
 0x2c5   :  { %11076 = vmatpush1.msra.mxu0 %v10996_v55  ;;  %v3183_v41 = vpop.f32.mrf.mxu0  ;;  %10994 = vmatprep.subr.mxu1 %v10993_v4  ;;  %v11464_v55 = vand.u32 4294901760, %v11463_v44  ;;  %v19866_v44 = vld [vmem:[#allocation37_spill] sm:$0xff] }
 0x2c6   :  { %11227 = vmatprep.subr.mxu0 %v10991_v23  ;;  %10816 = vmatprep.mubr.f32.mxu1 %v19841_v11  ;;  %v19066_v8 = vsub.f32 %v11852_v21, %v19057_v0  ;;  %v19864_v21 = vld [vmem:[#allocation29_spill] sm:$0xff] }
 0x2c7   :  { %11109 = vmatprep.mubr.f32.mxu0 %v19841_v11  ;;  %v3340_v62 = vpop.f32.mrf.mxu0  ;;  %10818 = vmatmul.mubr.f32.vlgmr.msra.gmra.mxu1 %v18902_v40  ;;  %v11457_v40 = vsub.f32 %v11455_v31, %v11456_v63 }
 0x2c8   :  { %11112 = vmatmul.mubr.f32.vlgmr.msra.gmra.mxu0 %v18997_v51  ;;  %11000 = vmatpush1.msra.mxu1 %v10999_v45  ;;  %v19075_v58 = vand.u32 4294901760, %v19066_v8  ;;  %v11824_v45 = vld [vmem:[%s19725_s6] sm:$0x7f] }
 0x2c9   :  { %11231 = vmatpush1.msra.mxu0 %v10997_v35  ;;  %v3342_v42 = vpop.f32.mrf.mxu0  ;;  %11149 = vmatprep.subr.mxu1 %v18991_v10  ;;  %v11458_v49 = vand.u32 4294901760, %v11457_v40  ;;  %v19862_v35 = vld [vmem:[#allocation28_spill] sm:$0xff] }
 0x2ca   :  { %11377 = vmatprep.subr.mxu0 %v19034_v50  ;;  %11033 = vmatprep.mubr.f32.mxu1 %v19841_v11 }
 0x2cb   :  { %11264 = vmatprep.mubr.f32.mxu0 %v19841_v11  ;;  %v3494_v28 = vpop.f32.mrf.mxu0  ;;  %v3263_v52 = vpop.f32.mrf.mxu1  ;;  %11035 = vmatmul.mubr.f32.vlgmr.msra.gmra.mxu1 %v18984_v7 }
 0x2cc   :  { %11266 = vmatmul.mubr.f32.vlgmr.msra.gmra.mxu0 %v18984_v7  ;;  %v3264_v43 = vadd.f32 %v3263_v52, %v3181_v25  ;;  %11151 = vmatpush1.msra.mxu1 %v19006_v24 }
 0x2cd   :  { %11379 = vmatpush1.msra.mxu0 %v19044_v5  ;;  %v3496_v27 = vpop.f32.mrf.mxu0  ;;  %11303 = vmatprep.subr.mxu1 %v18991_v10  ;;  %v3265_v18 = vpop.f32.mrf.mxu1 }
 0x2ce   :  { %11538 = vmatprep.subr.mxu0 %v11455_v31  ;;  %v3266_v2 = vadd.f32 %v3265_v18, %v3183_v41  ;;  %11184 = vmatprep.mubr.f32.mxu1 %v19841_v11  ;;  %v3341_v30 = vadd.f32 %v3340_v62, %v3264_v43  ;;  %v19863_v31 = vld [vmem:[#allocation26_spill] sm:$0xff]  ;;  %v11839_v41 = vsel %vm105_vm0, %v11834_v12, %v19084_v38 }
 0x2cf   :  { %11412 = vmatprep.mubr.f32.mxu0 %v19841_v11  ;;  %v3416_v15 = vpop.f32.mrf.mxu1  ;;  %11188 = vmatmul.mubr.f32.vlgmr.msra.gmra.mxu1 %v19013_v54 }
 0x2d0   :  { %v3646_v3 = vpop.f32.mrf.mxu0  ;;  %11418 = vmatmul.mubr.f32.vlgmr.msra.gmra.mxu0 %v10952_v20  ;;  %v3417_v33 = vadd.f32 %v3416_v15, %v3341_v30  ;;  %11305 = vmatpush1.msra.mxu1 %v19006_v24  ;;  %v3343_v10 = vadd.f32 %v3342_v42, %v3266_v2  ;;  %v11924_v24 = vsub.f32 %v19066_v8, %v19075_v58  ;;  %v12785_v2 = vsel %vm105_vm0, %v11824_v45, 0  ;;  %v19867_v15 = vld [vmem:[#allocation34_spill] sm:$0xff] }
 0x2d1   :  { %11541 = vmatpush1.msra.mxu0 %v11461_v46  ;;  %11459 = vmatprep.subr.mxu1 %v11458_v49  ;;  %v3418_v59 = vpop.f32.mrf.mxu1 }
 0x2d2   :  { %11692 = vmatprep.subr.mxu0 %v11456_v63  ;;  %v3648_v56 = vpop.f32.mrf.mxu0  ;;  %v3419_v29 = vadd.f32 %v3418_v59, %v3343_v10  ;;  %11338 = vmatprep.mubr.f32.mxu1 %v19841_v11  ;;  %v3495_v60 = vadd.f32 %v3494_v28, %v3417_v33  ;;  %v19092_v25 = vand.u32 4294901760, %v11924_v24  ;;  %v11846_v63 = vsel %vm105_vm0, %v19094_v26, %v11834_v12  ;;  %v19869_v12 = vld [vmem:[#allocation31_spill] sm:$0xff] }
 0x2d3   :  { %11574 = vmatprep.mubr.f32.mxu0 %v19841_v11  ;;  %v3568_v34 = vpop.f32.mrf.mxu1  ;;  %11340 = vmatmul.mubr.f32.vlgmr.msra.gmra.mxu1 %v18984_v7  ;;  %v11847_v30 = vmul.f32 %v11846_v63, %v18479_v47  ;;  %v19122_v47 = vand.u32 4294901760, %v12785_v2 }
 0x2d4   :  { %v3805_v32 = vpop.f32.mrf.mxu0  ;;  %11577 = vmatmul.mubr.f32.vlgmr.msra.gmra.mxu0 %v18997_v51  ;;  %v3569_v22 = vadd.f32 %v3568_v34, %v3495_v60  ;;  %11465 = vmatpush1.msra.mxu1 %v11464_v55  ;;  %v3497_v23 = vadd.f32 %v3496_v27, %v3419_v29  ;;  %v19865_v27 = vld [vmem:[#allocation27_spill] sm:$0xff]  ;;  %v11838_v55 = vpop.permute.xlu1 %11837  ;;  %v19870_v34 = vld [vmem:[#allocation30_spill] sm:$0xff] }
 0x2d5   :  { %11696 = vmatpush1.msra.mxu0 %v11462_v37  ;;  %11614 = vmatprep.subr.mxu1 %v19034_v50  ;;  %v3570_v57 = vpop.f32.mrf.mxu1 }
 0x2d6   :  { %11885 = vmatprep.subr.mxu0 %v19862_v35  ;;  %v3807_v20 = vpop.f32.mrf.mxu0  ;;  %v3571_v53 = vadd.f32 %v3570_v57, %v3497_v23  ;;  %11498 = vmatprep.mubr.f32.mxu1 %v19841_v11 }
 0x2d7   :  { %11729 = vmatprep.mubr.f32.mxu0 %v19841_v11  ;;  %v3728_v51 = vpop.f32.mrf.mxu1  ;;  %11500 = vmatmul.mubr.f32.vlgmr.msra.gmra.mxu1 %v18984_v7 }
 0x2d8   :  { %v3959_v61 = vpop.f32.mrf.mxu0  ;;  %11731 = vmatmul.mubr.f32.vlgmr.msra.gmra.mxu0 %v18984_v7  ;;  %v3729_v4 = vadd.f32 %v3728_v51, %v3646_v3  ;;  %11616 = vmatpush1.msra.mxu1 %v19044_v5 }
 0x2d9   :  { %11887 = vmatpush1.msra.mxu0 %v19863_v31  ;;  %11768 = vmatprep.subr.mxu1 %v19034_v50  ;;  %v3730_v46 = vpop.f32.mrf.mxu1  ;;  %v11848_v50 = vmul.f32 %v11839_v41, %v18457_v19 }
 0x2da   :  { %12046 = vmatprep.subr.mxu0 %v19864_v21  ;;  %v3961_v62 = vpop.f32.mrf.mxu0  ;;  %v3731_v42 = vadd.f32 %v3730_v46, %v3648_v56  ;;  %11649 = vmatprep.mubr.f32.mxu1 %v19841_v11  ;;  %v3806_v28 = vadd.f32 %v3805_v32, %v3729_v4  ;;  %v19868_v56 = vld [vmem:[#allocation39_spill] sm:$0xff]  ;;  %v11841_v4 = vsel %vm105_vm0, %v11838_v55, %v19094_v26  ;;  %v19872_v21 = vld [vmem:[#allocation33_spill] sm:$0xff] }
 0x2db   :  { %11920 = vmatprep.mubr.f32.mxu0 %v19841_v11  ;;  %v3881_v37 = vpop.f32.mrf.mxu1  ;;  %11653 = vmatmul.mubr.f32.vlgmr.msra.gmra.mxu1 %v19013_v54  ;;  %v12791_v60 = vsel %vm109_vm1, %v11848_v50, 0 }
 0x2dc   :  { %v4126_v52 = vpop.f32.mrf.mxu0  ;;  %11926 = vmatmul.mubr.f32.vlgmr.msra.gmra.mxu0 %v19092_v25  ;;  %v3882_v40 = vadd.f32 %v3881_v37, %v3806_v28  ;;  %11770 = vmatpush1.msra.mxu1 %v19044_v5  ;;  %v3808_v18 = vadd.f32 %v3807_v20, %v3731_v42  ;;  %v19132_v23 = vand.u32 4294901760, %v12791_v60  ;;  %v11840_v42 = vsel %vm105_vm0, %v19084_v38, %v11838_v55 }
 0x2dd   :  { %v4127_v43 = vadd.f32 %v4126_v52, %v3569_v22  ;;  %12049 = vmatpush1.msra.mxu0 %v19865_v27  ;;  %11967 = vmatprep.subr.mxu1 %v19866_v44  ;;  %v3883_v54 = vpop.f32.mrf.mxu1  ;;  %v11850_v28 = vmul.f32 %v11841_v4, %v18517_v6  ;;  %v19874_v27 = vld [vmem:[#allocation46_spill] sm:$0xff] }
 0x2de   :  { %12200 = vmatprep.subr.mxu0 %v19867_v15  ;;  %v4128_v3 = vpop.f32.mrf.mxu0  ;;  %v3884_v49 = vadd.f32 %v3883_v54, %v3808_v18  ;;  %11803 = vmatprep.mubr.f32.mxu1 %v19841_v11  ;;  %v3960_v19 = vadd.f32 %v3959_v61, %v3882_v40  ;;  %v19871_v61 = vld [vmem:[#allocation32_spill] sm:$0xff]  ;;  %v19875_v18 = vld [vmem:[#allocation38_spill] sm:$0xff] }
 0x2df   :  { %v4129_v33 = vadd.f32 %v4128_v3, %v3571_v53  ;;  %12082 = vmatprep.mubr.f32.mxu0 %v19841_v11  ;;  %v4033_v5 = vpop.f32.mrf.mxu1  ;;  %11805 = vmatmul.mubr.f32.vlgmr.msra.gmra.mxu1 %v18984_v7  ;;  %v12788_v7 = vsel %vm109_vm1, %v11847_v30, 0  ;;  %v19137_v53 = vsub.f32 %v12785_v2, %v19122_v47  ;;  %v11826_v4 = vld [vmem:[%s19725_s6 + $0x10] sm:$0x7f] }
 0x2e0   :  { %v4285_v10 = vpop.f32.mrf.mxu0  ;;  %12085 = vmatmul.mubr.f32.vlgmr.msra.gmra.mxu0 %v19066_v8  ;;  %v4034_v59 = vadd.f32 %v4033_v5, %v3960_v19  ;;  %11973 = vmatpush1.msra.mxu1 %v19868_v56  ;;  %v3962_v29 = vadd.f32 %v3961_v62, %v3884_v49  ;;  %v19143_v41 = vand.u32 4294901760, %v12788_v7  ;;  %v12797_v19 = vsel %vm109_vm1, %v11850_v28, 0 }
 0x2e1   :  { %12204 = vmatpush1.msra.mxu0 %v19869_v12  ;;  %12122 = vmatprep.subr.mxu1 %v19862_v35  ;;  %v4035_v32 = vpop.f32.mrf.mxu1  ;;  %v19158_v52 = vand.u32 4294901760, %v19137_v53  ;;  %v19188_v55 = vand.u32 4294901760, %v12797_v19 }
 0x2e2   :  { %12350 = vmatprep.subr.mxu0 %v19870_v34  ;;  %v4287_v24 = vpop.f32.mrf.mxu0  ;;  %v4036_v22 = vadd.f32 %v4035_v32, %v3962_v29  ;;  %12006 = vmatprep.mubr.f32.mxu1 %v19841_v11  ;;  %v19163_v6 = vsub.f32 %v12788_v7, %v19143_v41 }
 0x2e3   :  { %12237 = vmatprep.mubr.f32.mxu0 %v19841_v11  ;;  %v4208_v57 = vpop.f32.mrf.mxu1  ;;  %12008 = vmatmul.mubr.f32.vlgmr.msra.gmra.mxu1 %v19057_v0  ;;  %v12869_v49 = vsub.f32 %v19137_v53, %v19158_v52  ;;  %v19210_v28 = vsub.f32 %v12797_v19, %v19188_v55 }
 0x2e4   :  { %v4439_v20 = vpop.f32.mrf.mxu0  ;;  %12239 = vmatmul.mubr.f32.vlgmr.msra.gmra.mxu0 %v19057_v0  ;;  %v4209_v51 = vadd.f32 %v4208_v57, %v4127_v43  ;;  %12124 = vmatpush1.msra.mxu1 %v19863_v31  ;;  %v19873_v43 = vld [vmem:[#allocation36_spill] sm:$0xff]  ;;  %v12915_v29 = vand.u32 4294901760, %v19163_v6 }
 0x2e5   :  { %12352 = vmatpush1.msra.mxu0 %v19871_v61  ;;  %12276 = vmatprep.subr.mxu1 %v19862_v35  ;;  %v4210_v46 = vpop.f32.mrf.mxu1  ;;  %v19155_v35 = vsub.f32 %v12791_v60, %v19132_v23  ;;  %v19192_v7 = vand.u32 4294901760, %v12869_v49 }
 0x2e6   :  { %12511 = vmatprep.subr.mxu0 %v19872_v21  ;;  %v4441_v62 = vpop.f32.mrf.mxu0  ;;  %v4211_v45 = vadd.f32 %v4210_v46, %v4129_v33  ;;  %12157 = vmatprep.mubr.f32.mxu1 %v19841_v11  ;;  %v4286_v63 = vadd.f32 %v4285_v10, %v4209_v51  ;;  %v19876_v10 = vld [vmem:[#allocation48_spill] sm:$0xff] }
 0x2e7   :  { %12385 = vmatprep.mubr.f32.mxu0 %v19841_v11  ;;  %v4361_v26 = vpop.f32.mrf.mxu1  ;;  %12161 = vmatmul.mubr.f32.vlgmr.msra.gmra.mxu1 %v19075_v58  ;;  %v12909_v33 = vand.u32 4294901760, %v19155_v35 }
 0x2e8   :  { %v4591_v37 = vpop.f32.mrf.mxu0  ;;  %12391 = vmatmul.mubr.f32.vlgmr.msra.gmra.mxu0 %v19092_v25  ;;  %v4362_v50 = vadd.f32 %v4361_v26, %v4286_v63  ;;  %12278 = vmatpush1.msra.mxu1 %v19863_v31  ;;  %v4288_v38 = vadd.f32 %v4287_v24, %v4211_v45  ;;  %v11849_v31 = vmul.f32 %v11840_v42, %v18534_v1 }
 0x2e9   :  { %v4592_v40 = vadd.f32 %v4591_v37, %v4034_v59  ;;  %12514 = vmatpush1.msra.mxu0 %v19873_v43  ;;  %12432 = vmatprep.subr.mxu1 %v19874_v27  ;;  %v4363_v25 = vpop.f32.mrf.mxu1  ;;  %v19877_v59 = vld [vmem:[#allocation40_spill] sm:$0xff]  ;;  %v12916_v45 = vsub.f32 %v19163_v6, %v12915_v29 }
 0x2ea   :  { %12665 = vmatprep.subr.mxu0 %v19875_v18  ;;  %v4593_v2 = vpop.f32.mrf.mxu0  ;;  %v4364_v30 = vadd.f32 %v4363_v25, %v4288_v38  ;;  %12311 = vmatprep.mubr.f32.mxu1 %v19841_v11  ;;  %v4440_v15 = vadd.f32 %v4439_v20, %v4362_v50  ;;  %v12794_v60 = vsel %vm109_vm1, %v11849_v31, 0 }
 0x2eb   :  { %v4594_v44 = vadd.f32 %v4593_v2, %v4036_v22  ;;  %12547 = vmatprep.mubr.f32.mxu0 %v19841_v11  ;;  %v4513_v54 = vpop.f32.mrf.mxu1  ;;  %12313 = vmatmul.mubr.f32.vlgmr.msra.gmra.mxu1 %v19057_v0  ;;  %v12910_v22 = vsub.f32 %v19155_v35, %v12909_v33  ;;  %v19202_v21 = vand.u32 4294901760, %v12794_v60  ;;  %v12917_v27 = vand.u32 4294901760, %v12916_v45 }
 0x2ec   :  { %v4750_v3 = vpop.f32.mrf.mxu0  ;;  %12550 = vmatmul.mubr.f32.vlgmr.msra.gmra.mxu0 %v19066_v8  ;;  %v19176_v5 = vadd.f32 %v4513_v54, %v4440_v15  ;;  %12438 = vmatpush1.msra.mxu1 %v19876_v10  ;;  %v4442_v1 = vadd.f32 %v4441_v62, %v4364_v30 }
 0x2ed   :  { %12669 = vmatpush1.msra.mxu0 %v19877_v59  ;;  %12587 = vmatprep.subr.mxu1 %v19870_v34  ;;  %v4515_v56 = vpop.f32.mrf.mxu1  ;;  %v12911_v42 = vand.u32 4294901760, %v12910_v22 }
 0x2ee   :  { %v4752_v12 = vpop.f32.mrf.mxu0  ;;  %12471 = vmatprep.mubr.f32.mxu1 %v19841_v11  ;;  %v19182_v8 = vadd.f32 %v4515_v56, %v4442_v1  ;;  %12702 = vmatprep.mubr.f32.mxu0 %v19841_v11 }
 0x2ef   :  { %12830 = vmatprep.subr.mxu0 %v19132_v23  ;;  %v4673_v32 = vpop.f32.mrf.mxu1  ;;  %12473 = vmatmul.mubr.f32.vlgmr.msra.gmra.mxu1 %v19057_v0 }
 0x2f0   :  { %v4904_v24 = vpop.f32.mrf.mxu0  ;;  %12704 = vmatmul.mubr.f32.vlgmr.msra.gmra.mxu0 %v19057_v0  ;;  %v4674_v57 = vadd.f32 %v4673_v32, %v4592_v40  ;;  %12589 = vmatpush1.msra.mxu1 %v19871_v61 }
 0x2f1   :  { %12832 = vmatpush1.msra.mxu0 %v19143_v41  ;;  %12741 = vmatprep.subr.mxu1 %v19870_v34  ;;  %v4675_v20 = vpop.f32.mrf.mxu1 }
 0x2f2   :  { %12991 = vmatprep.subr.mxu0 %v19155_v35  ;;  %v4906_v51 = vpop.f32.mrf.mxu0  ;;  %v4676_v46 = vadd.f32 %v4675_v20, %v4594_v44  ;;  %12622 = vmatprep.mubr.f32.mxu1 %v19841_v11  ;;  %v4751_v62 = vadd.f32 %v4750_v3, %v4674_v57  ;;  %v13730_v35 = vsel %vm105_vm0, %v11826_v4, 0 }
 0x2f3   :  { %12865 = vmatprep.mubr.f32.mxu0 %v19841_v11  ;;  %v4826_v63 = vpop.f32.mrf.mxu1  ;;  %12626 = vmatmul.mubr.f32.vlgmr.msra.gmra.mxu1 %v19075_v58  ;;  %v19216_v58 = vsub.f32 %v12794_v60, %v19202_v21  ;;  %v19223_v25 = vand.u32 4294901760, %v13730_v35 }
 0x2f4   :  { %v5108_v34 = vpop.f32.mrf.mxu0  ;;  %12871 = vmatmul.mubr.f32.vlgmr.msra.gmra.mxu0 %v19192_v7  ;;  %v4827_v26 = vadd.f32 %v4826_v63, %v4751_v62  ;;  %12743 = vmatpush1.msra.mxu1 %v19871_v61  ;;  %v4753_v37 = vadd.f32 %v4752_v12, %v4676_v46 }
 0x2f5   :  { %12994 = vmatpush1.msra.mxu0 %v19163_v6  ;;  %12912 = vmatprep.subr.mxu1 %v12911_v42  ;;  %v4828_v50 = vpop.f32.mrf.mxu1  ;;  %v13374_v6 = vand.u32 4294901760, %v19210_v28 }
 0x2f6   :  { %13145 = vmatprep.subr.mxu0 %v12909_v33  ;;  %v5110_v40 = vpop.f32.mrf.mxu0  ;;  %v4829_v43 = vadd.f32 %v4828_v50, %v4753_v37  ;;  %12776 = vmatprep.mubr.f32.mxu1 %v19841_v11  ;;  %v4905_v38 = vadd.f32 %v4904_v24, %v4827_v26  ;;  %v19238_v33 = vsub.f32 %v13730_v35, %v19223_v25 }
 0x2f7   :  { %13027 = vmatprep.mubr.f32.mxu0 %v19841_v11  ;;  %v4978_v61 = vpop.f32.mrf.mxu1  ;;  %12778 = vmatmul.mubr.f32.vlgmr.msra.gmra.mxu1 %v19057_v0  ;;  %v13380_v0 = vand.u32 4294901760, %v19216_v58  ;;  %v13375_v49 = vsub.f32 %v19210_v28, %v13374_v6 }
 0x2f8   :  { %v5267_v18 = vpop.f32.mrf.mxu0  ;;  %13030 = vmatmul.mubr.f32.vlgmr.msra.gmra.mxu0 %v19137_v53  ;;  %v19225_v2 = vadd.f32 %v4978_v61, %v4905_v38  ;;  %12918 = vmatpush1.msra.mxu1 %v12917_v27  ;;  %v4907_v30 = vadd.f32 %v4906_v51, %v4829_v43  ;;  %v19879_v38 = vld [vmem:[#allocation10_spill] sm:$0xff] }
 0x2f9   :  { %13149 = vmatpush1.msra.mxu0 %v12915_v29  ;;  %13067 = vmatprep.subr.mxu1 %v19132_v23  ;;  %v4980_v44 = vpop.f32.mrf.mxu1  ;;  %v13381_v12 = vsub.f32 %v19216_v58, %v13380_v0  ;;  %v13376_v32 = vand.u32 4294901760, %v13375_v49 }
 0x2fa   :  { %13295 = vmatprep.subr.mxu0 %v19188_v55  ;;  %v5269_v15 = vpop.f32.mrf.mxu0  ;;  %v19229_v31 = vadd.f32 %v4980_v44, %v4907_v30  ;;  %12951 = vmatprep.mubr.f32.mxu1 %v19841_v11 }
 0x2fb   :  { %13182 = vmatprep.mubr.f32.mxu0 %v19841_v11  ;;  %v5190_v54 = vpop.f32.mrf.mxu1  ;;  %12953 = vmatmul.mubr.f32.vlgmr.msra.gmra.mxu1 %v19122_v47  ;;  %v13382_v4 = vand.u32 4294901760, %v13381_v12  ;;  %v19884_v12 = vld [vmem:[#allocation21_spill] sm:$0xff] }
 0x2fc   :  { %v5421_v3 = vpop.f32.mrf.mxu0  ;;  %13184 = vmatmul.mubr.f32.vlgmr.msra.gmra.mxu0 %v19122_v47  ;;  %v5191_v19 = vadd.f32 %v5190_v54, %v5108_v34  ;;  %13069 = vmatpush1.msra.mxu1 %v19143_v41  ;;  %v19881_v54 = vld [vmem:[#allocation12_spill] sm:$0xff] }
 0x2fd   :  { %13297 = vmatpush1.msra.mxu0 %v19202_v21  ;;  %13221 = vmatprep.subr.mxu1 %v19132_v23  ;;  %v5192_v10 = vpop.f32.mrf.mxu1  ;;  %v19250_v23 = vand.u32 4294901760, %v19238_v33 }
 0x2fe   :  { %13456 = vmatprep.subr.mxu0 %v19210_v28  ;;  %v5423_v59 = vpop.f32.mrf.mxu0  ;;  %v5193_v1 = vadd.f32 %v5192_v10, %v5110_v40  ;;  %13102 = vmatprep.mubr.f32.mxu1 %v19841_v11  ;;  %v5268_v56 = vadd.f32 %v5267_v18, %v5191_v19  ;;  %v19880_v18 = vld [vmem:[#allocation15_spill] sm:$0xff]  ;;  %v19882_v10 = vld [vmem:[#allocation22_spill] sm:$0xff] }
 0x2ff   :  { %13330 = vmatprep.mubr.f32.mxu0 %v19841_v11  ;;  %v5343_v29 = vpop.f32.mrf.mxu1  ;;  %13106 = vmatmul.mubr.f32.vlgmr.msra.gmra.mxu1 %v19158_v52 }
 0x300   :  { %v5573_v60 = vpop.f32.mrf.mxu0  ;;  %13336 = vmatmul.mubr.f32.vlgmr.msra.gmra.mxu0 %v19192_v7  ;;  %v5344_v24 = vadd.f32 %v5343_v29, %v5268_v56  ;;  %13223 = vmatpush1.msra.mxu1 %v19143_v41  ;;  %v5270_v22 = vadd.f32 %v5269_v15, %v5193_v1  ;;  %v13802_v41 = vsub.f32 %v19238_v33, %v19250_v23 }
 0x301   :  { %13459 = vmatpush1.msra.mxu0 %v19216_v58  ;;  %13377 = vmatprep.subr.mxu1 %v13376_v32  ;;  %v5345_v57 = vpop.f32.mrf.mxu1 }
 0x302   :  { %13610 = vmatprep.subr.mxu0 %v13374_v6  ;;  %v5575_v20 = vpop.f32.mrf.mxu0  ;;  %v5346_v51 = vadd.f32 %v5345_v57, %v5270_v22  ;;  %13256 = vmatprep.mubr.f32.mxu1 %v19841_v11  ;;  %v5422_v7 = vadd.f32 %v5421_v3, %v5344_v24  ;;  %v19269_v50 = vand.u32 4294901760, %v13802_v41  ;;  %v19885_v24 = vld [vmem:[#allocation16_spill] sm:$0xff]  ;;  %v19886_v57 = vld [vmem:[#allocation13_spill] sm:$0xff]  ;;  %v19887_v41 = vld [vmem:[#allocation14_spill] sm:$0xff] }
 0x303   :  { %13492 = vmatprep.mubr.f32.mxu0 %v19841_v11  ;;  %v5495_v46 = vpop.f32.mrf.mxu1  ;;  %13258 = vmatmul.mubr.f32.vlgmr.msra.gmra.mxu1 %v19122_v47 }
 0x304   :  { %v5732_v62 = vpop.f32.mrf.mxu0  ;;  %13495 = vmatmul.mubr.f32.vlgmr.msra.gmra.mxu0 %v19137_v53  ;;  %v5496_v45 = vadd.f32 %v5495_v46, %v5422_v7  ;;  %13383 = vmatpush1.msra.mxu1 %v13382_v4  ;;  %v5424_v63 = vadd.f32 %v5423_v59, %v5346_v51  ;;  %v19878_v53 = vld [vmem:[#allocation11_spill] sm:$0xff] }
 0x305   :  { %13614 = vmatpush1.msra.mxu0 %v13380_v0  ;;  %13532 = vmatprep.subr.mxu1 %v19188_v55  ;;  %v5497_v34 = vpop.f32.mrf.mxu1 }
 0x306   :  { %v5734_v42 = vpop.f32.mrf.mxu0  ;;  %13416 = vmatprep.mubr.f32.mxu1 %v19841_v11  ;;  %v19263_v28 = vadd.f32 %v5496_v45, %v19176_v5  ;;  %v5498_v26 = vadd.f32 %v5497_v34, %v5424_v63  ;;  %13647 = vmatprep.mubr.f32.mxu0 %v19841_v11  ;;  %v19888_v34 = vld [vmem:[#allocation17_spill] sm:$0xff] }
 0x307   :  { %13763 = vmatprep.subr.mxu0 %v19878_v53  ;;  %v5655_v37 = vpop.f32.mrf.mxu1  ;;  %13418 = vmatmul.mubr.f32.vlgmr.msra.gmra.mxu1 %v19122_v47 }
 0x308   :  { %v5886_v35 = vpop.f32.mrf.mxu0  ;;  %13649 = vmatmul.mubr.f32.vlgmr.msra.gmra.mxu0 %v19122_v47  ;;  %v19272_v40 = vadd.f32 %v5498_v26, %v19182_v8  ;;  %v5656_v58 = vadd.f32 %v5655_v37, %v5573_v60  ;;  %13534 = vmatpush1.msra.mxu1 %v19202_v21  ;;  %v11827_v8 = vld [vmem:[%s19725_s6 + $0x18] sm:$0x7f]  ;;  %v3010_v26 = vld [vmem:[%s19724_s5] sm:$0x7f] }
 0x309   :  { %13567 = vmatprep.mubr.f32.mxu1 %v19841_v11  ;;  %13686 = vmatprep.subr.mxu1 %v19188_v55  ;;  %v5657_v5 = vpop.f32.mrf.mxu1  ;;  %v14667_v3 = vsel %vm105_vm0, %v11827_v8, 0 }
 0x30a   :  { %v5888_v43 = vpop.f32.mrf.mxu0  ;;  %13765 = vmatpush1.msra.mxu0 %v19879_v38  ;;  %v5658_v27 = vadd.f32 %v5657_v5, %v5575_v20  ;;  %13798 = vmatprep.mubr.f32.mxu0 %v19841_v11  ;;  %v5733_v61 = vadd.f32 %v5732_v62, %v5656_v58  ;;  %v19296_v29 = vand.u32 4294901760, %v14667_v3  ;;  %v19889_v58 = vld [vmem:[#allocation19_spill] sm:$0xff] }
 0x30b   :  { %13924 = vmatprep.subr.mxu0 %v19880_v18  ;;  %v5808_v6 = vpop.f32.mrf.mxu1  ;;  %13571 = vmatmul.mubr.f32.vlgmr.msra.gmra.mxu1 %v19158_v52  ;;  %v19883_v52 = vld [vmem:[#allocation18_spill] sm:$0xff] }
 0x30c   :  { %v6078_v30 = vpop.f32.mrf.mxu0  ;;  %13804 = vmatmul.mubr.f32.vlgmr.msra.gmra.mxu0 %v19269_v50  ;;  %v5809_v55 = vadd.f32 %v5808_v6, %v5733_v61  ;;  %13688 = vmatpush1.msra.mxu1 %v19202_v21  ;;  %v5735_v44 = vadd.f32 %v5734_v42, %v5658_v27  ;;  %v19890_v27 = vld [vmem:[#allocation20_spill] sm:$0xff] }
 0x30d   :  { %13721 = vmatprep.mubr.f32.mxu1 %v19841_v11  ;;  %v5810_v15 = vpop.f32.mrf.mxu1  ;;  %13927 = vmatpush1.msra.mxu0 %v19881_v54 }
 0x30e   :  { %v6080_v0 = vpop.f32.mrf.mxu0  ;;  %13960 = vmatprep.mubr.f32.mxu0 %v19841_v11  ;;  %v5811_v49 = vadd.f32 %v5810_v15, %v5735_v44  ;;  %v5887_v19 = vadd.f32 %v5886_v35, %v5809_v55  ;;  %13845 = vmatprep.subr.mxu1 %v19882_v10  ;;  %v19892_v44 = vld [vmem:[#allocation24_spill] sm:$0xff]  ;;  %v19345_v10 = vpop.permute.xlu1 %15607 }
 0x30f   :  { %14078 = vmatprep.subr.mxu0 %v19883_v52  ;;  %v5960_v59 = vpop.f32.mrf.mxu1  ;;  %13723 = vmatmul.mubr.f32.vlgmr.msra.gmra.mxu1 %v19122_v47 }
 0x310   :  { %v6237_v1 = vpop.f32.mrf.mxu0  ;;  %13963 = vmatmul.mubr.f32.vlgmr.msra.gmra.mxu0 %v19238_v33  ;;  %v5961_v21 = vadd.f32 %v5960_v59, %v5887_v19  ;;  %v5889_v56 = vadd.f32 %v5888_v43, %v5811_v49  ;;  %13851 = vmatpush1.msra.mxu1 %v19884_v12  ;;  %v19894_v49 = vld [vmem:[#allocation25_spill] sm:$0xff]  ;;  %v19896_v12 = vld [vmem:[#allocation44_spill] sm:$0xff] }
 0x311   :  { %13884 = vmatprep.mubr.f32.mxu1 %v19841_v11  ;;  %v5962_v60 = vpop.f32.mrf.mxu1  ;;  %14082 = vmatpush1.msra.mxu0 %v19885_v24 }
 0x312   :  { %v6239_v32 = vpop.f32.mrf.mxu0  ;;  %14115 = vmatprep.mubr.f32.mxu0 %v19841_v11  ;;  %v19301_v22 = vadd.f32 %v5961_v21, %v19225_v2  ;;  %v5963_v47 = vadd.f32 %v5962_v60, %v5889_v56  ;;  %14000 = vmatprep.subr.mxu1 %v19878_v53  ;;  %v19313_v2 = vsub.f32 %v14667_v3, %v19296_v29  ;;  %v19895_v56 = vld [vmem:[#allocation43_spill] sm:$0xff] }
 0x313   :  { %14228 = vmatprep.subr.mxu0 %v19886_v57  ;;  %v6160_v20 = vpop.f32.mrf.mxu1  ;;  %13886 = vmatmul.mubr.f32.vlgmr.msra.gmra.mxu1 %v19223_v25 }
 0x314   :  { %v6391_v51 = vpop.f32.mrf.mxu0  ;;  %14117 = vmatmul.mubr.f32.vlgmr.msra.gmra.mxu0 %v19223_v25  ;;  %v19308_v7 = vadd.f32 %v5963_v47, %v19229_v31  ;;  %v6161_v4 = vadd.f32 %v6160_v20, %v6078_v30  ;;  %14002 = vmatpush1.msra.mxu1 %v19879_v38  ;;  %v19327_v5 = vand.u32 4294901760, %v19313_v2  ;;  %v19891_v30 = vld [vmem:[#allocation23_spill] sm:$0xff] }
 0x315   :  { %14035 = vmatprep.mubr.f32.mxu1 %v19841_v11  ;;  %v6162_v46 = vpop.f32.mrf.mxu1  ;;  %14230 = vmatpush1.msra.mxu0 %v19887_v41 }
 0x316   :  { %v6393_v62 = vpop.f32.mrf.mxu0  ;;  %14263 = vmatprep.mubr.f32.mxu0 %v19841_v11  ;;  %v6163_v45 = vadd.f32 %v6162_v46, %v6080_v0  ;;  %v6238_v63 = vadd.f32 %v6237_v1, %v6161_v4  ;;  %14389 = vmatprep.subr.mxu0 %v19888_v34  ;;  %v14739_v15 = vsub.f32 %v19313_v2, %v19327_v5  ;;  %v19893_v0 = vld [vmem:[#allocation41_spill] sm:$0xff]  ;;  %v19897_v34 = vld [vmem:[#allocation47_spill] sm:$0xff] }
 0x317   :  { %14154 = vmatprep.subr.mxu1 %v19878_v53  ;;  %v6313_v31 = vpop.f32.mrf.mxu1  ;;  %14039 = vmatmul.mubr.f32.vlgmr.msra.gmra.mxu1 %v19250_v23 }
 0x318   :  { %v6543_v42 = vpop.f32.mrf.mxu0  ;;  %14269 = vmatmul.mubr.f32.vlgmr.msra.gmra.mxu0 %v19269_v50  ;;  %v6314_v37 = vadd.f32 %v6313_v31, %v6238_v63  ;;  %v6240_v35 = vadd.f32 %v6239_v32, %v6163_v45  ;;  %14156 = vmatpush1.msra.mxu1 %v19879_v38  ;;  %v15606_v38 = vpop.permute.xlu0 %15605  ;;  %v19898_v31 = vld [vmem:[#allocation54_spill] sm:$0xff] }
 0x319   :  { %14392 = vmatpush1.msra.mxu0 %v19889_v58  ;;  %v6315_v53 = vpop.f32.mrf.mxu1  ;;  %14189 = vmatprep.mubr.f32.mxu1 %v19841_v11  ;;  %v15612_v24 = vsel %vm8862_vm12, %v15606_v38, %v19345_v10 }
 0x31a   :  { %v6545_v43 = vpop.f32.mrf.mxu0  ;;  %14425 = vmatprep.mubr.f32.mxu0 %v19841_v11  ;;  %v6316_v50 = vadd.f32 %v6315_v53, %v6240_v35  ;;  %14543 = vmatprep.subr.mxu0 %v19890_v27  ;;  %v6392_v61 = vadd.f32 %v6391_v51, %v6314_v37  ;;  %v11828_v51 = vld [vmem:[%s19725_s6 + $0x20] sm:$0x7f]  ;;  %v19899_v35 = vld [vmem:[#allocation49_spill] sm:$0xff] }
 0x31b   :  { %11817 = vperm.xlu1 %17702, %v3010_v26   ;;  %v6465_v18 = vpop.f32.mrf.mxu1  ;;  %14191 = vmatmul.mubr.f32.vlgmr.msra.gmra.mxu1 %v19223_v25  ;;  %v15625_v37 = vsel %vm105_vm0, %v11828_v51, 0  ;;  %vm16633_vm0 = vcmask 1045504  }
 0x31c   :  { %v6702_v8 = vpop.f32.mrf.mxu0  ;;  %14428 = vmatmul.mubr.f32.vlgmr.msra.gmra.mxu0 %v19238_v33  ;;  %v6466_v6 = vadd.f32 %v6465_v18, %v6392_v61  ;;  %v6394_v55 = vadd.f32 %v6393_v62, %v6316_v50  ;;  %14310 = vmatprep.subr.mxu1 %v19892_v44  ;;  %v15604_v47 = vpop.permute.xlu0 %15603  ;;  %v19900_v50 = vld [vmem:[#allocation56_spill] sm:$0xff]  ;;  %v19382_v18 = vand.u32 4294901760, %v15625_v37 }
 0x31d   :  { %14547 = vmatpush1.msra.mxu0 %v19891_v30  ;;  %v6467_v54 = vpop.f32.mrf.mxu1  ;;  %14316 = vmatpush1.msra.mxu1 %v19894_v49  ;;  %v15611_v4 = vsel %vm8862_vm12, %v15604_v47, %v15606_v38 }
 0x31e   :  { %14700 = vmatprep.subr.mxu0 %v19893_v0  ;;  %v6704_v3 = vpop.f32.mrf.mxu0  ;;  %v19341_v19 = vadd.f32 %v6466_v6, %v19263_v28  ;;  %v6468_v33 = vadd.f32 %v6467_v54, %v6394_v55  ;;  %14349 = vmatprep.mubr.f32.mxu1 %v19841_v11  ;;  %v19354_v28 = vand.u32 4294901760, %v14739_v15  ;;  %v15610_v55 = vpop.permute.xlu1 %15609 }
 0x31f   :  { %14580 = vmatprep.mubr.f32.mxu0 %v19841_v11  ;;  %v6625_v52 = vpop.f32.mrf.mxu1  ;;  %14351 = vmatmul.mubr.f32.vlgmr.msra.gmra.mxu1 %v19223_v25 }
 0x320   :  { %v6856_v59 = vpop.f32.mrf.mxu0  ;;  %14582 = vmatmul.mubr.f32.vlgmr.msra.gmra.mxu0 %v19223_v25  ;;  %v19350_v1 = vadd.f32 %v6468_v33, %v19272_v40  ;;  %v6626_v21 = vadd.f32 %v6625_v52, %v6543_v42  ;;  %14465 = vmatprep.subr.mxu1 %v19886_v57  ;;  %v19402_v33 = vsub.f32 %v15625_v37, %v19382_v18  ;;  %v19903_v52 = vld [vmem:[#allocation52_spill] sm:$0xff] }
 0x321   :  { %14702 = vmatpush1.msra.mxu0 %v19895_v56  ;;  %v6627_v60 = vpop.f32.mrf.mxu1  ;;  %14467 = vmatpush1.msra.mxu1 %v19887_v41 }
 0x322   :  { %14861 = vmatprep.subr.mxu0 %v19896_v12  ;;  %v6858_v32 = vpop.f32.mrf.mxu0  ;;  %v6628_v20 = vadd.f32 %v6627_v60, %v6545_v43  ;;  %14500 = vmatprep.mubr.f32.mxu1 %v19841_v11  ;;  %v6703_v40 = vadd.f32 %v6702_v8, %v6626_v21  ;;  %v19901_v8 = vld [vmem:[#allocation50_spill] sm:$0xff]  ;;  %v15619_v12 = vsel %vm8862_vm12, %v15610_v55, %v15604_v47 }
 0x323   :  { %14619 = vmatprep.subr.mxu1 %v19886_v57  ;;  %14735 = vmatprep.mubr.f32.mxu0 %v19841_v11  ;;  %v6778_v46 = vpop.f32.mrf.mxu1  ;;  %v15621_v57 = vmul.f32 %v15612_v24, %v18783_v9  ;;  %v15623_v47 = vmul.f32 %v15619_v12, %v18830_v36 }
 0x324   :  { %v7023_v62 = vpop.f32.mrf.mxu0  ;;  %14504 = vmatmul.mubr.f32.vlgmr.msra.gmra.mxu1 %v19250_v23  ;;  %v6779_v45 = vadd.f32 %v6778_v46, %v6703_v40  ;;  %14741 = vmatmul.mubr.f32.vlgmr.msra.gmra.mxu0 %v19354_v28  ;;  %v6705_v63 = vadd.f32 %v6704_v3, %v6628_v20  ;;  %v15613_v20 = vsel %vm8862_vm12, %v19345_v10, %v15610_v55  ;;  %v19905_v10 = vld [vmem:[#allocation55_spill] sm:$0xff] }
 0x325   :  { %14621 = vmatpush1.msra.mxu1 %v19887_v41  ;;  %14864 = vmatpush1.msra.mxu0 %v19897_v34  ;;  %v6780_v42 = vpop.f32.mrf.mxu1  ;;  %v15620_v41 = vmul.f32 %v15611_v4, %v18799_v39  ;;  %v15631_v61 = vsel %vm109_vm1, %v15621_v57, 0 }
 0x326   :  { %14782 = vmatprep.subr.mxu1 %v19898_v31  ;;  %v7025_v26 = vpop.f32.mrf.mxu0  ;;  %15015 = vmatprep.subr.mxu0 %v19899_v35  ;;  %v6781_v58 = vadd.f32 %v6780_v42, %v6705_v63  ;;  %v6857_v23 = vadd.f32 %v6856_v59, %v6779_v45  ;;  %v19392_v15 = vand.u32 4294901760, %v15631_v61  ;;  %v19906_v45 = vld [vmem:[#allocation59_spill] sm:$0xff]  ;;  %v19907_v31 = vld [vmem:[#allocation57_spill] sm:$0xff]  ;;  %v15637_v35 = vsel %vm109_vm1, %v15623_v47, 0 }
 0x327   :  { %14654 = vmatprep.mubr.f32.mxu1 %v19841_v11  ;;  %14897 = vmatprep.mubr.f32.mxu0 %v19841_v11  ;;  %v6930_v53 = vpop.f32.mrf.mxu1  ;;  %v15628_v44 = vsel %vm109_vm1, %v15620_v41, 0 }
 0x328   :  { %v7182_v9 = vpop.f32.mrf.mxu0  ;;  %14656 = vmatmul.mubr.f32.vlgmr.msra.gmra.mxu1 %v19223_v25  ;;  %v6931_v43 = vadd.f32 %v6930_v53, %v6857_v23  ;;  %14900 = vmatmul.mubr.f32.vlgmr.msra.gmra.mxu0 %v19313_v2  ;;  %v6859_v27 = vadd.f32 %v6858_v32, %v6781_v58  ;;  %v19902_v25 = vld [vmem:[#allocation51_spill] sm:$0xff]  ;;  %v19407_v60 = vand.u32 4294901760, %v15628_v44  ;;  %v19908_v23 = vld [vmem:[#allocation60_spill] sm:$0xff] }
 0x329   :  { %14788 = vmatpush1.msra.mxu1 %v19900_v50  ;;  %15019 = vmatpush1.msra.mxu0 %v19901_v8  ;;  %v6932_v39 = vpop.f32.mrf.mxu1  ;;  %v19449_v8 = vand.u32 4294901760, %v15637_v35 }
 0x32a   :  { %14937 = vmatprep.subr.mxu1 %v19893_v0  ;;  %v7184_v38 = vpop.f32.mrf.mxu0  ;;  %v19387_v6 = vadd.f32 %v6931_v43, %v19301_v22  ;;  %15165 = vmatprep.subr.mxu0 %v19902_v25  ;;  %v6933_v30 = vadd.f32 %v6932_v39, %v6859_v27  ;;  %v19427_v34 = vsub.f32 %v15628_v44, %v19407_v60 }
 0x32b   :  { %14821 = vmatprep.mubr.f32.mxu1 %v19841_v11  ;;  %15052 = vmatprep.mubr.f32.mxu0 %v19841_v11  ;;  %v7105_v54 = vpop.f32.mrf.mxu1 }
 0x32c   :  { %v7336_v3 = vpop.f32.mrf.mxu0  ;;  %14823 = vmatmul.mubr.f32.vlgmr.msra.gmra.mxu1 %v19296_v29  ;;  %v19397_v49 = vadd.f32 %v6933_v30, %v19308_v7  ;;  %v7106_v22 = vadd.f32 %v7105_v54, %v7023_v62  ;;  %15054 = vmatmul.mubr.f32.vlgmr.msra.gmra.mxu0 %v19296_v29  ;;  %v19904_v7 = vld [vmem:[#allocation53_spill] sm:$0xff]  ;;  %v19422_v62 = vand.u32 4294901760, %v19402_v33 }
 0x32d   :  { %14939 = vmatpush1.msra.mxu1 %v19895_v56  ;;  %15167 = vmatpush1.msra.mxu0 %v19903_v52  ;;  %v7107_v59 = vpop.f32.mrf.mxu1 }
 0x32e   :  { %15091 = vmatprep.subr.mxu1 %v19893_v0  ;;  %v7338_v21 = vpop.f32.mrf.mxu0  ;;  %15326 = vmatprep.subr.mxu0 %v19904_v7  ;;  %v7108_v32 = vadd.f32 %v7107_v59, %v7025_v26  ;;  %v7183_v24 = vadd.f32 %v7182_v9, %v7106_v22  ;;  %v19416_v0 = vsub.f32 %v15631_v61, %v19392_v15 }
 0x32f   :  { %14972 = vmatprep.mubr.f32.mxu1 %v19841_v11  ;;  %15200 = vmatprep.mubr.f32.mxu0 %v19841_v11  ;;  %v7258_v40 = vpop.f32.mrf.mxu1  ;;  %v15709_v53 = vsub.f32 %v19402_v33, %v19422_v62 }
 0x330   :  { %v7488_v51 = vpop.f32.mrf.mxu0  ;;  %14976 = vmatmul.mubr.f32.vlgmr.msra.gmra.mxu1 %v19327_v5  ;;  %v7259_v4 = vadd.f32 %v7258_v40, %v7183_v24  ;;  %15206 = vmatmul.mubr.f32.vlgmr.msra.gmra.mxu0 %v19354_v28  ;;  %v7185_v46 = vadd.f32 %v7184_v38, %v7108_v32  ;;  %v15622_v28 = vmul.f32 %v15613_v20, %v18842_v48  ;;  %v15749_v37 = vand.u32 4294901760, %v19416_v0  ;;  %v19909_v48 = vld [vmem:[#allocation58_spill] sm:$0xff] }
 0x331   :  { %15093 = vmatpush1.msra.mxu1 %v19895_v56  ;;  %15329 = vmatpush1.msra.mxu0 %v19905_v10  ;;  %v7260_v63 = vpop.f32.mrf.mxu1  ;;  %v19459_v44 = vand.u32 4294901760, %v15709_v53 }
 0x332   :  { %15247 = vmatprep.subr.mxu1 %v19906_v45  ;;  %v7490_v57 = vpop.f32.mrf.mxu0  ;;  %15480 = vmatprep.subr.mxu0 %v19907_v31  ;;  %v7261_v36 = vadd.f32 %v7260_v63, %v7185_v46  ;;  %v7337_v56 = vadd.f32 %v7336_v3, %v7259_v4  ;;  %v15634_v61 = vsel %vm109_vm1, %v15622_v28, 0 }
 0x333   :  { %15126 = vmatprep.mubr.f32.mxu1 %v19841_v11  ;;  %15362 = vmatprep.mubr.f32.mxu0 %v19841_v11  ;;  %v7410_v42 = vpop.f32.mrf.mxu1  ;;  %v19463_v22 = vand.u32 4294901760, %v15634_v61 }
 0x334   :  { %v7647_v26 = vpop.f32.mrf.mxu0  ;;  %15128 = vmatmul.mubr.f32.vlgmr.msra.gmra.mxu1 %v19296_v29  ;;  %v7411_v58 = vadd.f32 %v7410_v42, %v7337_v56  ;;  %15365 = vmatmul.mubr.f32.vlgmr.msra.gmra.mxu0 %v19313_v2  ;;  %v7339_v41 = vadd.f32 %v7338_v21, %v7261_v36  ;;  %v15755_v2 = vand.u32 4294901760, %v19427_v34 }
 0x335   :  { %15253 = vmatpush1.msra.mxu1 %v19908_v23  ;;  %15484 = vmatpush1.msra.mxu0 %v19909_v48  ;;  %v7412_v9 = vpop.f32.mrf.mxu1 }
 0x336   :  { %15402 = vmatprep.subr.mxu1 %v19902_v25  ;;  %v7649_v43 = vpop.f32.mrf.mxu0  ;;  %v19443_v50 = vadd.f32 %v7411_v58, %v19341_v19  ;;  %v7413_v27 = vadd.f32 %v7412_v9, %v7339_v41  ;;  %15286 = vmatprep.mubr.f32.mxu1 %v19841_v11  ;;  %v15750_v19 = vsub.f32 %v19416_v0, %v15749_v37 }
 0x337   :  { %15517 = vmatprep.mubr.f32.mxu0 %v19841_v11  ;;  %15670 = vmatprep.subr.mxu0 %v19392_v15  ;;  %v7570_v39 = vpop.f32.mrf.mxu1  ;;  %v15756_v21 = vsub.f32 %v19427_v34, %v15755_v2 }
 0x338   :  { %v7801_v38 = vpop.f32.mrf.mxu0  ;;  %15288 = vmatmul.mubr.f32.vlgmr.msra.gmra.mxu1 %v19296_v29  ;;  %v19455_v30 = vadd.f32 %v7413_v27, %v19350_v1  ;;  %v7571_v55 = vadd.f32 %v7570_v39, %v7488_v51  ;;  %15519 = vmatmul.mubr.f32.vlgmr.msra.gmra.mxu0 %v19296_v29  ;;  %v15751_v32 = vand.u32 4294901760, %v15750_v19 }
 0x339   :  { %15404 = vmatpush1.msra.mxu1 %v19903_v52  ;;  %15672 = vmatpush1.msra.mxu0 %v19407_v60  ;;  %v7572_v54 = vpop.f32.mrf.mxu1  ;;  %v15757_v4 = vand.u32 4294901760, %v15756_v21 }
 0x33a   :  { %15556 = vmatprep.subr.mxu1 %v19902_v25  ;;  %v7803_v3 = vpop.f32.mrf.mxu0  ;;  %15831 = vmatprep.subr.mxu0 %v19416_v0  ;;  %v7573_v59 = vadd.f32 %v7572_v54, %v7490_v57  ;;  %v7648_v1 = vadd.f32 %v7647_v26, %v7571_v55  ;;  %v16213_v25 = vsub.f32 %v15637_v35, %v19449_v8 }
 0x33b   :  { %15437 = vmatprep.mubr.f32.mxu1 %v19841_v11  ;;  %15705 = vmatprep.mubr.f32.mxu0 %v19841_v11  ;;  %v7723_v12 = vpop.f32.mrf.mxu1  ;;  %v19477_v0 = vsub.f32 %v15634_v61, %v19463_v22 }
 0x33c   :  { %v7993_v7 = vpop.f32.mrf.mxu0  ;;  %15441 = vmatmul.mubr.f32.vlgmr.msra.gmra.mxu1 %v19327_v5  ;;  %v7724_v24 = vadd.f32 %v7723_v12, %v7648_v1  ;;  %15711 = vmatmul.mubr.f32.vlgmr.msra.gmra.mxu0 %v19459_v44  ;;  %v7650_v20 = vadd.f32 %v7649_v43, %v7573_v59  ;;  %v16214_v10 = vand.u32 4294901760, %v16213_v25 }
 0x33d   :  { %15558 = vmatpush1.msra.mxu1 %v19903_v52  ;;  %15834 = vmatpush1.msra.mxu0 %v19427_v34  ;;  %v7725_v40 = vpop.f32.mrf.mxu1 }
 0x33e   :  { %15752 = vmatprep.subr.mxu1 %v15751_v32  ;;  %v19474_v51 = vpop.f32.mrf.mxu0  ;;  %15985 = vmatprep.subr.mxu0 %v15749_v37  ;;  %v7726_v5 = vadd.f32 %v7725_v40, %v7650_v20  ;;  %v7802_v47 = vadd.f32 %v7801_v38, %v7724_v24  ;;  %v16215_v42 = vsub.f32 %v16213_v25, %v16214_v10 }
 0x33f   :  { %15591 = vmatprep.mubr.f32.mxu1 %v19841_v11  ;;  %15867 = vmatprep.mubr.f32.mxu0 %v19841_v11  ;;  %v7875_v52 = vpop.f32.mrf.mxu1 }
 0x340   :  { %v8152_v46 = vpop.f32.mrf.mxu0  ;;  %15593 = vmatmul.mubr.f32.vlgmr.msra.gmra.mxu1 %v19296_v29  ;;  %v7876_v45 = vadd.f32 %v7875_v52, %v7802_v47  ;;  %15870 = vmatmul.mubr.f32.vlgmr.msra.gmra.mxu0 %v19402_v33  ;;  %v7804_v63 = vadd.f32 %v7803_v3, %v7726_v5  ;;  %v16220_v29 = vand.u32 4294901760, %v19477_v0  ;;  %v16216_v53 = vand.u32 4294901760, %v16215_v42 }
 0x341   :  { %15758 = vmatpush1.msra.mxu1 %v15757_v4  ;;  %15989 = vmatpush1.msra.mxu0 %v15755_v2  ;;  %v7877_v57 = vpop.f32.mrf.mxu1 }
 0x342   :  { %15907 = vmatprep.subr.mxu1 %v19392_v15  ;;  %v19484_v34 = vpop.f32.mrf.mxu0  ;;  %v19487_v31 = vadd.f32 %v7876_v45, %v19387_v6  ;;  %16135 = vmatprep.subr.mxu0 %v19449_v8  ;;  %v7878_v36 = vadd.f32 %v7877_v57, %v7804_v63  ;;  %v16221_v23 = vsub.f32 %v19477_v0, %v16220_v29 }
 0x343   :  { %15791 = vmatprep.mubr.f32.mxu1 %v19841_v11  ;;  %16022 = vmatprep.mubr.f32.mxu0 %v19841_v11  ;;  %v8075_v56 = vpop.f32.mrf.mxu1 }
 0x344   :  { %v8306_v28 = vpop.f32.mrf.mxu0  ;;  %15793 = vmatmul.mubr.f32.vlgmr.msra.gmra.mxu1 %v19382_v18  ;;  %v19495_v26 = vadd.f32 %v7878_v36, %v19397_v49  ;;  %v8076_v37 = vadd.f32 %v8075_v56, %v7993_v7  ;;  %16024 = vmatmul.mubr.f32.vlgmr.msra.gmra.mxu0 %v19382_v18  ;;  %v16222_v27 = vand.u32 4294901760, %v16221_v23 }
 0x345   :  { %15909 = vmatpush1.msra.mxu1 %v19407_v60  ;;  %16137 = vmatpush1.msra.mxu0 %v19463_v22  ;;  %v8077_v6 = vpop.f32.mrf.mxu1 }
 0x346   :  { %16061 = vmatprep.subr.mxu1 %v19392_v15  ;;  %v19501_v35 = vpop.f32.mrf.mxu0  ;;  %16296 = vmatprep.subr.mxu0 %v16213_v25  ;;  %v8153_v58 = vadd.f32 %v8152_v46, %v8076_v37 }
 0x347   :  { %15942 = vmatprep.mubr.f32.mxu1 %v19841_v11  ;;  %16170 = vmatprep.mubr.f32.mxu0 %v19841_v11  ;;  %v8228_v49 = vpop.f32.mrf.mxu1 }
 0x348   :  { %v8458_v41 = vpop.f32.mrf.mxu0  ;;  %15946 = vmatmul.mubr.f32.vlgmr.msra.gmra.mxu1 %v19422_v62  ;;  %v8229_v48 = vadd.f32 %v8228_v49, %v8153_v58  ;;  %16176 = vmatmul.mubr.f32.vlgmr.msra.gmra.mxu0 %v19459_v44 }
 0x349   :  { %16063 = vmatpush1.msra.mxu1 %v19407_v60  ;;  %16299 = vmatpush1.msra.mxu0 %v19477_v0  ;;  %v8230_v15 = vpop.f32.mrf.mxu1 }
 0x34a   :  { %16217 = vmatprep.subr.mxu1 %v16216_v53  ;;  %v8460_v9 = vpop.f32.mrf.mxu0  ;;  %16450 = vmatprep.subr.mxu0 %v16214_v10  ;;  %v8307_v43 = vadd.f32 %v8306_v28, %v8229_v48 }
 0x34b   :  { %16096 = vmatprep.mubr.f32.mxu1 %v19841_v11  ;;  %16332 = vmatprep.mubr.f32.mxu0 %v19841_v11  ;;  %v8380_v2 = vpop.f32.mrf.mxu1 }
 0x34c   :  { %v8617_v61 = vpop.f32.mrf.mxu0  ;;  %16098 = vmatmul.mubr.f32.vlgmr.msra.gmra.mxu1 %v19382_v18  ;;  %v8381_v39 = vadd.f32 %v8380_v2, %v8307_v43  ;;  %16335 = vmatmul.mubr.f32.vlgmr.msra.gmra.mxu0 %v19402_v33 }
 0x34d   :  { %16223 = vmatpush1.msra.mxu1 %v16222_v27  ;;  %16454 = vmatpush1.msra.mxu0 %v16220_v29  ;;  %v8382_v60 = vpop.f32.mrf.mxu1 }
 0x34e   :  { %16372 = vmatprep.subr.mxu1 %v19449_v8  ;;  %v8619_v38 = vpop.f32.mrf.mxu0  ;;  %v19516_v19 = vadd.f32 %v8381_v39, %v19443_v50  ;;  %16256 = vmatprep.mubr.f32.mxu1 %v19841_v11  ;;  %v8078_v50 = vadd.f32 %v8077_v6, %v19474_v51 }
 0x34f   :  { %16487 = vmatprep.mubr.f32.mxu0 %v19841_v11  ;;  %v8540_v55 = vpop.f32.mrf.mxu1 }
 0x350   :  { %v8771_v44 = vpop.f32.mrf.mxu0  ;;  %16258 = vmatmul.mubr.f32.vlgmr.msra.gmra.mxu1 %v19382_v18  ;;  %v8541_v54 = vadd.f32 %v8540_v55, %v8458_v41  ;;  %16489 = vmatmul.mubr.f32.vlgmr.msra.gmra.mxu0 %v19382_v18  ;;  %v8155_v24 = vadd.f32 %v19484_v34, %v8078_v50 }
 0x351   :  { %16374 = vmatpush1.msra.mxu1 %v19463_v22  ;;  %16407 = vmatprep.mubr.f32.mxu1 %v19841_v11  ;;  %v8542_v33 = vpop.f32.mrf.mxu1 }
 0x352   :  { %16526 = vmatprep.subr.mxu1 %v19449_v8  ;;  %v8773_v3 = vpop.f32.mrf.mxu0  ;;  %v8543_v59 = vadd.f32 %v8542_v33, %v8460_v9  ;;  %v8618_v1 = vadd.f32 %v8617_v61, %v8541_v54  ;;  %16714 = vmatprep.mubr.f32.mxu0 %v19841_v11 }
 0x353   :  { %v8693_v21 = vpop.f32.mrf.mxu1 }
 0x354   :  { %v8980_v12 = vpop.f32.mrf.mxu0  ;;  %16411 = vmatmul.mubr.f32.vlgmr.msra.gmra.mxu1 %v19422_v62  ;;  %v8694_v7 = vadd.f32 %v8693_v21, %v8618_v1  ;;  %v8620_v32 = vadd.f32 %v8619_v38, %v8543_v59 }
 0x355   :  { %16528 = vmatpush1.msra.mxu1 %v19463_v22  ;;  %16561 = vmatprep.mubr.f32.mxu1 %v19841_v11  ;;  %v8695_v8 = vpop.f32.mrf.mxu1  ;;  %v8231_v22 = vadd.f32 %v8230_v15, %v8155_v24 }
 0x356   :  { %v8982_v25 = vpop.f32.mrf.mxu0  ;;  %v8696_v20 = vadd.f32 %v8695_v8, %v8620_v32  ;;  %v8772_v40 = vadd.f32 %v8771_v44, %v8694_v7 }
 0x357   :  { %v8845_v51 = vpop.f32.mrf.mxu1  ;;  %v8309_v29 = vadd.f32 %v19501_v35, %v8231_v22 }
 0x358   :  { %v9139_v0 = vpop.f32.mrf.mxu0  ;;  %16563 = vmatmul.mubr.f32.vlgmr.msra.gmra.mxu1 %v19382_v18  ;;  %v8846_v5 = vadd.f32 %v8845_v51, %v8772_v40  ;;  %v8774_v47 = vadd.f32 %v8773_v3, %v8696_v20 }
 0x359   :  { %16810 = vmatprep.mubr.f32.mxu1 %v19841_v11  ;;  %v8847_v62 = vpop.f32.mrf.mxu1  ;;  %v8383_v49 = vadd.f32 %v8382_v60, %v8309_v29 }
 0x35a   :  { %v9141_v4 = vpop.f32.mrf.mxu0  ;;  %v8852_v52 = vadd.f32 %v8846_v5, %v19487_v31  ;;  %v8848_v46 = vadd.f32 %v8847_v62, %v8774_v47 }
 0x35b   :  { %v9062_v10 = vpop.f32.mrf.mxu1  ;;  %v8851_v27 = vadd.f32 %v8383_v49, %v19455_v30 }
 0x35c   :  { %v9293_v45 = vpop.f32.mrf.mxu0  ;;  %v8853_v63 = vadd.f32 %v8848_v46, %v19495_v26  ;;  %v9063_v57 = vadd.f32 %v9062_v10, %v8980_v12 }
 0x35d   :  { %v9064_v34 = vpop.f32.mrf.mxu1 }
 0x35e   :  { %v9295_v36 = vpop.f32.mrf.mxu0  ;;  %v9065_v18 = vadd.f32 %v9064_v34, %v8982_v25  ;;  %v9140_v56 = vadd.f32 %v9139_v0, %v9063_v57 }
 0x35f   :  { %v9215_v28 = vpop.f32.mrf.mxu1 }
 0x360   :  { %v9445_v42 = vpop.f32.mrf.mxu0  ;;  %v9216_v37 = vadd.f32 %v9215_v28, %v9140_v56  ;;  %v9142_v6 = vadd.f32 %v9141_v4, %v9065_v18 }
 0x361   :  { %v9217_v58 = vpop.f32.mrf.mxu1 }
 0x362   :  { %v9447_v23 = vpop.f32.mrf.mxu0  ;;  %v9218_v31 = vadd.f32 %v9217_v58, %v9142_v6  ;;  %v9294_v41 = vadd.f32 %v9293_v45, %v9216_v37 }
 0x363   :  { %v9367_v53 = vpop.f32.mrf.mxu1 }
 0x364   :  { %v9604_v48 = vpop.f32.mrf.mxu0  ;;  %v9368_v15 = vadd.f32 %v9367_v53, %v9294_v41  ;;  %v9296_v26 = vadd.f32 %v9295_v36, %v9218_v31 }
 0x365   :  { %v9369_v9 = vpop.f32.mrf.mxu1 }
 0x366   :  { %v9606_v43 = vpop.f32.mrf.mxu0  ;;  %v9837_v35 = vadd.f32 %v9368_v15, %v19516_v19  ;;  %v9370_v2 = vadd.f32 %v9369_v9, %v9296_v26 }
 0x367   :  { %v9527_v61 = vpop.f32.mrf.mxu1 }
 0x368   :  { %v9758_v39 = vpop.f32.mrf.mxu0  ;;  %v9838_v38 = vadd.f32 %v9370_v2, %v8851_v27  ;;  %v9528_v55 = vadd.f32 %v9527_v61, %v9445_v42 }
 0x369   :  { %v9529_v44 = vpop.f32.mrf.mxu1 }
 0x36a   :  { %v9760_v54 = vpop.f32.mrf.mxu0  ;;  %v9530_v60 = vadd.f32 %v9529_v44, %v9447_v23  ;;  %v9605_v33 = vadd.f32 %v9604_v48, %v9528_v55 }
 0x36b   :  { %v9680_v3 = vpop.f32.mrf.mxu1 }
 0x36c   :  { %v9967_v50 = vpop.f32.mrf.mxu0  ;;  %v9681_v59 = vadd.f32 %v9680_v3, %v9605_v33  ;;  %v9607_v1 = vadd.f32 %v9606_v43, %v9530_v60 }
 0x36d   :  { %v9682_v21 = vpop.f32.mrf.mxu1 }
 0x36e   :  { %v9969_v12 = vpop.f32.mrf.mxu0  ;;  %v9683_v7 = vadd.f32 %v9682_v21, %v9607_v1  ;;  %v9759_v32 = vadd.f32 %v9758_v39, %v9681_v59 }
 0x36f   :  { %v9832_v30 = vpop.f32.mrf.mxu1 }
 0x370   :  { %v10126_v8 = vpop.f32.mrf.mxu0  ;;  %v9833_v19 = vadd.f32 %v9832_v30, %v9759_v32  ;;  %v9761_v25 = vadd.f32 %v9760_v54, %v9683_v7 }
 0x371   :  { %v9834_v24 = vpop.f32.mrf.mxu1 }
 0x372   :  { %v10128_v20 = vpop.f32.mrf.mxu0  ;;  %v9839_v40 = vadd.f32 %v9833_v19, %v8852_v52  ;;  %v9835_v51 = vadd.f32 %v9834_v24, %v9761_v25 }
 0x373   :  { %v10049_v0 = vpop.f32.mrf.mxu1 }
 0x374   :  { %v10280_v5 = vpop.f32.mrf.mxu0  ;;  %v9840_v47 = vadd.f32 %v9835_v51, %v8853_v63  ;;  %v10050_v62 = vadd.f32 %v10049_v0, %v9967_v50 }
 0x375   :  { %v10051_v4 = vpop.f32.mrf.mxu1 }
 0x376   :  { %v10282_v22 = vpop.f32.mrf.mxu0  ;;  %v10052_v46 = vadd.f32 %v10051_v4, %v9969_v12  ;;  %v10127_v10 = vadd.f32 %v10126_v8, %v10050_v62 }
 0x377   :  { %v10202_v45 = vpop.f32.mrf.mxu1 }
 0x378   :  { %v10432_v57 = vpop.f32.mrf.mxu0  ;;  %v10203_v34 = vadd.f32 %v10202_v45, %v10127_v10  ;;  %v10129_v36 = vadd.f32 %v10128_v20, %v10052_v46 }
 0x379   :  { %v10204_v29 = vpop.f32.mrf.mxu1 }
 0x37a   :  { %v10434_v18 = vpop.f32.mrf.mxu0  ;;  %v10205_v56 = vadd.f32 %v10204_v29, %v10129_v36  ;;  %v10281_v28 = vadd.f32 %v10280_v5, %v10203_v34 }
 0x37b   :  { %v10354_v42 = vpop.f32.mrf.mxu1 }
 0x37c   :  { %v10591_v37 = vpop.f32.mrf.mxu0  ;;  %v10355_v52 = vadd.f32 %v10354_v42, %v10281_v28  ;;  %v10283_v6 = vadd.f32 %v10282_v22, %v10205_v56 }
 0x37d   :  { %v10356_v58 = vpop.f32.mrf.mxu1 }
 0x37e   :  { %v10593_v23 = vpop.f32.mrf.mxu0  ;;  %v10824_v63 = vadd.f32 %v10355_v52, %v9837_v35  ;;  %v10357_v49 = vadd.f32 %v10356_v58, %v10283_v6 }
 0x37f   :  { %v10514_v31 = vpop.f32.mrf.mxu1 }
 0x380   :  { %v10745_v41 = vpop.f32.mrf.mxu0  ;;  %v10825_v53 = vadd.f32 %v10357_v49, %v9838_v38  ;;  %v10515_v48 = vadd.f32 %v10514_v31, %v10432_v57 }
 0x381   :  { %v10516_v15 = vpop.f32.mrf.mxu1 }
 0x382   :  { %v10747_v26 = vpop.f32.mrf.mxu0  ;;  %v10517_v9 = vadd.f32 %v10516_v15, %v10434_v18  ;;  %v10592_v43 = vadd.f32 %v10591_v37, %v10515_v48 }
 0x383   :  { %v10667_v27 = vpop.f32.mrf.mxu1 }
 0x384   :  { %v10954_v2 = vpop.f32.mrf.mxu0  ;;  %v10668_v61 = vadd.f32 %v10667_v27, %v10592_v43  ;;  %v10594_v39 = vadd.f32 %v10593_v23, %v10517_v9 }
 0x385   :  { %v10669_v55 = vpop.f32.mrf.mxu1 }
 0x386   :  { %v10956_v44 = vpop.f32.mrf.mxu0  ;;  %v10670_v54 = vadd.f32 %v10669_v55, %v10594_v39  ;;  %v10746_v60 = vadd.f32 %v10745_v41, %v10668_v61 }
 0x387   :  { %v10819_v33 = vpop.f32.mrf.mxu1 }
 0x388   :  { %v11113_v3 = vpop.f32.mrf.mxu0  ;;  %v10820_v35 = vadd.f32 %v10819_v33, %v10746_v60  ;;  %v10748_v50 = vadd.f32 %v10747_v26, %v10670_v54 }
 0x389   :  { %v10821_v59 = vpop.f32.mrf.mxu1 }
 0x38a   :  { %v11115_v1 = vpop.f32.mrf.mxu0  ;;  %v10826_v38 = vadd.f32 %v10820_v35, %v9839_v40  ;;  %v10822_v21 = vadd.f32 %v10821_v59, %v10748_v50 }
 0x38b   :  { %v11036_v12 = vpop.f32.mrf.mxu1 }
 0x38c   :  { %v11267_v7 = vpop.f32.mrf.mxu0  ;;  %v10827_v32 = vadd.f32 %v10822_v21, %v9840_v47  ;;  %v11037_v30 = vadd.f32 %v11036_v12, %v10954_v2 }
 0x38d   :  { %v11038_v8 = vpop.f32.mrf.mxu1 }
 0x38e   :  { %v11269_v19 = vpop.f32.mrf.mxu0  ;;  %v11039_v25 = vadd.f32 %v11038_v8, %v10956_v44  ;;  %v11114_v24 = vadd.f32 %v11113_v3, %v11037_v30 }
 0x38f   :  { %v11189_v20 = vpop.f32.mrf.mxu1 }
 0x390   :  { %v11419_v51 = vpop.f32.mrf.mxu0  ;;  %v11190_v0 = vadd.f32 %v11189_v20, %v11114_v24  ;;  %v11116_v5 = vadd.f32 %v11115_v1, %v11039_v25 }
 0x391   :  { %v11191_v62 = vpop.f32.mrf.mxu1 }
 0x392   :  { %v11421_v4 = vpop.f32.mrf.mxu0  ;;  %v11192_v22 = vadd.f32 %v11191_v62, %v11116_v5  ;;  %v11268_v46 = vadd.f32 %v11267_v7, %v11190_v0 }
 0x393   :  { %v11341_v10 = vpop.f32.mrf.mxu1 }
 0x394   :  { %v11578_v45 = vpop.f32.mrf.mxu0  ;;  %v11342_v40 = vadd.f32 %v11341_v10, %v11268_v46  ;;  %v11270_v57 = vadd.f32 %v11269_v19, %v11192_v22 }
 0x395   :  { %v11343_v34 = vpop.f32.mrf.mxu1 }
 0x396   :  { %v11580_v36 = vpop.f32.mrf.mxu0  ;;  %v19538_v47 = vadd.f32 %v11342_v40, %v10824_v63  ;;  %v11344_v29 = vadd.f32 %v11343_v34, %v11270_v57 }
 0x397   :  { %v11501_v18 = vpop.f32.mrf.mxu1 }
 0x398   :  { %v11732_v56 = vpop.f32.mrf.mxu0  ;;  %v19540_v28 = vadd.f32 %v11344_v29, %v10825_v53  ;;  %v11502_v42 = vadd.f32 %v11501_v18, %v11419_v51 }
 0x399   :  { %v11503_v37 = vpop.f32.mrf.mxu1 }
 0x39a   :  { %v11734_v52 = vpop.f32.mrf.mxu0  ;;  %v11504_v6 = vadd.f32 %v11503_v37, %v11421_v4  ;;  %v11579_v58 = vadd.f32 %v11578_v45, %v11502_v42 }
 0x39b   :  { %v11654_v23 = vpop.f32.mrf.mxu1 }
 0x39c   :  { %v11927_v49 = vpop.f32.mrf.mxu0  ;;  %v11655_v31 = vadd.f32 %v11654_v23, %v11579_v58  ;;  %v11581_v41 = vadd.f32 %v11580_v36, %v11504_v6 }
 0x39d   :  { %v11656_v48 = vpop.f32.mrf.mxu1 }
 0x39e   :  { %v11929_v15 = vpop.f32.mrf.mxu0  ;;  %v11657_v26 = vadd.f32 %v11656_v48, %v11581_v41  ;;  %v11733_v9 = vadd.f32 %v11732_v56, %v11655_v31 }
 0x39f   :  { %v11806_v63 = vpop.f32.mrf.mxu1 }
 0x3a0   :  { %v12086_v43 = vpop.f32.mrf.mxu0  ;;  %v11807_v27 = vadd.f32 %v11806_v63, %v11733_v9  ;;  %v11735_v2 = vadd.f32 %v11734_v52, %v11657_v26 }
 0x3a1   :  { %v11808_v61 = vpop.f32.mrf.mxu1 }
 0x3a2   :  { %v12088_v53 = vpop.f32.mrf.mxu0  ;;  %v19542_v39 = vadd.f32 %v11807_v27, %v10826_v38  ;;  %v11809_v55 = vadd.f32 %v11808_v61, %v11735_v2 }
 0x3a3   :  { %v12009_v44 = vpop.f32.mrf.mxu1 }
 0x3a4   :  { %19910 = vst [vmem:[#allocation35_spill] sm:$0xff] %v19542_v39  ;;  %v12240_v54 = vpop.f32.mrf.mxu0  ;;  %v19544_v60 = vadd.f32 %v11809_v55, %v10827_v32  ;;  %v12010_v33 = vadd.f32 %v12009_v44, %v11927_v49 }
 0x3a5   :  { %v12011_v3 = vpop.f32.mrf.mxu1 }
 0x3a6   :  { %19911 = vst [vmem:[#allocation42_spill] sm:$0xff] %v19544_v60  ;;  %v12242_v35 = vpop.f32.mrf.mxu0  ;;  %v12012_v50 = vadd.f32 %v12011_v3, %v11929_v15  ;;  %v12087_v59 = vadd.f32 %v12086_v43, %v12010_v33 }
 0x3a7   :  { %v12162_v1 = vpop.f32.mrf.mxu1 }
 0x3a8   :  { %v12392_v21 = vpop.f32.mrf.mxu0  ;;  %v12163_v12 = vadd.f32 %v12162_v1, %v12087_v59  ;;  %v12089_v7 = vadd.f32 %v12088_v53, %v12012_v50 }
 0x3a9   :  { %v12164_v30 = vpop.f32.mrf.mxu1 }
 0x3aa   :  { %v12394_v8 = vpop.f32.mrf.mxu0  ;;  %v12165_v19 = vadd.f32 %v12164_v30, %v12089_v7  ;;  %v12241_v25 = vadd.f32 %v12240_v54, %v12163_v12 }
 0x3ab   :  { %v12314_v38 = vpop.f32.mrf.mxu1 }
 0x3ac   :  { %v12551_v24 = vpop.f32.mrf.mxu0  ;;  %v12315_v20 = vadd.f32 %v12314_v38, %v12241_v25  ;;  %v12243_v51 = vadd.f32 %v12242_v35, %v12165_v19 }
 0x3ad   :  { %v12316_v0 = vpop.f32.mrf.mxu1 }
 0x3ae   :  { %v12553_v32 = vpop.f32.mrf.mxu0  ;;  %v12317_v5 = vadd.f32 %v12316_v0, %v12243_v51 }
 0x3af   :  { %v12474_v62 = vpop.f32.mrf.mxu1 }
 0x3b0   :  { %v12705_v4 = vpop.f32.mrf.mxu0  ;;  %v12475_v22 = vadd.f32 %v12474_v62, %v12392_v21 }
 0x3b1   :  { %v12476_v46 = vpop.f32.mrf.mxu1 }
 0x3b2   :  { %v12707_v10 = vpop.f32.mrf.mxu0  ;;  %v12477_v45 = vadd.f32 %v12476_v46, %v12394_v8  ;;  %v12552_v40 = vadd.f32 %v12551_v24, %v12475_v22 }
 0x3b3   :  { %v12627_v57 = vpop.f32.mrf.mxu1 }
 0x3b4   :  { %v12872_v34 = vpop.f32.mrf.mxu0  ;;  %v12628_v36 = vadd.f32 %v12627_v57, %v12552_v40  ;;  %v12554_v18 = vadd.f32 %v12553_v32, %v12477_v45 }
 0x3b5   :  { %v12873_v29 = vadd.f32 %v12872_v34, %v12315_v20  ;;  %v12629_v56 = vpop.f32.mrf.mxu1 }
 0x3b6   :  { %v12874_v42 = vpop.f32.mrf.mxu0  ;;  %v12630_v37 = vadd.f32 %v12629_v56, %v12554_v18  ;;  %v12706_v6 = vadd.f32 %v12705_v4, %v12628_v36 }
 0x3b7   :  { %v12875_v52 = vadd.f32 %v12874_v42, %v12317_v5  ;;  %v12779_v58 = vpop.f32.mrf.mxu1 }
 0x3b8   :  { %v13031_v23 = vpop.f32.mrf.mxu0  ;;  %v12780_v49 = vadd.f32 %v12779_v58, %v12706_v6  ;;  %v12708_v31 = vadd.f32 %v12707_v10, %v12630_v37 }
 0x3b9   :  { %v12781_v41 = vpop.f32.mrf.mxu1 }
 0x3ba   :  { %v13033_v48 = vpop.f32.mrf.mxu0  ;;  %v12782_v15 = vadd.f32 %v12781_v41, %v12708_v31 }
 0x3bb   :  { %v12954_v26 = vpop.f32.mrf.mxu1 }
 0x3bc   :  { %v13185_v9 = vpop.f32.mrf.mxu0  ;;  %v12955_v63 = vadd.f32 %v12954_v26, %v12873_v29 }
 0x3bd   :  { %v12956_v43 = vpop.f32.mrf.mxu1 }
 0x3be   :  { %v13187_v27 = vpop.f32.mrf.mxu0  ;;  %v12957_v2 = vadd.f32 %v12956_v43, %v12875_v52  ;;  %v13032_v61 = vadd.f32 %v13031_v23, %v12955_v63 }
 0x3bf   :  { %v13107_v53 = vpop.f32.mrf.mxu1 }
 0x3c0   :  { %v13337_v55 = vpop.f32.mrf.mxu0  ;;  %v13108_v44 = vadd.f32 %v13107_v53, %v13032_v61  ;;  %v13034_v33 = vadd.f32 %v13033_v48, %v12957_v2 }
 0x3c1   :  { %v13338_v54 = vadd.f32 %v13337_v55, %v12780_v49  ;;  %v13109_v3 = vpop.f32.mrf.mxu1 }
 0x3c2   :  { %v13339_v35 = vpop.f32.mrf.mxu0  ;;  %v13110_v50 = vadd.f32 %v13109_v3, %v13034_v33  ;;  %v13186_v1 = vadd.f32 %v13185_v9, %v13108_v44 }
 0x3c3   :  { %v13340_v59 = vadd.f32 %v13339_v35, %v12782_v15  ;;  %v13259_v21 = vpop.f32.mrf.mxu1 }
 0x3c4   :  { %v13496_v12 = vpop.f32.mrf.mxu0  ;;  %v19546_v7 = vadd.f32 %v13259_v21, %v13186_v1  ;;  %v13188_v30 = vadd.f32 %v13187_v27, %v13110_v50 }
 0x3c5   :  { %v13261_v8 = vpop.f32.mrf.mxu1 }
 0x3c6   :  { %v13498_v19 = vpop.f32.mrf.mxu0  ;;  %v19548_v25 = vadd.f32 %v13261_v8, %v13188_v30 }
 0x3c7   :  { %v13419_v38 = vpop.f32.mrf.mxu1 }
 0x3c8   :  { %v13650_v24 = vpop.f32.mrf.mxu0  ;;  %v13420_v20 = vadd.f32 %v13419_v38, %v13338_v54 }
 0x3c9   :  { %v13421_v51 = vpop.f32.mrf.mxu1 }
 0x3ca   :  { %v13652_v0 = vpop.f32.mrf.mxu0  ;;  %v13422_v32 = vadd.f32 %v13421_v51, %v13340_v59  ;;  %v13497_v5 = vadd.f32 %v13496_v12, %v13420_v20 }
 0x3cb   :  { %v13572_v62 = vpop.f32.mrf.mxu1 }
 0x3cc   :  { %v13805_v4 = vpop.f32.mrf.mxu0  ;;  %v13499_v22 = vadd.f32 %v13498_v19, %v13422_v32  ;;  %v13573_v46 = vadd.f32 %v13572_v62, %v13497_v5 }
 0x3cd   :  { %v13574_v10 = vpop.f32.mrf.mxu1 }
 0x3ce   :  { %v13807_v45 = vpop.f32.mrf.mxu0  ;;  %v13575_v40 = vadd.f32 %v13574_v10, %v13499_v22  ;;  %v13651_v57 = vadd.f32 %v13650_v24, %v13573_v46 }
 0x3cf   :  { %v13724_v34 = vpop.f32.mrf.mxu1 }
 0x3d0   :  { %v13964_v36 = vpop.f32.mrf.mxu0  ;;  %v13653_v29 = vadd.f32 %v13652_v0, %v13575_v40  ;;  %v19550_v18 = vadd.f32 %v13724_v34, %v13651_v57 }
 0x3d1   :  { %v13726_v56 = vpop.f32.mrf.mxu1 }
 0x3d2   :  { %v13966_v42 = vpop.f32.mrf.mxu0  ;;  %v19552_v37 = vadd.f32 %v13726_v56, %v13653_v29 }
 0x3d3   :  { %v13887_v52 = vpop.f32.mrf.mxu1 }
 0x3d4   :  { %v19554_v6 = vpop.f32.mrf.mxu0  ;;  %v13888_v0 = vadd.f32 %v13887_v52, %v13805_v4 }
 0x3d5   :  { %v13889_v58 = vpop.f32.mrf.mxu1 }
 0x3d6   :  { %v19556_v23 = vpop.f32.mrf.mxu0  ;;  %v13890_v62 = vadd.f32 %v13889_v58, %v13807_v45  ;;  %v13965_v40 = vadd.f32 %v13964_v36, %v13888_v0 }
 0x3d7   :  { %v14040_v49 = vpop.f32.mrf.mxu1 }
 0x3d8   :  { %v14270_v31 = vpop.f32.mrf.mxu0  ;;  %v13967_v56 = vadd.f32 %v13966_v42, %v13890_v62  ;;  %v14041_v17 = vadd.f32 %v14040_v49, %v13965_v40  ;;  %v16622_v42 = vld [vmem:[%s19727_s8] sm:$0x3]  ;;  %s17741_s8 = smov [#allocation2]  }
 0x3d9   :  { %v14042_v41 = vpop.f32.mrf.mxu1  ;;  %s17677_s14 = sshll.u32 %s17741_s8, 4  ;;  %s17678_s14 = int_to_ptr.vmem [resolvable:$true] %s17677_s14 }
 0x3da   :  { %v14272_v48 = vpop.f32.mrf.mxu0  ;;  %v14043_v45 = vadd.f32 %v14042_v41, %v13967_v56  ;;  %v14119_v49 = vadd.f32 %v19554_v6, %v14041_v17  ;;  %s17708_s15 = scalar_lea.vmem %s17678_s14, 128  ;;  %p17713_p1 = scmp.lt.s32.totalorder %s17678_s14, %s17678_s14 }
 0x3db   :  { %v19558_v15 = vpop.f32.mrf.mxu1  ;;  %p17709_p0 = scmp.ne.s32.totalorder %s17678_s14, %s17708_s15  ;;  %p17714_p2 = scmp.lt.s32.totalorder %s17708_s15, %s17708_s15 }
 0x3dc   :  { %v14429_v26 = vpop.f32.mrf.mxu0  ;;  %v14121_v41 = vadd.f32 %v19556_v23, %v14043_v45 }
 0x3dd   :  { %v19560_v9 = vpop.f32.mrf.mxu1  ;;  %p17715_p3 = por %p17714_p2, %p17713_p1 }
 0x3de   :  { %v14431_v63 = vpop.f32.mrf.mxu0 }
 0x3df   :  { %v14352_v43 = vpop.f32.mrf.mxu1  ;;  %p17716_p4 = pnand %p17715_p3, %p17709_p0 }
 0x3e0   :  { %v19562_v27 = vpop.f32.mrf.mxu0  ;;  %v14353_v4 = vadd.f32 %v14352_v43, %v14270_v31 }
 0x3e1   :  { %v14354_v2 = vpop.f32.mrf.mxu1 }
 0x3e2   :  { %v19564_v61 = vpop.f32.mrf.mxu0  ;;  %v14355_v52 = vadd.f32 %v14354_v2, %v14272_v48  ;;  %v14430_v31 = vadd.f32 %v14429_v26, %v14353_v4 }
 0x3e4   :  { %v19566_v53 = vpop.f32.mrf.mxu1  ;;  %v14742_v55 = vpop.f32.mrf.mxu0  ;;  %v14432_v48 = vadd.f32 %v14431_v63, %v14355_v52 }
 0x3e6   :  { %v19568_v44 = vpop.f32.mrf.mxu1  ;;  %v14744_v54 = vpop.f32.mrf.mxu0 }
 0x3e7   :  { %v14508_v6 = vadd.f32 %v19568_v44, %v14432_v48 }
 0x3e8   :  { %v19570_v33 = vpop.f32.mrf.mxu1  ;;  %v14901_v3 = vpop.f32.mrf.mxu0 }
 0x3e9   :  { %v14586_v4 = vadd.f32 %v19564_v61, %v14508_v6 }
 0x3ea   :  { %v19572_v35 = vpop.f32.mrf.mxu1  ;;  %v14903_v50 = vpop.f32.mrf.mxu0 }
 0x3ec   :  { %v14824_v59 = vpop.f32.mrf.mxu1  ;;  %v15055_v1 = vpop.f32.mrf.mxu0 }
 0x3ed   :  { %v14825_v22 = vadd.f32 %v14824_v59, %v14742_v55 }
 0x3ee   :  { %v14826_v21 = vpop.f32.mrf.mxu1  ;;  %v15057_v12 = vpop.f32.mrf.mxu0 }
 0x3ef   :  { %v14827_v57 = vadd.f32 %v14826_v21, %v14744_v54  ;;  %v14902_v16 = vadd.f32 %v14901_v3, %v14825_v22 }
 0x3f0   :  { %v14977_v30 = vpop.f32.mrf.mxu1  ;;  %v15207_v8 = vpop.f32.mrf.mxu0 }
 0x3f1   :  { %v14904_v11 = vadd.f32 %v14903_v50, %v14827_v57  ;;  %v14978_v58 = vadd.f32 %v14977_v30, %v14902_v16  ;;  %v16631_v30 = vsel %vm16629_vm15, %v16622_v42, 0 }
 0x3f2   :  { %v14979_v19 = vpop.f32.mrf.mxu1  ;;  %v15209_v38 = vpop.f32.mrf.mxu0  ;;  %v19590_v63 = vand.u32 4294901760, %v16631_v30 }
 0x3f3   :  { %v14980_v3 = vadd.f32 %v14979_v19, %v14904_v11  ;;  %v15056_v16 = vadd.f32 %v15055_v1, %v14978_v58  ;;  %v14506_v11 = vadd.f32 %v19566_v53, %v14430_v31 }
 0x3f4   :  { %v15129_v24 = vpop.f32.mrf.mxu1  ;;  %v15366_v20 = vpop.f32.mrf.mxu0 }
 0x3f5   :  { %v15058_v62 = vadd.f32 %v15057_v12, %v14980_v3  ;;  %v15130_v23 = vadd.f32 %v15129_v24, %v15056_v16  ;;  %v14584_v44 = vadd.f32 %v19562_v27, %v14506_v11  ;;  %v19604_v27 = vpop.permute.xlu1 %11817 }
 0x3f6   :  { %v15131_v51 = vpop.f32.mrf.mxu1  ;;  %v15368_v32 = vpop.f32.mrf.mxu0 }
 0x3f7   :  { %v15132_v12 = vadd.f32 %v15131_v51, %v15058_v62 }
 0x3f8   :  { %v15289_v5 = vpop.f32.mrf.mxu1  ;;  %v19574_v46 = vpop.f32.mrf.mxu0 }
 0x3f9   :  { %v15290_v59 = vadd.f32 %v15289_v5, %v15207_v8  ;;  %v14193_v5 = vadd.f32 %v19558_v15, %v14119_v49  ;;  %v14658_v49 = vadd.f32 %v19570_v33, %v14584_v44 }
 0x3fa   :  { %v15291_v10 = vpop.f32.mrf.mxu1  ;;  %v19576_v34 = vpop.f32.mrf.mxu0 }
 0x3fb   :  { %v15292_v36 = vadd.f32 %v15291_v10, %v15209_v38  ;;  %v15367_v8 = vadd.f32 %v15366_v20, %v15290_v59  ;;  %v19602_v59 = vpop.permute.xlu0 %16575 }
 0x3fc   :  { %v15442_v29 = vpop.f32.mrf.mxu1  ;;  %v15712_v14 = vpop.f32.mrf.mxu0 }
 0x3fd   :  { %v15369_v38 = vadd.f32 %v15368_v32, %v15292_v36  ;;  %v15443_v32 = vadd.f32 %v15442_v29, %v15367_v8 }
 0x3fe   :  { %v15444_v13 = vpop.f32.mrf.mxu1  ;;  %v15714_v60 = vpop.f32.mrf.mxu0 }
 0x3ff   :  { %v15445_v40 = vadd.f32 %v15444_v13, %v15369_v38  ;;  %v14664_v38 = vadd.f32 %v14658_v49, %v19550_v18 }
 0x400   :  { %v19578_v39 = vpop.f32.mrf.mxu1  ;;  %v15871_v55 = vpop.f32.mrf.mxu0 }
 0x401   :  { %v15523_v51 = vadd.f32 %v19576_v34, %v15445_v40 }
 0x402   :  { %v19580_v54 = vpop.f32.mrf.mxu1  ;;  %v15873_v50 = vpop.f32.mrf.mxu0 }
 0x403   :  { %v15597_v33 = vadd.f32 %v19580_v54, %v15523_v51 }
 0x404   :  { %v15794_v43 = vpop.f32.mrf.mxu1  ;;  %v16025_v21 = vpop.f32.mrf.mxu0 }
 0x405   :  { %v15795_v2 = vadd.f32 %v15794_v43, %v15712_v14  ;;  %v14195_v14 = vadd.f32 %v19560_v9, %v14121_v41  ;;  %v19597_v9 = vsub.f32 %v16631_v30, %v19590_v63  ;;  %v11820_v43 = vadd.f32 %v19604_v27, %v19538_v47 }
 0x406   :  { %v15796_v0 = vpop.f32.mrf.mxu1  ;;  %v16027_v17 = vpop.f32.mrf.mxu0  ;;  %v11821_v41 = vadd.f32 %v19604_v27, %v19540_v28 }
 0x407   :  { %v15797_v22 = vadd.f32 %v15796_v0, %v15714_v60  ;;  %v15872_v10 = vadd.f32 %v15871_v55, %v15795_v2  ;;  %v14662_v60 = vadd.f32 %v14193_v5, %v19546_v7  ;;  %v14663_v24 = vadd.f32 %v14195_v14, %v19548_v25 }
 0x408   :  { %v15947_v26 = vpop.f32.mrf.mxu1  ;;  %v16177_v20 = vpop.f32.mrf.mxu0  ;;  %v15521_v7 = vadd.f32 %v19574_v46, %v15443_v32  ;;  %v14660_v25 = vadd.f32 %v19572_v35, %v14586_v4  ;;  %v19609_v31 = vand.u32 4294901760, %v19597_v9 }
 0x409   :  { %v15874_v1 = vadd.f32 %v15873_v50, %v15797_v22  ;;  %v15948_v19 = vadd.f32 %v15947_v26, %v15872_v10  ;;  %v15599_v45 = vadd.f32 %v15130_v23, %v14662_v60  ;;  %v15600_v61 = vadd.f32 %v15132_v12, %v14663_v24 }
 0x40a   :  { %v15949_v15 = vpop.f32.mrf.mxu1  ;;  %v16179_v53 = vpop.f32.mrf.mxu0  ;;  %v15595_v16 = vadd.f32 %v19578_v39, %v15521_v7  ;;  %v14665_v0 = vadd.f32 %v14660_v25, %v19552_v37  ;;  %v16718_v47 = vsub.f32 %v19597_v9, %v19609_v31 }
 0x40b   :  { %v15950_v57 = vadd.f32 %v15949_v15, %v15874_v1  ;;  %v16026_v56 = vadd.f32 %v16025_v21, %v15948_v19 }
 0x40c   :  { %v16099_v52 = vpop.f32.mrf.mxu1  ;;  %v16336_v58 = vpop.f32.mrf.mxu0  ;;  %v15601_v10 = vadd.f32 %v15595_v16, %v14664_v38 }
 0x40d   :  { %v16028_v29 = vadd.f32 %v16027_v17, %v15950_v57  ;;  %v16100_v13 = vadd.f32 %v16099_v52, %v16026_v56  ;;  %v15602_v17 = vadd.f32 %v15597_v33, %v14665_v0 }
 0x40e   :  { %v16101_v55 = vpop.f32.mrf.mxu1  ;;  %v16338_v50 = vpop.f32.mrf.mxu0 }
 0x40f   :  { %v16569_v36 = vadd.f32 %v16100_v13, %v15599_v45  ;;  %v16102_v42 = vadd.f32 %v16101_v55, %v16028_v29  ;;  %v19633_v13 = vand.u32 4294901760, %v16718_v47 }
 0x410   :  { %v16259_v3 = vpop.f32.mrf.mxu1  ;;  %v16490_v62 = vpop.f32.mrf.mxu0 }
 0x411   :  { %v16578_v46 = vadd.f32 %v19602_v59, %v16569_v36  ;;  %v16570_v34 = vadd.f32 %v16102_v42, %v15600_v61  ;;  %v16260_v48 = vadd.f32 %v16259_v3, %v16177_v20 }
 0x412   :  { %v16261_v35 = vpop.f32.mrf.mxu1  ;;  %v16492_v37 = vpop.f32.mrf.mxu0 }
 0x413   :  { %v16586_v2 = vrot.slane %v16578_v46, 1  ;;  %v16579_v21 = vadd.f32 %v19602_v59, %v16570_v34  ;;  %v16262_v30 = vadd.f32 %v16261_v35, %v16179_v53  ;;  %v16337_v8 = vadd.f32 %v16336_v58, %v16260_v48  ;;  %v19912_v46 = vld [vmem:[#allocation35_spill] sm:$0xff]  ;;  %v19913_v48 = vld [vmem:[#allocation42_spill] sm:$0xff] }
 0x414   :  { %v16412_v5 = vpop.f32.mrf.mxu1  ;;  %v11822_v34 = vadd.f32 %v19604_v27, %v19912_v46 }
 0x415   :  { %v16610_v28 = vmul.f32 0.3, %v16586_v2  ;;  %v16587_v39 = vrot.slane %v16579_v21, 1  ;;  %v16339_v22 = vadd.f32 %v16338_v50, %v16262_v30  ;;  %v16413_v54 = vadd.f32 %v16412_v5, %v16337_v8 }
 0x416   :  { %v16414_v11 = vpop.f32.mrf.mxu1  ;;  %vm16602_vm1 = vcmp.ge.f32.partialorder %v16586_v2, 0.0  ;;  %v16594_v6 = vsel %vm3095_vm10, %v11820_v43, %v16586_v2  ;;  %v11823_v43 = vadd.f32 %v19604_v27, %v19913_v48  ;;  %v19914_v21 = vmov 0.0  }
 0x417   :  { %v16611_v26 = vmul.f32 0.3, %v16587_v39  ;;  %v16415_v18 = vadd.f32 %v16414_v11, %v16339_v22  ;;  %v16491_v14 = vadd.f32 %v16490_v62, %v16413_v54  ;;  %vm16603_vm2 = vcmp.ge.f32.partialorder %v16587_v39, 0.0 }
 0x418   :  { %v16564_v23 = vpop.f32.mrf.mxu1  ;;  %v16618_v1 = vsel %vm16602_vm1, %v16586_v2, %v16610_v28  ;;  %v16595_v19 = vsel %vm3095_vm10, %v11821_v41, %v16587_v39  ;;  %vm16598_vm3 = vcmp.ge.f32.partialorder %v16594_v6, 0.0  ;;  %v16606_v20 = vmul.f32 0.3, %v16594_v6 }
 0x419   :  { %v16493_v32 = vadd.f32 %v16492_v37, %v16415_v18  ;;  %v16565_v40 = vadd.f32 %v16564_v23, %v16491_v14  ;;  %v16619_v15 = vsel %vm16603_vm2, %v16587_v39, %v16611_v26  ;;  %v16635_v60 = vsel %vm16633_vm0, %v16618_v1, 0 }
 0x41a   :  { %v16566_v12 = vpop.f32.mrf.mxu1  ;;  %v16638_v57 = vsel %vm16633_vm0, %v16619_v15, 0  ;;  %v19627_v56 = vand.u32 4294901760, %v16635_v60  ;;  %vm16599_vm4 = vcmp.ge.f32.partialorder %v16595_v19, 0.0  ;;  %v16607_v53 = vmul.f32 0.3, %v16595_v19 }
 0x41b   :  { %v16571_v44 = vadd.f32 %v16565_v40, %v15601_v10  ;;  %v16567_v4 = vadd.f32 %v16566_v12, %v16493_v32  ;;  %v19629_v52 = vand.u32 4294901760, %v16638_v57  ;;  %v16614_v24 = vsel %vm16598_vm3, %v16594_v6, %v16606_v20 }
 0x41c   :  { %v16615_v45 = vsel %vm16599_vm4, %v16595_v19, %v16607_v53  ;;  %v19631_v29 = vand.u32 4294901760, %v16614_v24  ;;  %v16761_v58 = vsub.f32 %v16635_v60, %v19627_v56 }
 0x41d   :  { %v16580_v7 = vadd.f32 %v19602_v59, %v16571_v44  ;;  %v16572_v51 = vadd.f32 %v16567_v4, %v15602_v17  ;;  %16675 = vmatprep.subr.mxu0 %v19629_v52  ;;  %v19638_v55 = vand.u32 4294901760, %v16615_v45  ;;  %v16755_v61 = vsub.f32 %v16638_v57, %v19629_v52 }
 0x41e   :  { %16677 = vmatpush1.msra.mxu0 %v19627_v56  ;;  %v16773_v36 = vsub.f32 %v16614_v24, %v19631_v29  ;;  %v16762_v42 = vand.u32 4294901760, %v16761_v58 }
 0x41f   :  { %v16588_v49 = vrot.slane %v16580_v7, 1  ;;  %v16581_v25 = vadd.f32 %v19602_v59, %v16572_v51  ;;  %16679 = vmatprep.subr.mxu0 %v19638_v55  ;;  %v16767_v3 = vsub.f32 %v16615_v45, %v19638_v55  ;;  %v16756_v50 = vand.u32 4294901760, %v16755_v61  ;;  %v16627_v7 = vpop.permute.xlu0 %16626 }
 0x420   :  { %16681 = vmatpush1.msra.mxu0 %v19631_v29  ;;  %v16763_v41 = vsub.f32 %v16761_v58, %v16762_v42  ;;  %v16774_v16 = vand.u32 4294901760, %v16773_v36 }
 0x421   :  { %v16612_v33 = vmul.f32 0.3, %v16588_v49  ;;  %v16589_v35 = vrot.slane %v16581_v25, 1  ;;  %16720 = vmatmul.mubr.f32.vlgmr.msra.gmra.mxu0 %v19633_v13  ;;  %16848 = vmatprep.subr.mxu0 %v16755_v61  ;;  %v16757_v59 = vsub.f32 %v16755_v61, %v16756_v50  ;;  %v16768_v2 = vand.u32 4294901760, %v16767_v3 }
 0x422   :  { %16851 = vmatpush1.msra.mxu0 %v16761_v58  ;;  %16890 = vmatprep.mubr.f32.mxu0 %v19914_v21  ;;  %v16764_v30 = vand.u32 4294901760, %v16763_v41  ;;  %v16775_v8 = vsub.f32 %v16773_v36, %v16774_v16  ;;  %vm16604_vm5 = vcmp.ge.f32.partialorder %v16588_v49, 0.0  ;;  %v16596_v38 = vsel %vm3095_vm10, %v11822_v34, %v16588_v49 }
 0x423   :  { %v16613_v27 = vmul.f32 0.3, %v16589_v35  ;;  %16854 = vmatprep.subr.mxu0 %v16767_v3  ;;  %v16758_v0 = vand.u32 4294901760, %v16757_v59  ;;  %v16769_v5 = vsub.f32 %v16767_v3, %v16768_v2  ;;  %vm16605_vm6 = vcmp.ge.f32.partialorder %v16589_v35, 0.0 }
 0x424   :  { %16857 = vmatpush1.msra.mxu0 %v16773_v36  ;;  %v16776_v62 = vand.u32 4294901760, %v16775_v8  ;;  %v16620_v47 = vsel %vm16604_vm5, %v16588_v49, %v16612_v33  ;;  %v16597_v28 = vsel %vm3095_vm10, %v11823_v43, %v16589_v35  ;;  %vm16600_vm7 = vcmp.ge.f32.partialorder %v16596_v38, 0.0 }
 0x425   :  { %16759 = vmatprep.subr.mxu1 %v16758_v0  ;;  %16893 = vmatmul.mubr.f32.vlgmr.msra.gmra.mxu0 %v19597_v9  ;;  %v16770_v39 = vand.u32 4294901760, %v16769_v5  ;;  %v16621_v22 = vsel %vm16605_vm6, %v16589_v35, %v16613_v27  ;;  %v16641_v54 = vsel %vm16633_vm0, %v16620_v47, 0  ;;  %vm16601_vm8 = vcmp.ge.f32.partialorder %v16597_v28, 0.0 }
 0x426   :  { %17008 = vmatprep.subr.mxu0 %v16756_v50  ;;  %16765 = vmatpush1.msra.mxu1 %v16764_v30  ;;  %v16644_v10 = vsel %vm16633_vm0, %v16621_v22, 0  ;;  %v19658_v17 = vand.u32 4294901760, %v16641_v54  ;;  %v16609_v11 = vmul.f32 0.3, %v16597_v28  ;;  %v16608_v6 = vmul.f32 0.3, %v16596_v38 }
 0x427   :  { %17012 = vmatpush1.msra.mxu0 %v16762_v42  ;;  %16771 = vmatprep.subr.mxu1 %v16770_v39  ;;  %v19660_v26 = vand.u32 4294901760, %v16644_v10 }
 0x428   :  { %17016 = vmatprep.subr.mxu0 %v16768_v2  ;;  %16777 = vmatpush1.msra.mxu1 %v16776_v62  ;;  %v16617_v18 = vsel %vm16601_vm8, %v16597_v28, %v16609_v11  ;;  %v16616_v14 = vsel %vm16600_vm7, %v16596_v38, %v16608_v6  ;;  %v17252_v19 = vsub.f32 %v16641_v54, %v19658_v17 }
 0x429   :  { %17020 = vmatpush1.msra.mxu0 %v16774_v16  ;;  %17053 = vmatprep.mubr.f32.mxu0 %v19914_v21  ;;  %v19664_v37 = vand.u32 4294901760, %v16617_v18  ;;  %v19666_v23 = vand.u32 4294901760, %v16616_v14  ;;  %v17246_v1 = vsub.f32 %v16644_v10, %v19660_v26  ;;  %v19915_v10 = vld [vmem:[#allocation9_spill] sm:$0xff] }
 0x42a   :  { %16812 = vmatmul.mubr.f32.vlgmr.msra.gmra.mxu1 %v19590_v63  ;;  %16928 = vmatprep.subr.mxu1 %v19629_v52  ;;  %v17253_v15 = vand.u32 4294901760, %v17252_v19 }
 0x42b   :  { %17055 = vmatmul.mubr.f32.vlgmr.msra.gmra.mxu0 %v19590_v63  ;;  %17166 = vmatprep.subr.mxu0 %v19660_v26  ;;  %v17258_v20 = vsub.f32 %v16617_v18, %v19664_v37  ;;  %v17264_v32 = vsub.f32 %v16616_v14, %v19666_v23  ;;  %v17247_v40 = vand.u32 4294901760, %v17246_v1 }
 0x42c   :  { %16930 = vmatpush1.msra.mxu1 %v19627_v56  ;;  %17168 = vmatpush1.msra.mxu0 %v19658_v17  ;;  %v17254_v53 = vsub.f32 %v17252_v19, %v17253_v15 }
 0x42d   :  { %16932 = vmatprep.subr.mxu1 %v19638_v55  ;;  %17170 = vmatprep.subr.mxu0 %v19664_v37  ;;  %v17248_v60 = vsub.f32 %v17246_v1, %v17247_v40  ;;  %v17259_v12 = vand.u32 4294901760, %v17258_v20  ;;  %v17265_v57 = vand.u32 4294901760, %v17264_v32 }
 0x42e   :  { %16934 = vmatpush1.msra.mxu1 %v19631_v29  ;;  %16967 = vmatprep.mubr.f32.mxu1 %v19914_v21 }
 0x42f   :  { %17172 = vmatpush1.msra.mxu0 %v19666_v23  ;;  %17205 = vmatprep.mubr.f32.mxu0 %v19914_v21  ;;  %v17249_v44 = vand.u32 4294901760, %v17248_v60  ;;  %v17260_v4 = vsub.f32 %v17258_v20, %v17259_v12  ;;  %v17266_v24 = vsub.f32 %v17264_v32, %v17265_v57  ;;  %v19917_v60 = vld [vmem:[#allocation7_spill] sm:$0xff] }
 0x430   :  { %16971 = vmatmul.mubr.f32.vlgmr.msra.gmra.mxu1 %v19609_v31  ;;  %17090 = vmatprep.subr.mxu1 %v19629_v52  ;;  %v17255_v52 = vand.u32 4294901760, %v17254_v53 }
 0x431   :  { %17211 = vmatmul.mubr.f32.vlgmr.msra.gmra.mxu0 %v19633_v13  ;;  %17339 = vmatprep.subr.mxu0 %v17246_v1  ;;  %v17261_v45 = vand.u32 4294901760, %v17260_v4  ;;  %v19918_v4 = vld [vmem:[#allocation8_spill] sm:$0xff] }
 0x432   :  { %17092 = vmatpush1.msra.mxu1 %v19627_v56  ;;  %17342 = vmatpush1.msra.mxu0 %v17252_v19  ;;  %v17267_v56 = vand.u32 4294901760, %v17266_v24 }
 0x433   :  { %17094 = vmatprep.subr.mxu1 %v19638_v55  ;;  %17345 = vmatprep.subr.mxu0 %v17258_v20 }
 0x434   :  { %17096 = vmatpush1.msra.mxu1 %v19631_v29  ;;  %17129 = vmatprep.mubr.f32.mxu1 %v19914_v21 }
 0x435   :  { %17348 = vmatpush1.msra.mxu0 %v17264_v32  ;;  %17131 = vmatmul.mubr.f32.vlgmr.msra.gmra.mxu1 %v19590_v63 }
 0x436   :  { %17250 = vmatprep.subr.mxu1 %v17249_v44  ;;  %17381 = vmatprep.mubr.f32.mxu0 %v19914_v21 }
 0x437   :  { %17499 = vmatprep.subr.mxu0 %v17247_v40  ;;  %17256 = vmatpush1.msra.mxu1 %v17255_v52 }
 0x438   :  { %17384 = vmatmul.mubr.f32.vlgmr.msra.gmra.mxu0 %v19597_v9  ;;  %17262 = vmatprep.subr.mxu1 %v17261_v45 }
 0x439   :  { %17503 = vmatpush1.msra.mxu0 %v17253_v15  ;;  %17268 = vmatpush1.msra.mxu1 %v17267_v56 }
 0x43a   :  { %17507 = vmatprep.subr.mxu0 %v17259_v12  ;;  %17301 = vmatprep.mubr.f32.mxu1 %v19914_v21 }
 0x43b   :  { %17511 = vmatpush1.msra.mxu0 %v17265_v57  ;;  %17303 = vmatmul.mubr.f32.vlgmr.msra.gmra.mxu1 %v19590_v63 }
 0x43c   :  { %17419 = vmatprep.subr.mxu1 %v19660_v26  ;;  %17458 = vmatprep.mubr.f32.mxu1 %v19914_v21 }
 0x43d   :  { %17421 = vmatpush1.msra.mxu1 %v19658_v17  ;;  %17544 = vmatprep.mubr.f32.mxu0 %v19914_v21 }
 0x43e   :  { %17423 = vmatprep.subr.mxu1 %v19664_v37  ;;  %17546 = vmatmul.mubr.f32.vlgmr.msra.gmra.mxu0 %v19590_v63 }
 0x43f   :  { %17425 = vmatpush1.msra.mxu1 %v19666_v23 }
 0x440   :  { %17462 = vmatmul.mubr.f32.vlgmr.msra.gmra.mxu1 %v19609_v31  ;;  %17581 = vmatprep.subr.mxu1 %v19660_v26  ;;  %v19916_v26 = vld [vmem:[#allocation6_spill] sm:$0xff] }
 0x441   :  { %17583 = vmatpush1.msra.mxu1 %v19658_v17  ;;  %17620 = vmatprep.mubr.f32.mxu1 %v19914_v21 }
 0x442   :  { %17585 = vmatprep.subr.mxu1 %v19664_v37 }
 0x443   :  { %17587 = vmatpush1.msra.mxu1 %v19666_v23 }
 0x444   :  { %17622 = vmatmul.mubr.f32.vlgmr.msra.gmra.mxu1 %v19590_v63 }
 0x4e1   :  { %v16721_v9 = vpop.f32.mrf.mxu0 }
 0x4e2   :  { %v16722_v36 = vadd.f32 %v16721_v9, %v16627_v7 }
 0x4e3   :  { %v16723_v29 = vpop.f32.mrf.mxu0 }
 0x4e4   :  { %v16724_v55 = vadd.f32 %v16723_v29, %v16627_v7 }
 0x4e5   :  { %v16894_v13 = vpop.f32.mrf.mxu0 }
 0x4e7   :  { %v16896_v58 = vpop.f32.mrf.mxu0 }
 0x4ea   :  { %v16813_v51 = vpop.f32.mrf.mxu1 }
 0x4eb   :  { %v17056_v31 = vpop.f32.mrf.mxu0  ;;  %v16814_v25 = vadd.f32 %v16813_v51, %v16722_v36 }
 0x4ec   :  { %v16815_v61 = vpop.f32.mrf.mxu1 }
 0x4ed   :  { %v16816_v42 = vadd.f32 %v16815_v61, %v16724_v55  ;;  %v17058_v49 = vpop.f32.mrf.mxu0  ;;  %v16895_v48 = vadd.f32 %v16894_v13, %v16814_v25 }
 0x4ef   :  { %v16897_v50 = vadd.f32 %v16896_v58, %v16816_v42  ;;  %v19919_v58 = vld [vmem:[#allocation5_spill] sm:$0xff] }
 0x4f0   :  { %v16972_v3 = vpop.f32.mrf.mxu1 }
 0x4f1   :  { %v17212_v46 = vpop.f32.mrf.mxu0  ;;  %v16973_v16 = vadd.f32 %v16972_v3, %v16895_v48 }
 0x4f2   :  { %v16974_v34 = vpop.f32.mrf.mxu1  ;;  %v17213_v2 = vadd.f32 %v17212_v46, %v16627_v7 }
 0x4f3   :  { %v16975_v43 = vadd.f32 %v16974_v34, %v16897_v50  ;;  %v17214_v41 = vpop.f32.mrf.mxu0  ;;  %v17057_v21 = vadd.f32 %v17056_v31, %v16973_v16 }
 0x4f4   :  { %v17215_v8 = vadd.f32 %v17214_v41, %v16627_v7 }
 0x4f5   :  { %v17132_v63 = vpop.f32.mrf.mxu1  ;;  %v17059_v59 = vadd.f32 %v17058_v49, %v16975_v43 }
 0x4f6   :  { %v17133_v28 = vadd.f32 %v17132_v63, %v17057_v21 }
 0x4f7   :  { %v17134_v33 = vpop.f32.mrf.mxu1 }
 0x4f8   :  { %v17385_v35 = vpop.f32.mrf.mxu0  ;;  %v17135_v0 = vadd.f32 %v17134_v33, %v17059_v59  ;;  %v17632_v18 = vadd.f32 %v17133_v28, %v19916_v26 }
 0x4fa   :  { %v17387_v27 = vpop.f32.mrf.mxu0  ;;  %v17633_v17 = vadd.f32 %v17135_v0, %v19915_v10  ;;  %v17640_v15 = vmul.f32 0.3, %v17632_v18  ;;  %vm17636_vm10 = vcmp.ge.f32.partialorder %v17632_v18, 0.0 }
 0x4fb   :  { %v17304_v30 = vpop.f32.mrf.mxu1 }
 0x4fc   :  { %v17305_v38 = vadd.f32 %v17304_v30, %v17213_v2  ;;  %v17641_v19 = vmul.f32 0.3, %v17633_v17  ;;  %vm17637_vm9 = vcmp.ge.f32.partialorder %v17633_v17, 0.0  ;;  %v17644_v52 = vsel %vm17636_vm10, %v17632_v18, %v17640_v15 }
 0x4fd   :  { %v17306_v5 = vpop.f32.mrf.mxu1 }
 0x4fe   :  { %v17307_v62 = vadd.f32 %v17306_v5, %v17215_v8  ;;  %v17386_v47 = vadd.f32 %v17385_v35, %v17305_v38  ;;  %v17547_v54 = vpop.f32.mrf.mxu0  ;;  %v17645_v53 = vsel %vm17637_vm9, %v17633_v17, %v17641_v19 }
 0x4ff   :  { %v17652_v56 = vcombine.low %v17644_v52, %v17645_v53 }
 0x500   :  { %v17388_v39 = vadd.f32 %v17387_v27, %v17307_v62  ;;  %v17463_v22 = vpop.f32.mrf.mxu1  ;;  %v17549_v23 = vpop.f32.mrf.mxu0 }
 0x501   :  { %v17464_v11 = vadd.f32 %v17463_v22, %v17386_v47  ;;  %v17660_v7 = vrot.slane %v17652_v56, %v19919_v58 }
 0x502   :  { %v17465_v6 = vpop.f32.mrf.mxu1 }
 0x503   :  { %v17466_v14 = vadd.f32 %v17465_v6, %v17388_v39  ;;  %v17548_v37 = vadd.f32 %v17547_v54, %v17464_v11 }
 0x504   :  { %v17623_v1 = vpop.f32.mrf.mxu1 }
 0x505   :  { %v17550_v20 = vadd.f32 %v17549_v23, %v17466_v14  ;;  %v17624_v32 = vadd.f32 %v17623_v1, %v17548_v37 }
 0x506   :  { %v17625_v40 = vpop.f32.mrf.mxu1 }
 0x507   :  { %v17634_v12 = vadd.f32 %v17624_v32, %v19917_v60  ;;  %v17626_v57 = vadd.f32 %v17625_v40, %v17550_v20 }
 0x509   :  { %v17642_v44 = vmul.f32 0.3, %v17634_v12  ;;  %v17635_v24 = vadd.f32 %v17626_v57, %v19918_v4  ;;  %vm17638_vm11 = vcmp.ge.f32.partialorder %v17634_v12, 0.0 }
 0x50b   :  { %vm17639_vm12 = vcmp.ge.f32.partialorder %v17635_v24, 0.0  ;;  %v17643_v45 = vmul.f32 0.3, %v17635_v24  ;;  %v17646_v9 = vsel %vm17638_vm11, %v17634_v12, %v17642_v44 }
 0x50d   :  { %v17647_v29 = vsel %vm17639_vm12, %v17635_v24, %v17643_v45 }
 0x50e   :  { %v17653_v13 = vcombine.low %v17646_v9, %v17647_v29 }
 0x510   :  { %v17667_v51 = vrot.slane %v17653_v13, %v19919_v58 }
 0x512   :  { %v17668_v55 = vcombine.low %v17660_v7, %v17667_v51 }
 0x514   :  { %17670 = vst [vmem:[#allocation2] sm:$0xff] %v17668_v55 }
 0x515   :  { %17719 = shalt.err (!%p17716_p4)
}
 0x516   :  { %17680 = dma.vmem_to_hbm [thread:$0]  %s17678_s14, 128, %s19729_s10, [#allocation3]  }
 0x517   :  { %17728 = dma.done.wait [#allocation3], 128  }
 0x518   :  { %17729 = vsyncadd [#allocation3], 4294967168 }
 0x519   :  { %17684 = vsyncpa [#allocation3], 1 }

</bundles_post_ra>
